<compile_context>
chip_gen: v7x
topology: tpu7x:2x2x1
jax: 0.10.0
libtpu: 0.0.40
codegen_flags: <defaults>
</compile_context>

<pallas_src>
import math
from functools import partial

import jax
import jax.numpy as jnp
import numpy as np
from jax.experimental import pallas as pl
from jax.experimental.pallas import tpu as pltpu


# ----------------------------------------------------------------------------
# Pallas kernels
# ----------------------------------------------------------------------------
def _stats_kernel(x_ref, sum_ref, sq_ref):
    """Per-sample per-channel sum / sum-of-squares (training-mode BatchNorm).

    x_ref  : (1, H, W, C)
    sum_ref: (1, 1, C) f32   (per-sample partial; reduced over N outside)
    sq_ref : (1, 1, C) f32
    """
    H, W, C = x_ref.shape[1], x_ref.shape[2], x_ref.shape[3]
    x = x_ref[0].astype(jnp.float32).reshape(H * W, C)   # leading-dim merge only
    sum_ref[0] = jnp.sum(x, axis=0, keepdims=True)
    sq_ref[0] = jnp.sum(x * x, axis=0, keepdims=True)


def _im2col_conv3x3(act, pad_ref, col_ref, w_ref, b_ref, H, W, Ci):
    """3x3 'same' conv of `act` (H, W, Ci) f32 as ONE K=9*Ci bf16 MXU matmul.

    pad_ref: (H+2, W+2, Ci) f32 VMEM scratch (zero halo staged here, no HBM pad copy)
    col_ref: (H*W, 9*Ci) bf16 VMEM scratch (im2col buffer -> bounds register pressure)
    w_ref  : (9*Ci, Co) bf16  (HWIO weights flattened as (kh, kw, ci) x co)
    b_ref  : (1, Co) f32
    returns: (H*W, Co) f32
    """
    pad_ref[...] = jnp.zeros_like(pad_ref)     # re-zeroed every step (megacore-safe)
    pad_ref[1:H + 1, 1:W + 1, :] = act
    for kh in range(3):
        for kw in range(3):
            k = kh * 3 + kw
            tap = pad_ref[kh:kh + H, kw:kw + W, :].reshape(H * W, Ci)
            col_ref[:, k * Ci:(k + 1) * Ci] = tap.astype(jnp.bfloat16)
    y = jnp.dot(col_ref[...], w_ref[...], preferred_element_type=jnp.float32)
    return y + b_ref[...]


def _bn_lrelu_conv_stats_kernel(x_ref, scale_ref, shift_ref, w_ref, b_ref,
                                o_ref, sum_ref, sq_ref, pad_ref, col_ref,
                                *, H, W, Ci, Co):
    """y = conv3x3(leaky_relu(x*scale + shift)); emits per-sample channel stats of y."""
    act = x_ref[0].astype(jnp.float32) * scale_ref[...] + shift_ref[...]   # (H, W, Ci)
    act = jnp.where(act >= 0.0, act, 0.2 * act)
    y = _im2col_conv3x3(act, pad_ref, col_ref, w_ref, b_ref, H, W, Ci)     # (H*W, Co) f32
    sum_ref[0] = jnp.sum(y, axis=0, keepdims=True)
    sq_ref[0] = jnp.sum(y * y, axis=0, keepdims=True)
    o_ref[0] = y.reshape(H, W, Co).astype(o_ref.dtype)


def _bn_lrelu_conv_res_kernel(x_ref, scale_ref, shift_ref, w_ref, b_ref, res_ref,
                              o_ref, pad_ref, col_ref, *, H, W, Ci, Co, inv_scale):
    """out = (conv3x3(leaky_relu(x*scale + shift)) + residual) * (1/output_scale_factor)."""
    act = x_ref[0].astype(jnp.float32) * scale_ref[...] + shift_ref[...]
    act = jnp.where(act >= 0.0, act, 0.2 * act)
    y = _im2col_conv3x3(act, pad_ref, col_ref, w_ref, b_ref, H, W, Ci)     # (H*W, Co) f32
    y = y.reshape(H, W, Co) + res_ref[0].astype(jnp.float32)
    o_ref[0] = (y * inv_scale).astype(o_ref.dtype)


# ----------------------------------------------------------------------------
# JAX wrappers
# ----------------------------------------------------------------------------
def _channel_stats(x):
    """x: (N, H, W, C) -> per-channel (sum, sumsq) over N, H, W (both f32, shape (C,))."""
    N, H, W, C = x.shape
    psum, psq = pl.pallas_call(
        _stats_kernel,
        out_shape=(jax.ShapeDtypeStruct((N, 1, C), jnp.float32),
                   jax.ShapeDtypeStruct((N, 1, C), jnp.float32)),
        grid=(N,),
        in_specs=[pl.BlockSpec((1, H, W, C), lambda n: (n, 0, 0, 0))],
        out_specs=(pl.BlockSpec((1, 1, C), lambda n: (n, 0, 0)),
                   pl.BlockSpec((1, 1, C), lambda n: (n, 0, 0))),
        compiler_params=pltpu.CompilerParams(dimension_semantics=("parallel",)),
    )(x)
    return jnp.sum(psum[:, 0, :], axis=0), jnp.sum(psq[:, 0, :], axis=0)


def _bn_affine(s, sq, count, gamma, beta, eps):
    """Fold training-mode BatchNorm into per-channel scale/shift, each shape (1, C)."""
    mean = s / count
    var = jnp.maximum(sq / count - mean * mean, 0.0)     # clamp: guard cancellation
    invstd = jax.lax.rsqrt(var + eps)
    scale = gamma.astype(jnp.float32) * invstd
    shift = beta.astype(jnp.float32) - mean * scale
    return scale[None, :], shift[None, :]


def bn_lrelu_conv(x, scale, shift, w, b, *, residual=None,
                  output_scale_factor=1.0, out_dtype=jnp.float32):
    """Fused BN-apply + LeakyReLU(0.2) + 3x3 'same' Conv2d.

    x : (N, H, W, Ci);  w : (3, 3, Ci, Co) HWIO;  b : (Co,);  scale/shift : (1, Ci).
    Without `residual`, also returns per-channel (sum, sumsq) of the conv output
    (for the next BatchNorm).  With `residual` (N, H, W, Co), adds it and scales
    the result by 1/output_scale_factor.
    """
    N, H, W, Ci = x.shape
    Co = w.shape[-1]
    assert W % 8 == 0, "sublane-only reshapes require W % 8 == 0"  # TODO(synk): general W
    w_flat = w.reshape(9 * Ci, Co).astype(jnp.bfloat16)
    b2 = b.reshape(1, Co).astype(jnp.float32)

    in_specs = [
        pl.BlockSpec((1, H, W, Ci), lambda n: (n, 0, 0, 0)),
        pl.BlockSpec((1, Ci), lambda n: (0, 0)),
        pl.BlockSpec((1, Ci), lambda n: (0, 0)),
        pl.BlockSpec((9 * Ci, Co), lambda n: (0, 0)),
        pl.BlockSpec((1, Co), lambda n: (0, 0)),
    ]
    args = [x, scale, shift, w_flat, b2]
    scratch = [pltpu.VMEM((H + 2, W + 2, Ci), jnp.float32),
               pltpu.VMEM((H * W, 9 * Ci), jnp.bfloat16)]

    if residual is None:
        kern = partial(_bn_lrelu_conv_stats_kernel, H=H, W=W, Ci=Ci, Co=Co)
        out_shape = (jax.ShapeDtypeStruct((N, H, W, Co), out_dtype),
                     jax.ShapeDtypeStruct((N, 1, Co), jnp.float32),
                     jax.ShapeDtypeStruct((N, 1, Co), jnp.float32))
        out_specs = (pl.BlockSpec((1, H, W, Co), lambda n: (n, 0, 0, 0)),
                     pl.BlockSpec((1, 1, Co), lambda n: (n, 0, 0)),
                     pl.BlockSpec((1, 1, Co), lambda n: (n, 0, 0)))
    else:
        kern = partial(_bn_lrelu_conv_res_kernel, H=H, W=W, Ci=Ci, Co=Co,
                       inv_scale=float(1.0 / output_scale_factor))
        in_specs.append(pl.BlockSpec((1, H, W, Co), lambda n: (n, 0, 0, 0)))
        args.append(residual)
        out_shape = jax.ShapeDtypeStruct((N, H, W, Co), out_dtype)
        out_specs = pl.BlockSpec((1, H, W, Co), lambda n: (n, 0, 0, 0))

    out = pl.pallas_call(
        kern,
        out_shape=out_shape,
        grid=(N,),
        in_specs=in_specs,
        out_specs=out_specs,
        scratch_shapes=scratch,
        compiler_params=pltpu.CompilerParams(dimension_semantics=("parallel",)),
    )(*args)

    if residual is not None:
        return out
    y, psum, psq = out
    return y, jnp.sum(psum[:, 0, :], axis=0), jnp.sum(psq[:, 0, :], axis=0)


def discriminator_block2d_forward(x, params, *, output_scale_factor=1.0, eps=1e-5):
    """x: (N, H, W, C) channels-last f32.  add_downsample=False path.  Returns (N, H, W, Co)."""
    N, H, W, C = x.shape
    Co = params["conv1_w"].shape[-1]
    assert params["conv2_w"].shape[-1] == Co and C == Co, \
        "Identity shortcut (add_downsample=False) requires in_channels == out_channels"
    count = float(N * H * W)

    # shortcut = Identity(x)  (fused into the conv2 kernel as the residual)

    # norm1 statistics (training-mode batch stats); the affine apply is fused into conv1.
    s1, sq1 = _channel_stats(x)
    scale1, shift1 = _bn_affine(s1, sq1, count, params["bn1_g"], params["bn1_b"], eps)

    # norm1-apply + LeakyReLU + conv1, emitting norm2's statistics; bf16 intermediate.
    h1, s2, sq2 = bn_lrelu_conv(x, scale1, shift1, params["conv1_w"], params["conv1_b"],
                                out_dtype=jnp.bfloat16)
    scale2, shift2 = _bn_affine(s2, sq2, count, params["bn2_g"], params["bn2_b"], eps)

    # norm2-apply + LeakyReLU + dropout(p=0, identity) + downsampler(Identity) + conv2,
    # fused with the residual add and the 1/output_scale_factor scaling.
    out = bn_lrelu_conv(h1, scale2, shift2, params["conv2_w"], params["conv2_b"],
                        residual=x, output_scale_factor=output_scale_factor)
    return out


# ----------------------------------------------------------------------------
# Deterministic parameter init (conv ~ N(0, 0.02), BN gamma ~ N(1, 0.02), beta = 0)
# ----------------------------------------------------------------------------
def init_params(key, channels=32):
    ks = jax.random.split(key, 6)

    def conv_w(k, ci, co):
        return (0.02 * jax.random.normal(k, (3, 3, ci, co))).astype(jnp.float32)

    def conv_b(k, ci, co):
        bound = 1.0 / math.sqrt(ci * 9)
        return jax.random.uniform(k, (co,), jnp.float32, -bound, bound)

    return dict(
        bn1_g=(1.0 + 0.02 * jax.random.normal(ks[0], (channels,))).astype(jnp.float32),
        bn1_b=jnp.zeros((channels,), jnp.float32),
        conv1_w=conv_w(ks[1], channels, channels),
        conv1_b=conv_b(ks[2], channels, channels),
        bn2_g=(1.0 + 0.02 * jax.random.normal(ks[3], (channels,))).astype(jnp.float32),
        bn2_b=jnp.zeros((channels,), jnp.float32),
        conv2_w=conv_w(ks[4], channels, channels),
        conv2_b=conv_b(ks[5], channels, channels),
    )


# ----------------------------------------------------------------------------
# Pure-JAX (f32) reference for correctness
# ----------------------------------------------------------------------------
def _reference_forward(x, params, output_scale_factor=1.0, eps=1e-5):
    def conv(h, w, b):
        out = jax.lax.conv_general_dilated(
            h, w, window_strides=(1, 1), padding=((1, 1), (1, 1)),
            dimension_numbers=("NHWC", "HWIO", "NHWC"),
            precision=jax.lax.Precision.HIGHEST)
        return out + b

    def bn_lrelu(h, g, bta):
        m = jnp.mean(h, axis=(0, 1, 2), keepdims=True)
        v = jnp.mean((h - m) ** 2, axis=(0, 1, 2), keepdims=True)
        y = (h - m) / jnp.sqrt(v + eps) * g + bta
        return jnp.where(y >= 0.0, y, 0.2 * y)

    shortcut = x
    h = bn_lrelu(x, params["bn1_g"], params["bn1_b"])
    h = conv(h, params["conv1_w"], params["conv1_b"])
    h = bn_lrelu(h, params["bn2_g"], params["bn2_b"])
    h = conv(h, params["conv2_w"], params["conv2_b"])
    return (h + shortcut) / output_scale_factor


# ----------------------------------------------------------------------------
if __name__ == "__main__":
    key = jax.random.PRNGKey(0)
    kx, kp = jax.random.split(key)

    # PyTorch-style input (N, C, H, W) = (2, 32, 16, 16); add_downsample=False block
    N, C, H, W = 2, 32, 16, 16
    x_nchw = jax.random.normal(kx, (N, C, H, W), jnp.float32)
    x = jnp.transpose(x_nchw, (0, 2, 3, 1))  # -> (N, H, W, C) channels-last

    params = init_params(kp, channels=C)
    osf = 1.0  # module default output_scale_factor

    fwd = jax.jit(partial(discriminator_block2d_forward, output_scale_factor=osf))
    out = jax.block_until_ready(fwd(x, params))
    assert out.shape == (N, H, W, C)

    ref = _reference_forward(x, params, output_scale_factor=osf)
    np.testing.assert_allclose(np.asarray(out), np.asarray(ref), rtol=5e-2, atol=5e-2)

    print("KERNEL_OK")
</pallas_src>

<mosaic_0001>
module attributes {stable_mosaic.version = 11 : i64} {
  func.func @_stats_kernel(%arg0: i32, %arg1: memref<1x16x16x32xf32, #tpu.memory_space<vmem>>, %arg2: memref<1x1x32xf32, #tpu.memory_space<vmem>>, %arg3: memref<1x1x32xf32, #tpu.memory_space<vmem>>) attributes {dimension_semantics = [#tpu.dimension_semantics<parallel>], iteration_bounds = array<i64: 2>, scalar_prefetch = 0 : i64, scratch_operands = 0 : i64, tpu.core_type = #tpu.core_type<tc>, window_params = [{transform_indices = @transform_0, window_bounds = array<i64: 1, 16, 16, 32>}, {transform_indices = @transform_1, window_bounds = array<i64: 1, 1, 32>}, {transform_indices = @transform_2, window_bounds = array<i64: 1, 1, 32>}]} {
    %c0 = arith.constant 0 : index
    %c0_0 = arith.constant 0 : index
    %c0_1 = arith.constant 0 : index
    %c0_2 = arith.constant 0 : index
    %0 = vector.load %arg1[%c0, %c0_0, %c0_1, %c0_2] : memref<1x16x16x32xf32, #tpu.memory_space<vmem>>, vector<1x16x16x32xf32>
    %1 = vector.shape_cast %0 : vector<1x16x16x32xf32> to vector<16x16x32xf32>
    %2 = vector.shape_cast %1 : vector<16x16x32xf32> to vector<256x32xf32>
    %cst = arith.constant dense<0.000000e+00> : vector<32xf32>
    %3 = vector.multi_reduction <add>, %2, %cst [0] : vector<256x32xf32> to vector<32xf32>
    %4 = vector.shape_cast %3 : vector<32xf32> to vector<1x32xf32>
    %c0_3 = arith.constant 0 : index
    %c0_4 = arith.constant 0 : index
    %c0_5 = arith.constant 0 : index
    %5 = vector.load %arg2[%c0_3, %c0_4, %c0_5] : memref<1x1x32xf32, #tpu.memory_space<vmem>>, vector<1x1x32xf32>
    %6 = vector.shape_cast %5 : vector<1x1x32xf32> to vector<1x32xf32>
    %7 = vector.shape_cast %4 : vector<1x32xf32> to vector<1x1x32xf32>
    tpu.vector_store %arg2[%c0_3, %c0_4, %c0_5], %7 {strides = array<i32>} : memref<1x1x32xf32, #tpu.memory_space<vmem>>, vector<1x1x32xf32>,
    %8 = arith.mulf %2, %2 : vector<256x32xf32>
    %cst_6 = arith.constant dense<0.000000e+00> : vector<32xf32>
    %9 = vector.multi_reduction <add>, %8, %cst_6 [0] : vector<256x32xf32> to vector<32xf32>
    %10 = vector.shape_cast %9 : vector<32xf32> to vector<1x32xf32>
    %c0_7 = arith.constant 0 : index
    %c0_8 = arith.constant 0 : index
    %c0_9 = arith.constant 0 : index
    %11 = vector.load %arg3[%c0_7, %c0_8, %c0_9] : memref<1x1x32xf32, #tpu.memory_space<vmem>>, vector<1x1x32xf32>
    %12 = vector.shape_cast %11 : vector<1x1x32xf32> to vector<1x32xf32>
    %13 = vector.shape_cast %10 : vector<1x32xf32> to vector<1x1x32xf32>
    tpu.vector_store %arg3[%c0_7, %c0_8, %c0_9], %13 {strides = array<i32>} : memref<1x1x32xf32, #tpu.memory_space<vmem>>, vector<1x1x32xf32>,
    return
  }
  func.func @transform_0(%arg0: i32) -> (i32, i32, i32, i32) {
    %c0_i32 = arith.constant 0 : i32
    %c0_i32_0 = arith.constant 0 : i32
    %c0_i32_1 = arith.constant 0 : i32
    %c0_i32_2 = arith.constant 0 : i32
    return %arg0, %c0_i32, %c0_i32_0, %c0_i32_1 : i32, i32, i32, i32
  }
  func.func @transform_1(%arg0: i32) -> (i32, i32, i32) {
    %c0_i32 = arith.constant 0 : i32
    %c0_i32_0 = arith.constant 0 : i32
    %c0_i32_1 = arith.constant 0 : i32
    return %arg0, %c0_i32, %c0_i32_0 : i32, i32, i32
  }
  func.func @transform_2(%arg0: i32) -> (i32, i32, i32) {
    %c0_i32 = arith.constant 0 : i32
    %c0_i32_0 = arith.constant 0 : i32
    %c0_i32_1 = arith.constant 0 : i32
    return %arg0, %c0_i32, %c0_i32_0 : i32, i32, i32
  }
}

module attributes {stable_mosaic.version = 11 : i64} {
  func.func @_bn_lrelu_conv_stats_kernel(%arg0: i32, %arg1: memref<1x16x16x32xf32, #tpu.memory_space<vmem>>, %arg2: memref<1x32xf32, #tpu.memory_space<vmem>>, %arg3: memref<1x32xf32, #tpu.memory_space<vmem>>, %arg4: memref<288x32xbf16, #tpu.memory_space<vmem>>, %arg5: memref<1x32xf32, #tpu.memory_space<vmem>>, %arg6: memref<1x16x16x32xbf16, #tpu.memory_space<vmem>>, %arg7: memref<1x1x32xf32, #tpu.memory_space<vmem>>, %arg8: memref<1x1x32xf32, #tpu.memory_space<vmem>>, %arg9: memref<18x18x32xf32, #tpu.memory_space<vmem>>, %arg10: memref<256x288xbf16, #tpu.memory_space<vmem>>) attributes {dimension_semantics = [#tpu.dimension_semantics<parallel>], iteration_bounds = array<i64: 2>, scalar_prefetch = 0 : i64, scratch_operands = 2 : i64, tpu.core_type = #tpu.core_type<tc>, window_params = [{transform_indices = @transform_0, window_bounds = array<i64: 1, 16, 16, 32>}, {pipeline_mode = #tpu.pipeline_mode<synchronous>, transform_indices = @transform_1, window_bounds = array<i64: 1, 32>}, {pipeline_mode = #tpu.pipeline_mode<synchronous>, transform_indices = @transform_2, window_bounds = array<i64: 1, 32>}, {pipeline_mode = #tpu.pipeline_mode<synchronous>, transform_indices = @transform_3, window_bounds = array<i64: 288, 32>}, {pipeline_mode = #tpu.pipeline_mode<synchronous>, transform_indices = @transform_4, window_bounds = array<i64: 1, 32>}, {transform_indices = @transform_5, window_bounds = array<i64: 1, 16, 16, 32>}, {transform_indices = @transform_6, window_bounds = array<i64: 1, 1, 32>}, {transform_indices = @transform_7, window_bounds = array<i64: 1, 1, 32>}]} {
    %c0 = arith.constant 0 : index
    %c0_0 = arith.constant 0 : index
    %c0_1 = arith.constant 0 : index
    %c0_2 = arith.constant 0 : index
    %0 = vector.load %arg1[%c0, %c0_0, %c0_1, %c0_2] : memref<1x16x16x32xf32, #tpu.memory_space<vmem>>, vector<1x16x16x32xf32>
    %1 = vector.shape_cast %0 : vector<1x16x16x32xf32> to vector<16x16x32xf32>
    %c0_3 = arith.constant 0 : index
    %c0_4 = arith.constant 0 : index
    %2 = vector.load %arg2[%c0_3, %c0_4] : memref<1x32xf32, #tpu.memory_space<vmem>>, vector<1x32xf32>
    %3 = vector.shape_cast %2 : vector<1x32xf32> to vector<1x1x32xf32>
    %4 = vector.broadcast %3 : vector<1x1x32xf32> to vector<16x16x32xf32>
    %5 = arith.mulf %1, %4 : vector<16x16x32xf32>
    %c0_5 = arith.constant 0 : index
    %c0_6 = arith.constant 0 : index
    %6 = vector.load %arg3[%c0_5, %c0_6] : memref<1x32xf32, #tpu.memory_space<vmem>>, vector<1x32xf32>
    %7 = vector.shape_cast %6 : vector<1x32xf32> to vector<1x1x32xf32>
    %8 = vector.broadcast %7 : vector<1x1x32xf32> to vector<16x16x32xf32>
    %9 = arith.addf %5, %8 : vector<16x16x32xf32>
    %cst = arith.constant 0.000000e+00 : f32
    %10 = vector.broadcast %cst : f32 to vector<16x16x32xf32>
    %11 = arith.cmpf oge, %9, %10 : vector<16x16x32xf32>
    %cst_7 = arith.constant 2.000000e-01 : f32
    %12 = vector.broadcast %cst_7 : f32 to vector<16x16x32xf32>
    %13 = arith.mulf %12, %9 : vector<16x16x32xf32>
    %14 = arith.select %11, %9, %13 : vector<16x16x32xi1>, vector<16x16x32xf32>
    %cst_8 = arith.constant 0.000000e+00 : f32
    %15 = vector.broadcast %cst_8 : f32 to vector<18x18x32xf32>
    %c0_9 = arith.constant 0 : index
    %c0_10 = arith.constant 0 : index
    %c0_11 = arith.constant 0 : index
    %16 = vector.load %arg9[%c0_9, %c0_10, %c0_11] : memref<18x18x32xf32, #tpu.memory_space<vmem>>, vector<18x18x32xf32>
    tpu.vector_store %arg9[%c0_9, %c0_10, %c0_11], %15 {strides = array<i32>} : memref<18x18x32xf32, #tpu.memory_space<vmem>>, vector<18x18x32xf32>,
    %c1 = arith.constant 1 : index
    %c1_12 = arith.constant 1 : index
    %c0_13 = arith.constant 0 : index
    %17 = vector.load %arg9[%c1, %c1_12, %c0_13] : memref<18x18x32xf32, #tpu.memory_space<vmem>>, vector<16x16x32xf32>
    tpu.vector_store %arg9[%c1, %c1_12, %c0_13], %14 {strides = array<i32>} : memref<18x18x32xf32, #tpu.memory_space<vmem>>, vector<16x16x32xf32>,
    %c0_14 = arith.constant 0 : index
    %c0_15 = arith.constant 0 : index
    %c0_16 = arith.constant 0 : index
    %18 = vector.load %arg9[%c0_14, %c0_15, %c0_16] : memref<18x18x32xf32, #tpu.memory_space<vmem>>, vector<16x16x32xf32>
    %19 = vector.shape_cast %18 : vector<16x16x32xf32> to vector<256x32xf32>
    %20 = arith.truncf %19 : vector<256x32xf32> to vector<256x32xbf16>
    %c0_17 = arith.constant 0 : index
    %c0_18 = arith.constant 0 : index
    %21 = vector.load %arg10[%c0_17, %c0_18] : memref<256x288xbf16, #tpu.memory_space<vmem>>, vector<256x32xbf16>
    tpu.vector_store %arg10[%c0_17, %c0_18], %20 {strides = array<i32>} : memref<256x288xbf16, #tpu.memory_space<vmem>>, vector<256x32xbf16>,
    %c0_19 = arith.constant 0 : index
    %c1_20 = arith.constant 1 : index
    %c0_21 = arith.constant 0 : index
    %22 = vector.load %arg9[%c0_19, %c1_20, %c0_21] : memref<18x18x32xf32, #tpu.memory_space<vmem>>, vector<16x16x32xf32>
    %23 = vector.shape_cast %22 : vector<16x16x32xf32> to vector<256x32xf32>
    %24 = arith.truncf %23 : vector<256x32xf32> to vector<256x32xbf16>
    %c0_22 = arith.constant 0 : index
    %c32 = arith.constant 32 : index
    %25 = vector.load %arg10[%c0_22, %c32] : memref<256x288xbf16, #tpu.memory_space<vmem>>, vector<256x32xbf16>
    tpu.vector_store %arg10[%c0_22, %c32], %24 {strides = array<i32>} : memref<256x288xbf16, #tpu.memory_space<vmem>>, vector<256x32xbf16>,
    %c0_23 = arith.constant 0 : index
    %c2 = arith.constant 2 : index
    %c0_24 = arith.constant 0 : index
    %26 = vector.load %arg9[%c0_23, %c2, %c0_24] : memref<18x18x32xf32, #tpu.memory_space<vmem>>, vector<16x16x32xf32>
    %27 = vector.shape_cast %26 : vector<16x16x32xf32> to vector<256x32xf32>
    %28 = arith.truncf %27 : vector<256x32xf32> to vector<256x32xbf16>
    %c0_25 = arith.constant 0 : index
    %c64 = arith.constant 64 : index
    %29 = vector.load %arg10[%c0_25, %c64] : memref<256x288xbf16, #tpu.memory_space<vmem>>, vector<256x32xbf16>
    tpu.vector_store %arg10[%c0_25, %c64], %28 {strides = array<i32>} : memref<256x288xbf16, #tpu.memory_space<vmem>>, vector<256x32xbf16>,
    %c1_26 = arith.constant 1 : index
    %c0_27 = arith.constant 0 : index
    %c0_28 = arith.constant 0 : index
    %30 = vector.load %arg9[%c1_26, %c0_27, %c0_28] : memref<18x18x32xf32, #tpu.memory_space<vmem>>, vector<16x16x32xf32>
    %31 = vector.shape_cast %30 : vector<16x16x32xf32> to vector<256x32xf32>
    %32 = arith.truncf %31 : vector<256x32xf32> to vector<256x32xbf16>
    %c0_29 = arith.constant 0 : index
    %c96 = arith.constant 96 : index
    %33 = vector.load %arg10[%c0_29, %c96] : memref<256x288xbf16, #tpu.memory_space<vmem>>, vector<256x32xbf16>
    tpu.vector_store %arg10[%c0_29, %c96], %32 {strides = array<i32>} : memref<256x288xbf16, #tpu.memory_space<vmem>>, vector<256x32xbf16>,
    %c1_30 = arith.constant 1 : index
    %c1_31 = arith.constant 1 : index
    %c0_32 = arith.constant 0 : index
    %34 = vector.load %arg9[%c1_30, %c1_31, %c0_32] : memref<18x18x32xf32, #tpu.memory_space<vmem>>, vector<16x16x32xf32>
    %35 = vector.shape_cast %34 : vector<16x16x32xf32> to vector<256x32xf32>
    %36 = arith.truncf %35 : vector<256x32xf32> to vector<256x32xbf16>
    %c0_33 = arith.constant 0 : index
    %c128 = arith.constant 128 : index
    %37 = vector.load %arg10[%c0_33, %c128] : memref<256x288xbf16, #tpu.memory_space<vmem>>, vector<256x32xbf16>
    tpu.vector_store %arg10[%c0_33, %c128], %36 {strides = array<i32>} : memref<256x288xbf16, #tpu.memory_space<vmem>>, vector<256x32xbf16>,
    %c1_34 = arith.constant 1 : index
    %c2_35 = arith.constant 2 : index
    %c0_36 = arith.constant 0 : index
    %38 = vector.load %arg9[%c1_34, %c2_35, %c0_36] : memref<18x18x32xf32, #tpu.memory_space<vmem>>, vector<16x16x32xf32>
    %39 = vector.shape_cast %38 : vector<16x16x32xf32> to vector<256x32xf32>
    %40 = arith.truncf %39 : vector<256x32xf32> to vector<256x32xbf16>
    %c0_37 = arith.constant 0 : index
    %c160 = arith.constant 160 : index
    %41 = vector.load %arg10[%c0_37, %c160] : memref<256x288xbf16, #tpu.memory_space<vmem>>, vector<256x32xbf16>
    tpu.vector_store %arg10[%c0_37, %c160], %40 {strides = array<i32>} : memref<256x288xbf16, #tpu.memory_space<vmem>>, vector<256x32xbf16>,
    %c2_38 = arith.constant 2 : index
    %c0_39 = arith.constant 0 : index
    %c0_40 = arith.constant 0 : index
    %42 = vector.load %arg9[%c2_38, %c0_39, %c0_40] : memref<18x18x32xf32, #tpu.memory_space<vmem>>, vector<16x16x32xf32>
    %43 = vector.shape_cast %42 : vector<16x16x32xf32> to vector<256x32xf32>
    %44 = arith.truncf %43 : vector<256x32xf32> to vector<256x32xbf16>
    %c0_41 = arith.constant 0 : index
    %c192 = arith.constant 192 : index
    %45 = vector.load %arg10[%c0_41, %c192] : memref<256x288xbf16, #tpu.memory_space<vmem>>, vector<256x32xbf16>
    tpu.vector_store %arg10[%c0_41, %c192], %44 {strides = array<i32>} : memref<256x288xbf16, #tpu.memory_space<vmem>>, vector<256x32xbf16>,
    %c2_42 = arith.constant 2 : index
    %c1_43 = arith.constant 1 : index
    %c0_44 = arith.constant 0 : index
    %46 = vector.load %arg9[%c2_42, %c1_43, %c0_44] : memref<18x18x32xf32, #tpu.memory_space<vmem>>, vector<16x16x32xf32>
    %47 = vector.shape_cast %46 : vector<16x16x32xf32> to vector<256x32xf32>
    %48 = arith.truncf %47 : vector<256x32xf32> to vector<256x32xbf16>
    %c0_45 = arith.constant 0 : index
    %c224 = arith.constant 224 : index
    %49 = vector.load %arg10[%c0_45, %c224] : memref<256x288xbf16, #tpu.memory_space<vmem>>, vector<256x32xbf16>
    tpu.vector_store %arg10[%c0_45, %c224], %48 {strides = array<i32>} : memref<256x288xbf16, #tpu.memory_space<vmem>>, vector<256x32xbf16>,
    %c2_46 = arith.constant 2 : index
    %c2_47 = arith.constant 2 : index
    %c0_48 = arith.constant 0 : index
    %50 = vector.load %arg9[%c2_46, %c2_47, %c0_48] : memref<18x18x32xf32, #tpu.memory_space<vmem>>, vector<16x16x32xf32>
    %51 = vector.shape_cast %50 : vector<16x16x32xf32> to vector<256x32xf32>
    %52 = arith.truncf %51 : vector<256x32xf32> to vector<256x32xbf16>
    %c0_49 = arith.constant 0 : index
    %c256 = arith.constant 256 : index
    %53 = vector.load %arg10[%c0_49, %c256] : memref<256x288xbf16, #tpu.memory_space<vmem>>, vector<256x32xbf16>
    tpu.vector_store %arg10[%c0_49, %c256], %52 {strides = array<i32>} : memref<256x288xbf16, #tpu.memory_space<vmem>>, vector<256x32xbf16>,
    %c0_50 = arith.constant 0 : index
    %c0_51 = arith.constant 0 : index
    %54 = vector.load %arg10[%c0_50, %c0_51] : memref<256x288xbf16, #tpu.memory_space<vmem>>, vector<256x288xbf16>
    %c0_52 = arith.constant 0 : index
    %c0_53 = arith.constant 0 : index
    %55 = vector.load %arg4[%c0_52, %c0_53] : memref<288x32xbf16, #tpu.memory_space<vmem>>, vector<288x32xbf16>
    %cst_54 = arith.constant dense<0.000000e+00> : vector<256x32xf32>
    %56 = tpu.matmul %54, %55, %cst_54 {dimension_numbers = #tpu.dot_dimension_numbers<[1], [0], [0], [1], [0, 0, 1, 1], [], []>} : vector<256x288xbf16>, vector<288x32xbf16>, vector<256x32xf32> -> vector<256x32xf32>
    %c0_55 = arith.constant 0 : index
    %c0_56 = arith.constant 0 : index
    %57 = vector.load %arg5[%c0_55, %c0_56] : memref<1x32xf32, #tpu.memory_space<vmem>>, vector<1x32xf32>
    %58 = vector.broadcast %57 : vector<1x32xf32> to vector<256x32xf32>
    %59 = arith.addf %56, %58 : vector<256x32xf32>
    %cst_57 = arith.constant dense<0.000000e+00> : vector<32xf32>
    %60 = vector.multi_reduction <add>, %59, %cst_57 [0] : vector<256x32xf32> to vector<32xf32>
    %61 = vector.shape_cast %60 : vector<32xf32> to vector<1x32xf32>
    %c0_58 = arith.constant 0 : index
    %c0_59 = arith.constant 0 : index
    %c0_60 = arith.constant 0 : index
    %62 = vector.load %arg7[%c0_58, %c0_59, %c0_60] : memref<1x1x32xf32, #tpu.memory_space<vmem>>, vector<1x1x32xf32>
    %63 = vector.shape_cast %62 : vector<1x1x32xf32> to vector<1x32xf32>
    %64 = vector.shape_cast %61 : vector<1x32xf32> to vector<1x1x32xf32>
    tpu.vector_store %arg7[%c0_58, %c0_59, %c0_60], %64 {strides = array<i32>} : memref<1x1x32xf32, #tpu.memory_space<vmem>>, vector<1x1x32xf32>,
    %65 = arith.mulf %59, %59 : vector<256x32xf32>
    %cst_61 = arith.constant dense<0.000000e+00> : vector<32xf32>
    %66 = vector.multi_reduction <add>, %65, %cst_61 [0] : vector<256x32xf32> to vector<32xf32>
    %67 = vector.shape_cast %66 : vector<32xf32> to vector<1x32xf32>
    %c0_62 = arith.constant 0 : index
    %c0_63 = arith.constant 0 : index
    %c0_64 = arith.constant 0 : index
    %68 = vector.load %arg8[%c0_62, %c0_63, %c0_64] : memref<1x1x32xf32, #tpu.memory_space<vmem>>, vector<1x1x32xf32>
    %69 = vector.shape_cast %68 : vector<1x1x32xf32> to vector<1x32xf32>
    %70 = vector.shape_cast %67 : vector<1x32xf32> to vector<1x1x32xf32>
    tpu.vector_store %arg8[%c0_62, %c0_63, %c0_64], %70 {strides = array<i32>} : memref<1x1x32xf32, #tpu.memory_space<vmem>>, vector<1x1x32xf32>,
    %71 = vector.shape_cast %59 : vector<256x32xf32> to vector<16x16x32xf32>
    %72 = arith.truncf %71 : vector<16x16x32xf32> to vector<16x16x32xbf16>
    %c0_65 = arith.constant 0 : index
    %c0_66 = arith.constant 0 : index
    %c0_67 = arith.constant 0 : index
    %c0_68 = arith.constant 0 : index
    %73 = vector.load %arg6[%c0_65, %c0_66, %c0_67, %c0_68] : memref<1x16x16x32xbf16, #tpu.memory_space<vmem>>, vector<1x16x16x32xbf16>
    %74 = vector.shape_cast %73 : vector<1x16x16x32xbf16> to vector<16x16x32xbf16>
    %75 = vector.shape_cast %72 : vector<16x16x32xbf16> to vector<1x16x16x32xbf16>
    tpu.vector_store %arg6[%c0_65, %c0_66, %c0_67, %c0_68], %75 {strides = array<i32>} : memref<1x16x16x32xbf16, #tpu.memory_space<vmem>>, vector<1x16x16x32xbf16>,
    return
  }
  func.func @transform_0(%arg0: i32) -> (i32, i32, i32, i32) {
    %c0_i32 = arith.constant 0 : i32
    %c0_i32_0 = arith.constant 0 : i32
    %c0_i32_1 = arith.constant 0 : i32
    %c0_i32_2 = arith.constant 0 : i32
    return %arg0, %c0_i32, %c0_i32_0, %c0_i32_1 : i32, i32, i32, i32
  }
  func.func @transform_1(%arg0: i32) -> (i32, i32) {
    %c0_i32 = arith.constant 0 : i32
    %c0_i32_0 = arith.constant 0 : i32
    %c0_i32_1 = arith.constant 0 : i32
    return %c0_i32, %c0_i32_0 : i32, i32
  }
  func.func @transform_2(%arg0: i32) -> (i32, i32) {
    %c0_i32 = arith.constant 0 : i32
    %c0_i32_0 = arith.constant 0 : i32
    %c0_i32_1 = arith.constant 0 : i32
    return %c0_i32, %c0_i32_0 : i32, i32
  }
  func.func @transform_3(%arg0: i32) -> (i32, i32) {
    %c0_i32 = arith.constant 0 : i32
    %c0_i32_0 = arith.constant 0 : i32
    %c0_i32_1 = arith.constant 0 : i32
    return %c0_i32, %c0_i32_0 : i32, i32
  }
  func.func @transform_4(%arg0: i32) -> (i32, i32) {
    %c0_i32 = arith.constant 0 : i32
    %c0_i32_0 = arith.constant 0 : i32
    %c0_i32_1 = arith.constant 0 : i32
    return %c0_i32, %c0_i32_0 : i32, i32
  }
  func.func @transform_5(%arg0: i32) -> (i32, i32, i32, i32) {
    %c0_i32 = arith.constant 0 : i32
    %c0_i32_0 = arith.constant 0 : i32
    %c0_i32_1 = arith.constant 0 : i32
    %c0_i32_2 = arith.constant 0 : i32
    return %arg0, %c0_i32, %c0_i32_0, %c0_i32_1 : i32, i32, i32, i32
  }
  func.func @transform_6(%arg0: i32) -> (i32, i32, i32) {
    %c0_i32 = arith.constant 0 : i32
    %c0_i32_0 = arith.constant 0 : i32
    %c0_i32_1 = arith.constant 0 : i32
    return %arg0, %c0_i32, %c0_i32_0 : i32, i32, i32
  }
  func.func @transform_7(%arg0: i32) -> (i32, i32, i32) {
    %c0_i32 = arith.constant 0 : i32
    %c0_i32_0 = arith.constant 0 : i32
    %c0_i32_1 = arith.constant 0 : i32
    return %arg0, %c0_i32, %c0_i32_0 : i32, i32, i32
  }
}

module attributes {stable_mosaic.version = 11 : i64} {
  func.func @_bn_lrelu_conv_res_kernel(%arg0: i32, %arg1: memref<1x16x16x32xbf16, #tpu.memory_space<vmem>>, %arg2: memref<1x32xf32, #tpu.memory_space<vmem>>, %arg3: memref<1x32xf32, #tpu.memory_space<vmem>>, %arg4: memref<288x32xbf16, #tpu.memory_space<vmem>>, %arg5: memref<1x32xf32, #tpu.memory_space<vmem>>, %arg6: memref<1x16x16x32xf32, #tpu.memory_space<vmem>>, %arg7: memref<1x16x16x32xf32, #tpu.memory_space<vmem>>, %arg8: memref<18x18x32xf32, #tpu.memory_space<vmem>>, %arg9: memref<256x288xbf16, #tpu.memory_space<vmem>>) attributes {dimension_semantics = [#tpu.dimension_semantics<parallel>], iteration_bounds = array<i64: 2>, scalar_prefetch = 0 : i64, scratch_operands = 2 : i64, tpu.core_type = #tpu.core_type<tc>, window_params = [{transform_indices = @transform_0, window_bounds = array<i64: 1, 16, 16, 32>}, {pipeline_mode = #tpu.pipeline_mode<synchronous>, transform_indices = @transform_1, window_bounds = array<i64: 1, 32>}, {pipeline_mode = #tpu.pipeline_mode<synchronous>, transform_indices = @transform_2, window_bounds = array<i64: 1, 32>}, {pipeline_mode = #tpu.pipeline_mode<synchronous>, transform_indices = @transform_3, window_bounds = array<i64: 288, 32>}, {pipeline_mode = #tpu.pipeline_mode<synchronous>, transform_indices = @transform_4, window_bounds = array<i64: 1, 32>}, {transform_indices = @transform_5, window_bounds = array<i64: 1, 16, 16, 32>}, {transform_indices = @transform_6, window_bounds = array<i64: 1, 16, 16, 32>}]} {
    %c0 = arith.constant 0 : index
    %c0_0 = arith.constant 0 : index
    %c0_1 = arith.constant 0 : index
    %c0_2 = arith.constant 0 : index
    %0 = vector.load %arg1[%c0, %c0_0, %c0_1, %c0_2] : memref<1x16x16x32xbf16, #tpu.memory_space<vmem>>, vector<1x16x16x32xbf16>
    %1 = vector.shape_cast %0 : vector<1x16x16x32xbf16> to vector<16x16x32xbf16>
    %2 = arith.extf %1 : vector<16x16x32xbf16> to vector<16x16x32xf32>
    %c0_3 = arith.constant 0 : index
    %c0_4 = arith.constant 0 : index
    %3 = vector.load %arg2[%c0_3, %c0_4] : memref<1x32xf32, #tpu.memory_space<vmem>>, vector<1x32xf32>
    %4 = vector.shape_cast %3 : vector<1x32xf32> to vector<1x1x32xf32>
    %5 = vector.broadcast %4 : vector<1x1x32xf32> to vector<16x16x32xf32>
    %6 = arith.mulf %2, %5 : vector<16x16x32xf32>
    %c0_5 = arith.constant 0 : index
    %c0_6 = arith.constant 0 : index
    %7 = vector.load %arg3[%c0_5, %c0_6] : memref<1x32xf32, #tpu.memory_space<vmem>>, vector<1x32xf32>
    %8 = vector.shape_cast %7 : vector<1x32xf32> to vector<1x1x32xf32>
    %9 = vector.broadcast %8 : vector<1x1x32xf32> to vector<16x16x32xf32>
    %10 = arith.addf %6, %9 : vector<16x16x32xf32>
    %cst = arith.constant 0.000000e+00 : f32
    %11 = vector.broadcast %cst : f32 to vector<16x16x32xf32>
    %12 = arith.cmpf oge, %10, %11 : vector<16x16x32xf32>
    %cst_7 = arith.constant 2.000000e-01 : f32
    %13 = vector.broadcast %cst_7 : f32 to vector<16x16x32xf32>
    %14 = arith.mulf %13, %10 : vector<16x16x32xf32>
    %15 = arith.select %12, %10, %14 : vector<16x16x32xi1>, vector<16x16x32xf32>
    %cst_8 = arith.constant 0.000000e+00 : f32
    %16 = vector.broadcast %cst_8 : f32 to vector<18x18x32xf32>
    %c0_9 = arith.constant 0 : index
    %c0_10 = arith.constant 0 : index
    %c0_11 = arith.constant 0 : index
    %17 = vector.load %arg8[%c0_9, %c0_10, %c0_11] : memref<18x18x32xf32, #tpu.memory_space<vmem>>, vector<18x18x32xf32>
    tpu.vector_store %arg8[%c0_9, %c0_10, %c0_11], %16 {strides = array<i32>} : memref<18x18x32xf32, #tpu.memory_space<vmem>>, vector<18x18x32xf32>,
    %c1 = arith.constant 1 : index
    %c1_12 = arith.constant 1 : index
    %c0_13 = arith.constant 0 : index
    %18 = vector.load %arg8[%c1, %c1_12, %c0_13] : memref<18x18x32xf32, #tpu.memory_space<vmem>>, vector<16x16x32xf32>
    tpu.vector_store %arg8[%c1, %c1_12, %c0_13], %15 {strides = array<i32>} : memref<18x18x32xf32, #tpu.memory_space<vmem>>, vector<16x16x32xf32>,
    %c0_14 = arith.constant 0 : index
    %c0_15 = arith.constant 0 : index
    %c0_16 = arith.constant 0 : index
    %19 = vector.load %arg8[%c0_14, %c0_15, %c0_16] : memref<18x18x32xf32, #tpu.memory_space<vmem>>, vector<16x16x32xf32>
    %20 = vector.shape_cast %19 : vector<16x16x32xf32> to vector<256x32xf32>
    %21 = arith.truncf %20 : vector<256x32xf32> to vector<256x32xbf16>
    %c0_17 = arith.constant 0 : index
    %c0_18 = arith.constant 0 : index
    %22 = vector.load %arg9[%c0_17, %c0_18] : memref<256x288xbf16, #tpu.memory_space<vmem>>, vector<256x32xbf16>
    tpu.vector_store %arg9[%c0_17, %c0_18], %21 {strides = array<i32>} : memref<256x288xbf16, #tpu.memory_space<vmem>>, vector<256x32xbf16>,
    %c0_19 = arith.constant 0 : index
    %c1_20 = arith.constant 1 : index
    %c0_21 = arith.constant 0 : index
    %23 = vector.load %arg8[%c0_19, %c1_20, %c0_21] : memref<18x18x32xf32, #tpu.memory_space<vmem>>, vector<16x16x32xf32>
    %24 = vector.shape_cast %23 : vector<16x16x32xf32> to vector<256x32xf32>
    %25 = arith.truncf %24 : vector<256x32xf32> to vector<256x32xbf16>
    %c0_22 = arith.constant 0 : index
    %c32 = arith.constant 32 : index
    %26 = vector.load %arg9[%c0_22, %c32] : memref<256x288xbf16, #tpu.memory_space<vmem>>, vector<256x32xbf16>
    tpu.vector_store %arg9[%c0_22, %c32], %25 {strides = array<i32>} : memref<256x288xbf16, #tpu.memory_space<vmem>>, vector<256x32xbf16>,
    %c0_23 = arith.constant 0 : index
    %c2 = arith.constant 2 : index
    %c0_24 = arith.constant 0 : index
    %27 = vector.load %arg8[%c0_23, %c2, %c0_24] : memref<18x18x32xf32, #tpu.memory_space<vmem>>, vector<16x16x32xf32>
    %28 = vector.shape_cast %27 : vector<16x16x32xf32> to vector<256x32xf32>
    %29 = arith.truncf %28 : vector<256x32xf32> to vector<256x32xbf16>
    %c0_25 = arith.constant 0 : index
    %c64 = arith.constant 64 : index
    %30 = vector.load %arg9[%c0_25, %c64] : memref<256x288xbf16, #tpu.memory_space<vmem>>, vector<256x32xbf16>
    tpu.vector_store %arg9[%c0_25, %c64], %29 {strides = array<i32>} : memref<256x288xbf16, #tpu.memory_space<vmem>>, vector<256x32xbf16>,
    %c1_26 = arith.constant 1 : index
    %c0_27 = arith.constant 0 : index
    %c0_28 = arith.constant 0 : index
    %31 = vector.load %arg8[%c1_26, %c0_27, %c0_28] : memref<18x18x32xf32, #tpu.memory_space<vmem>>, vector<16x16x32xf32>
    %32 = vector.shape_cast %31 : vector<16x16x32xf32> to vector<256x32xf32>
    %33 = arith.truncf %32 : vector<256x32xf32> to vector<256x32xbf16>
    %c0_29 = arith.constant 0 : index
    %c96 = arith.constant 96 : index
    %34 = vector.load %arg9[%c0_29, %c96] : memref<256x288xbf16, #tpu.memory_space<vmem>>, vector<256x32xbf16>
    tpu.vector_store %arg9[%c0_29, %c96], %33 {strides = array<i32>} : memref<256x288xbf16, #tpu.memory_space<vmem>>, vector<256x32xbf16>,
    %c1_30 = arith.constant 1 : index
    %c1_31 = arith.constant 1 : index
    %c0_32 = arith.constant 0 : index
    %35 = vector.load %arg8[%c1_30, %c1_31, %c0_32] : memref<18x18x32xf32, #tpu.memory_space<vmem>>, vector<16x16x32xf32>
    %36 = vector.shape_cast %35 : vector<16x16x32xf32> to vector<256x32xf32>
    %37 = arith.truncf %36 : vector<256x32xf32> to vector<256x32xbf16>
    %c0_33 = arith.constant 0 : index
    %c128 = arith.constant 128 : index
    %38 = vector.load %arg9[%c0_33, %c128] : memref<256x288xbf16, #tpu.memory_space<vmem>>, vector<256x32xbf16>
    tpu.vector_store %arg9[%c0_33, %c128], %37 {strides = array<i32>} : memref<256x288xbf16, #tpu.memory_space<vmem>>, vector<256x32xbf16>,
    %c1_34 = arith.constant 1 : index
    %c2_35 = arith.constant 2 : index
    %c0_36 = arith.constant 0 : index
    %39 = vector.load %arg8[%c1_34, %c2_35, %c0_36] : memref<18x18x32xf32, #tpu.memory_space<vmem>>, vector<16x16x32xf32>
    %40 = vector.shape_cast %39 : vector<16x16x32xf32> to vector<256x32xf32>
    %41 = arith.truncf %40 : vector<256x32xf32> to vector<256x32xbf16>
    %c0_37 = arith.constant 0 : index
    %c160 = arith.constant 160 : index
    %42 = vector.load %arg9[%c0_37, %c160] : memref<256x288xbf16, #tpu.memory_space<vmem>>, vector<256x32xbf16>
    tpu.vector_store %arg9[%c0_37, %c160], %41 {strides = array<i32>} : memref<256x288xbf16, #tpu.memory_space<vmem>>, vector<256x32xbf16>,
    %c2_38 = arith.constant 2 : index
    %c0_39 = arith.constant 0 : index
    %c0_40 = arith.constant 0 : index
    %43 = vector.load %arg8[%c2_38, %c0_39, %c0_40] : memref<18x18x32xf32, #tpu.memory_space<vmem>>, vector<16x16x32xf32>
    %44 = vector.shape_cast %43 : vector<16x16x32xf32> to vector<256x32xf32>
    %45 = arith.truncf %44 : vector<256x32xf32> to vector<256x32xbf16>
    %c0_41 = arith.constant 0 : index
    %c192 = arith.constant 192 : index
    %46 = vector.load %arg9[%c0_41, %c192] : memref<256x288xbf16, #tpu.memory_space<vmem>>, vector<256x32xbf16>
    tpu.vector_store %arg9[%c0_41, %c192], %45 {strides = array<i32>} : memref<256x288xbf16, #tpu.memory_space<vmem>>, vector<256x32xbf16>,
    %c2_42 = arith.constant 2 : index
    %c1_43 = arith.constant 1 : index
    %c0_44 = arith.constant 0 : index
    %47 = vector.load %arg8[%c2_42, %c1_43, %c0_44] : memref<18x18x32xf32, #tpu.memory_space<vmem>>, vector<16x16x32xf32>
    %48 = vector.shape_cast %47 : vector<16x16x32xf32> to vector<256x32xf32>
    %49 = arith.truncf %48 : vector<256x32xf32> to vector<256x32xbf16>
    %c0_45 = arith.constant 0 : index
    %c224 = arith.constant 224 : index
    %50 = vector.load %arg9[%c0_45, %c224] : memref<256x288xbf16, #tpu.memory_space<vmem>>, vector<256x32xbf16>
    tpu.vector_store %arg9[%c0_45, %c224], %49 {strides = array<i32>} : memref<256x288xbf16, #tpu.memory_space<vmem>>, vector<256x32xbf16>,
    %c2_46 = arith.constant 2 : index
    %c2_47 = arith.constant 2 : index
    %c0_48 = arith.constant 0 : index
    %51 = vector.load %arg8[%c2_46, %c2_47, %c0_48] : memref<18x18x32xf32, #tpu.memory_space<vmem>>, vector<16x16x32xf32>
    %52 = vector.shape_cast %51 : vector<16x16x32xf32> to vector<256x32xf32>
    %53 = arith.truncf %52 : vector<256x32xf32> to vector<256x32xbf16>
    %c0_49 = arith.constant 0 : index
    %c256 = arith.constant 256 : index
    %54 = vector.load %arg9[%c0_49, %c256] : memref<256x288xbf16, #tpu.memory_space<vmem>>, vector<256x32xbf16>
    tpu.vector_store %arg9[%c0_49, %c256], %53 {strides = array<i32>} : memref<256x288xbf16, #tpu.memory_space<vmem>>, vector<256x32xbf16>,
    %c0_50 = arith.constant 0 : index
    %c0_51 = arith.constant 0 : index
    %55 = vector.load %arg9[%c0_50, %c0_51] : memref<256x288xbf16, #tpu.memory_space<vmem>>, vector<256x288xbf16>
    %c0_52 = arith.constant 0 : index
    %c0_53 = arith.constant 0 : index
    %56 = vector.load %arg4[%c0_52, %c0_53] : memref<288x32xbf16, #tpu.memory_space<vmem>>, vector<288x32xbf16>
    %cst_54 = arith.constant dense<0.000000e+00> : vector<256x32xf32>
    %57 = tpu.matmul %55, %56, %cst_54 {dimension_numbers = #tpu.dot_dimension_numbers<[1], [0], [0], [1], [0, 0, 1, 1], [], []>} : vector<256x288xbf16>, vector<288x32xbf16>, vector<256x32xf32> -> vector<256x32xf32>
    %c0_55 = arith.constant 0 : index
    %c0_56 = arith.constant 0 : index
    %58 = vector.load %arg5[%c0_55, %c0_56] : memref<1x32xf32, #tpu.memory_space<vmem>>, vector<1x32xf32>
    %59 = vector.broadcast %58 : vector<1x32xf32> to vector<256x32xf32>
    %60 = arith.addf %57, %59 : vector<256x32xf32>
    %61 = vector.shape_cast %60 : vector<256x32xf32> to vector<16x16x32xf32>
    %c0_57 = arith.constant 0 : index
    %c0_58 = arith.constant 0 : index
    %c0_59 = arith.constant 0 : index
    %c0_60 = arith.constant 0 : index
    %62 = vector.load %arg6[%c0_57, %c0_58, %c0_59, %c0_60] : memref<1x16x16x32xf32, #tpu.memory_space<vmem>>, vector<1x16x16x32xf32>
    %63 = vector.shape_cast %62 : vector<1x16x16x32xf32> to vector<16x16x32xf32>
    %64 = arith.addf %61, %63 : vector<16x16x32xf32>
    %cst_61 = arith.constant 1.000000e+00 : f32
    %65 = vector.broadcast %cst_61 : f32 to vector<16x16x32xf32>
    %66 = arith.mulf %64, %65 : vector<16x16x32xf32>
    %c0_62 = arith.constant 0 : index
    %c0_63 = arith.constant 0 : index
    %c0_64 = arith.constant 0 : index
    %c0_65 = arith.constant 0 : index
    %67 = vector.load %arg7[%c0_62, %c0_63, %c0_64, %c0_65] : memref<1x16x16x32xf32, #tpu.memory_space<vmem>>, vector<1x16x16x32xf32>
    %68 = vector.shape_cast %67 : vector<1x16x16x32xf32> to vector<16x16x32xf32>
    %69 = vector.shape_cast %66 : vector<16x16x32xf32> to vector<1x16x16x32xf32>
    tpu.vector_store %arg7[%c0_62, %c0_63, %c0_64, %c0_65], %69 {strides = array<i32>} : memref<1x16x16x32xf32, #tpu.memory_space<vmem>>, vector<1x16x16x32xf32>,
    return
  }
  func.func @transform_0(%arg0: i32) -> (i32, i32, i32, i32) {
    %c0_i32 = arith.constant 0 : i32
    %c0_i32_0 = arith.constant 0 : i32
    %c0_i32_1 = arith.constant 0 : i32
    %c0_i32_2 = arith.constant 0 : i32
    return %arg0, %c0_i32, %c0_i32_0, %c0_i32_1 : i32, i32, i32, i32
  }
  func.func @transform_1(%arg0: i32) -> (i32, i32) {
    %c0_i32 = arith.constant 0 : i32
    %c0_i32_0 = arith.constant 0 : i32
    %c0_i32_1 = arith.constant 0 : i32
    return %c0_i32, %c0_i32_0 : i32, i32
  }
  func.func @transform_2(%arg0: i32) -> (i32, i32) {
    %c0_i32 = arith.constant 0 : i32
    %c0_i32_0 = arith.constant 0 : i32
    %c0_i32_1 = arith.constant 0 : i32
    return %c0_i32, %c0_i32_0 : i32, i32
  }
  func.func @transform_3(%arg0: i32) -> (i32, i32) {
    %c0_i32 = arith.constant 0 : i32
    %c0_i32_0 = arith.constant 0 : i32
    %c0_i32_1 = arith.constant 0 : i32
    return %c0_i32, %c0_i32_0 : i32, i32
  }
  func.func @transform_4(%arg0: i32) -> (i32, i32) {
    %c0_i32 = arith.constant 0 : i32
    %c0_i32_0 = arith.constant 0 : i32
    %c0_i32_1 = arith.constant 0 : i32
    return %c0_i32, %c0_i32_0 : i32, i32
  }
  func.func @transform_5(%arg0: i32) -> (i32, i32, i32, i32) {
    %c0_i32 = arith.constant 0 : i32
    %c0_i32_0 = arith.constant 0 : i32
    %c0_i32_1 = arith.constant 0 : i32
    %c0_i32_2 = arith.constant 0 : i32
    return %arg0, %c0_i32, %c0_i32_0, %c0_i32_1 : i32, i32, i32, i32
  }
  func.func @transform_6(%arg0: i32) -> (i32, i32, i32, i32) {
    %c0_i32 = arith.constant 0 : i32
    %c0_i32_0 = arith.constant 0 : i32
    %c0_i32_1 = arith.constant 0 : i32
    %c0_i32_2 = arith.constant 0 : i32
    return %arg0, %c0_i32, %c0_i32_0, %c0_i32_1 : i32, i32, i32, i32
  }
}

</mosaic_0001>

<bundles_post_ra>
// kernel: discriminator_block2d_forward.3
= control target key start
LH: loop header
LB: loop body
LE: loop exit
PB: predicated region body
PF: predicated region fallthrough
CT: control target
= control target key end

     0   :  { %8 = vsyncpa [#allocation3], 0  ;;  %s806_s0 = inlined_call_operand.hbm [shape: f32[2,16,16,32], index: 0, kind: input, shape index: {}]   ;;  %s807_s1 = inlined_call_operand.vmem [shape: f32[2,1,32], index: 1, kind: output, shape index: {0}]   ;;  %s808_s2 = inlined_call_operand.vmem [shape: f32[2,1,32], index: 2, kind: output, shape index: {1}]  }
   0x1   :  { %10 = vsyncpa [#allocation3 + $0x1], 0  ;;  %s595_s9 = smov 0   ;;  %s597_s10 = smov 0  }
   0x2   :  { %s599_s11 = smov 0   ;;  %s601_s12 = smov 0  }
   0x3 LB: > { %s614_s13 = sadd.s32 4294967295, %s575_s12   ;;  %s617_s14 = sadd.s32 1, %s575_s12   ;;  %s575_s12 = sphi %s601_s12, %s815_s12   ;;  %s571_s11 = sphi %s599_s11, %s814_s11   ;;  %s567_s10 = sphi %s597_s10, %s813_s10   ;;  %s563_s9 = sphi %s595_s9, %s812_s9  }
   0x4   : > { %s20_s15 = ssub.s32 %s575_s12, %s617_s14  ;;  %s23_s16 = sadd.s32 1, %s571_s11 }
   0x5   : > { %p21_p0 = scmp.eq.s32.totalorder %s20_s15, 0  ;;  %p30_p1 = scmp.ne.s32.totalorder %s571_s11, %s567_s10 }
   0x6   : > { %p31_p2 = scmp.eq.s32.totalorder %s575_s12, 0  ;;  %p36_p3 = scmp.ne.s32.totalorder %s567_s10, %s563_s9 }
   0x7   : > { %s627_s17 = scalar_select %p21_p0, %s571_s11, %s23_s16  }
   0x8   : > { %p32_p4 = por %p31_p2, %p30_p1  ;;  %p37_p5 = scmp.eq.s32.totalorder %s614_s13, 0 }
   0x9   : > { %p476_p6 = scmp.lt.s32.totalorder %s575_s12, 2  ;;  %s112_s19 = sand.u32 1, %s571_s11  }
   0xa   : > { %p631_p7 = por %p37_p5, %p36_p3  ;;  %s462_s20 = sshll.u32 %s112_s19, 8 }
   0xb   : > { %s469_s21 = sshll.u32 %s575_s12, 12  ;;  %s116_s25 = scalar_lea.vmem [#allocation2], %s462_s20 }
   0xc   : > { %s640_s24 = scalar_lea.hbm %s806_s0, %s469_s21  ;;  %s123_s26 = sshll.u32 %s116_s25, 4  ;;  %s642_s26 = int_to_ptr.vmem [resolvable:$true] %s123_s26 }
   0xd   : > { %p644_p8 = pnand %p476_p6, %p32_p4  ;;  %s649_s28 = scalar_lea.sflag [#allocation3], %s112_s19 }
   0xe   : > { %s511_s29 = scalar_lea.hbm %s640_s24, 4096  ;;  %s516_s4 = scalar_lea.hbm %s806_s0, 8192 }
   0xf   : > { %p512_p10 = scmp.ne.s32.totalorder %s640_s24, %s511_s29  ;;  %p513_p11 = pneg %p644_p8 }
  0x10   : > { %p517_p0 = scmp.lt.u32.totalorder %s640_s24, %s806_s0  ;;  %p518_p1 = scmp.lt.u32.totalorder %s516_s4, %s511_s29 }
  0x11   : > { %p514_p12 = pnand %p513_p11, %p512_p10  ;;  %p520_p3 = scmp.lt.u32.totalorder %s511_s29, %s640_s24 }
  0x12   : > { %p519_p2 = por %p518_p1, %p517_p0 }
  0x13   : > { %p515_p13 = pneg %p514_p12 }
  0x14   : > { %p521_p4 = por %p520_p3, %p519_p2 }
  0x16   : > { %p522_p5 = pnand %p521_p4, %p515_p13 }
  0x18   : > { %525 = shalt.err (!%p522_p5)
}
  0x19   : > { %s526_s7 = scalar_lea.vmem %s642_s26, 4096  ;;  %s577_s8 = smov [#allocation2]  }
  0x1a   : > { %p527_p6 = scmp.ne.s32.totalorder %s642_s26, %s526_s7  ;;  %s531_s9 = sshll.u32 %s577_s8, 4  ;;  %s532_s9 = int_to_ptr.vmem [resolvable:$false] %s531_s9 }
  0x1b   : > { %s533_s15 = scalar_lea.vmem %s532_s9, 8192  ;;  %p534_p9 = scmp.lt.s32.totalorder %s642_s26, %s532_s9 }
  0x1c   : > { %p529_p10 = pnand %p527_p6, %p513_p11  ;;  %p535_p0 = scmp.lt.s32.totalorder %s533_s15, %s526_s7 }
  0x1e   : > { %p530_p12 = pneg %p529_p10  ;;  %p536_p1 = por %p535_p0, %p534_p9 }
  0x20   : > { %p537_p2 = pnand %p536_p1, %p530_p12 }
  0x22   : > { %540 = shalt.err (!%p537_p2)
}
  0x23   : > { %s578_s16 = smov 128   ;;  %s579_s19 = smov 8  }
  0x24   : > { %475 = dma.hbm_to_vmem [thread:$0]  (!%p644_p8), %s640_s24, 4096, %s642_s26, %s649_s28, %s578_s16, %s578_s16, %s579_s19  }
  0x25   : > { %p131_p11 = scmp.lt.s32.totalorder %s575_s12, 3  ;;  %p811_p13 = scmp.ge.s32.totalorder %s575_s12, 1 }
  0x27   : > { %p132_p3 = pnand %p811_p13, %p131_p11 }
  0x28   : > { %s137_s20 = sand.u32 (!%p132_p3), 1, %s567_s10  }
  0x29   : > { %135 = sbr.rel (%p132_p3) target bundleno = 131 (0x83), region = 24  ;;  %s466_s21 = sshll.u32 (!%p132_p3), %s137_s20, 8 }
  0x2a   : > { %s138_s22 = scalar_lea.sflag (!%p132_p3), [#allocation3], %s137_s20  ;;  %s681_s23 = scalar_lea.vmem (!%p132_p3), [#allocation2], %s466_s21 }
  0x30   : > { %558 = dma.done.wait (%p631_p7), %s138_s22, 4096  }
  0x31   : > { %560 = vsyncadd (%p631_p7), %s138_s22, 4294963200  ;;  %vm201_vm0 = vcmask 261120   ;;  %v169_v0 = vld [vmem:[%s681_s23] sm:$0xff]  ;;  %v170_v1 = vld [vmem:[%s681_s23 + $0x8] sm:$0xff]  ;;  %p163_p7 = scmp.lt.s32.totalorder %s614_s13, 1  ;;  %vm271_vm1 = vcmask 253952  }
  0x32   : > { %v171_v2 = vld [vmem:[%s681_s23 + $0x10] sm:$0xff]  ;;  %v202_v3 = vsel %vm201_vm0, %v169_v0, 0.0  ;;  %v203_v4 = vsel %vm201_vm0, %v170_v1, 0.0  ;;  %v172_v6 = vld [vmem:[%s681_s23 + $0x18] sm:$0xff]  ;;  %v173_v9 = vld [vmem:[%s681_s23 + $0x20] sm:$0xff]  ;;  %v273_v27 = vmul.f32 %v169_v0, %v169_v0  ;;  %v274_v28 = vmul.f32 %v170_v1, %v170_v1 }
  0x33   : > { %v205_v5 = vsel %vm201_vm0, %v171_v2, 0.0  ;;  %v204_v7 = vadd.f32 %v203_v4, %v202_v3  ;;  %v207_v8 = vsel %vm201_vm0, %v172_v6, 0.0  ;;  %v209_v11 = vsel %vm201_vm0, %v173_v9, 0.0  ;;  %v174_v12 = vld [vmem:[%s681_s23 + $0x28] sm:$0xff]  ;;  %v175_v15 = vld [vmem:[%s681_s23 + $0x30] sm:$0xff]  ;;  %v176_v18 = vld [vmem:[%s681_s23 + $0x38] sm:$0xff] }
  0x34   : > { %v211_v14 = vsel %vm201_vm0, %v174_v12, 0.0  ;;  %v213_v17 = vsel %vm201_vm0, %v175_v15, 0.0  ;;  %v215_v20 = vsel %vm201_vm0, %v176_v18, 0.0  ;;  %v177_v21 = vld [vmem:[%s681_s23 + $0x40] sm:$0xff]  ;;  %v178_v24 = vld [vmem:[%s681_s23 + $0x48] sm:$0xff]  ;;  %v275_v29 = vmul.f32 %v171_v2, %v171_v2  ;;  %v179_v30 = vld [vmem:[%s681_s23 + $0x50] sm:$0xff] }
  0x35   : > { %v206_v10 = vadd.f32 %v205_v5, %v204_v7  ;;  %v217_v23 = vsel %vm201_vm0, %v177_v21, 0.0  ;;  %v219_v26 = vsel %vm201_vm0, %v178_v24, 0.0  ;;  %v180_v32 = vld [vmem:[%s681_s23 + $0x58] sm:$0xff]  ;;  %v221_v33 = vsel %vm201_vm0, %v179_v30, 0.0  ;;  %v181_v41 = vld [vmem:[%s681_s23 + $0x60] sm:$0xff]  ;;  %v182_v47 = vld [vmem:[%s681_s23 + $0x68] sm:$0xff] }
  0x36   : > { %v276_v34 = vmul.f32 %v172_v6, %v172_v6  ;;  %v223_v36 = vsel %vm201_vm0, %v180_v32, 0.0  ;;  %v277_v37 = vmul.f32 %v173_v9, %v173_v9  ;;  %v305_v38 = vsel %vm201_vm0, %v273_v27, 0.0  ;;  %v183_v53 = vld [vmem:[%s681_s23 + $0x70] sm:$0xff]  ;;  %v184_v59 = vld [vmem:[%s681_s23 + $0x78] sm:$0xff]  ;;  %v185_v1 = vld [vmem:[%s681_s23 + $0x80] sm:$0xff]  ;;  %s817_s13 = smov (!%p163_p7, %s614_s13), 1 }
  0x37   : > { %v208_v13 = vadd.f32 %v207_v8, %v206_v10  ;;  %v306_v39 = vsel %vm201_vm0, %v274_v28, 0.0  ;;  %v308_v40 = vsel %vm201_vm0, %v275_v29, 0.0  ;;  %v225_v44 = vsel %vm201_vm0, %v181_v41, 0.0  ;;  %v186_v7 = vld [vmem:[%s681_s23 + $0x88] sm:$0xff]  ;;  %s165_s24 = scalar_lea.vmem %s807_s1, %s817_s13  ;;  %s168_s27 = scalar_lea.vmem %s808_s2, %s817_s13 }
  0x38   : > { %v307_v43 = vadd.f32 %v306_v39, %v305_v38  ;;  %v278_v45 = vmul.f32 %v174_v12, %v174_v12  ;;  %v310_v46 = vsel %vm201_vm0, %v276_v34, 0.0  ;;  %v227_v50 = vsel %vm201_vm0, %v182_v47, 0.0 }
  0x39   : > { %v210_v16 = vadd.f32 %v209_v11, %v208_v13  ;;  %v279_v51 = vmul.f32 %v175_v15, %v175_v15  ;;  %v312_v52 = vsel %vm201_vm0, %v277_v37, 0.0  ;;  %v229_v56 = vsel %vm201_vm0, %v183_v53, 0.0  ;;  %v187_v13 = vld [vmem:[%s681_s23 + $0x90] sm:$0xff] }
  0x3a   : > { %v309_v49 = vadd.f32 %v308_v40, %v307_v43  ;;  %v280_v57 = vmul.f32 %v176_v18, %v176_v18  ;;  %v314_v58 = vsel %vm201_vm0, %v278_v45, 0.0  ;;  %v231_v62 = vsel %vm201_vm0, %v184_v59, 0.0  ;;  %v191_v37 = vld [vmem:[%s681_s23 + $0xb0] sm:$0xff]  ;;  %v192_v43 = vld [vmem:[%s681_s23 + $0xb8] sm:$0xff] }
  0x3b   : > { %v212_v19 = vadd.f32 %v211_v14, %v210_v16  ;;  %v281_v63 = vmul.f32 %v177_v21, %v177_v21  ;;  %v316_v0 = vsel %vm201_vm0, %v279_v51, 0.0  ;;  %v233_v4 = vsel %vm201_vm0, %v185_v1, 0.0 }
  0x3c   : > { %v311_v55 = vadd.f32 %v310_v46, %v309_v49  ;;  %v282_v5 = vmul.f32 %v178_v24, %v178_v24  ;;  %v318_v6 = vsel %vm201_vm0, %v280_v57, 0.0  ;;  %v235_v10 = vsel %vm201_vm0, %v186_v7, 0.0  ;;  %v193_v49 = vld [vmem:[%s681_s23 + $0xc0] sm:$0xff] }
  0x3d   : > { %v214_v22 = vadd.f32 %v213_v17, %v212_v19  ;;  %v283_v11 = vmul.f32 %v179_v30, %v179_v30  ;;  %v320_v12 = vsel %vm201_vm0, %v281_v63, 0.0  ;;  %v237_v16 = vsel %vm201_vm0, %v187_v13, 0.0  ;;  %v188_v19 = vld [vmem:[%s681_s23 + $0x98] sm:$0xff] }
  0x3e   : > { %v313_v61 = vadd.f32 %v312_v52, %v311_v55  ;;  %v284_v17 = vmul.f32 %v180_v32, %v180_v32  ;;  %v322_v18 = vsel %vm201_vm0, %v282_v5, 0.0  ;;  %v286_v29 = vmul.f32 %v182_v47, %v182_v47  ;;  %v194_v55 = vld [vmem:[%s681_s23 + $0xc8] sm:$0xff] }
  0x3f   : > { %v216_v25 = vadd.f32 %v215_v20, %v214_v22  ;;  %v239_v22 = vsel %vm201_vm0, %v188_v19, 0.0  ;;  %v324_v24 = vsel %vm201_vm0, %v283_v11, 0.0  ;;  %v245_v40 = vsel %vm201_vm0, %v191_v37, 0.0 }
  0x40   : > { %v315_v3 = vadd.f32 %v314_v58, %v313_v61  ;;  %v326_v30 = vsel %vm201_vm0, %v284_v17, 0.0  ;;  %v247_v46 = vsel %vm201_vm0, %v192_v43, 0.0  ;;  %v289_v47 = vmul.f32 %v185_v1, %v185_v1  ;;  %v195_v61 = vld [vmem:[%s681_s23 + $0xd0] sm:$0xff] }
  0x41   : > { %v218_v31 = vadd.f32 %v217_v23, %v216_v25  ;;  %v285_v23 = vmul.f32 %v181_v41, %v181_v41  ;;  %v189_v25 = vld [vmem:[%s681_s23 + $0xa0] sm:$0xff]  ;;  %v288_v41 = vmul.f32 %v184_v59, %v184_v59  ;;  %v249_v52 = vsel %vm201_vm0, %v193_v49, 0.0 }
  0x42   : > { %v317_v9 = vadd.f32 %v316_v0, %v315_v3  ;;  %v241_v28 = vsel %vm201_vm0, %v189_v25, 0.0  ;;  %v251_v58 = vsel %vm201_vm0, %v194_v55, 0.0  ;;  %v291_v59 = vmul.f32 %v187_v13, %v187_v13  ;;  %v196_v3 = vld [vmem:[%s681_s23 + $0xd8] sm:$0xff] }
  0x43   : > { %v220_v35 = vadd.f32 %v219_v26, %v218_v31  ;;  %v190_v31 = vld [vmem:[%s681_s23 + $0xa8] sm:$0xff]  ;;  %v253_v0 = vsel %vm201_vm0, %v195_v61, 0.0  ;;  %v292_v1 = vmul.f32 %v188_v19, %v188_v19  ;;  %v295_v19 = vmul.f32 %v191_v37, %v191_v37 }
  0x44   : > { %v319_v15 = vadd.f32 %v318_v6, %v317_v9  ;;  %v243_v34 = vsel %vm201_vm0, %v190_v31, 0.0  ;;  %v255_v6 = vsel %vm201_vm0, %v196_v3, 0.0  ;;  %v197_v9 = vld [vmem:[%s681_s23 + $0xe0] sm:$0xff]  ;;  %v294_v13 = vmul.f32 %v190_v31, %v190_v31 }
  0x45   : > { %v222_v42 = vadd.f32 %v221_v33, %v220_v35  ;;  %v287_v35 = vmul.f32 %v183_v53, %v183_v53  ;;  %v290_v53 = vmul.f32 %v186_v7, %v186_v7  ;;  %v293_v7 = vmul.f32 %v189_v25, %v189_v25 }
  0x46   : > { %v321_v21 = vadd.f32 %v320_v12, %v319_v15  ;;  %v257_v12 = vsel %vm201_vm0, %v197_v9, 0.0  ;;  %v198_v15 = vld [vmem:[%s681_s23 + $0xe8] sm:$0xff]  ;;  %v296_v25 = vmul.f32 %v192_v43, %v192_v43  ;;  %v297_v31 = vmul.f32 %v193_v49, %v193_v49 }
  0x47   : > { %v224_v48 = vadd.f32 %v223_v36, %v222_v42  ;;  %v328_v36 = vsel %vm201_vm0, %v285_v23, 0.0  ;;  %v330_v42 = vsel %vm201_vm0, %v286_v29, 0.0  ;;  %v300_v43 = vmul.f32 %v196_v3, %v196_v3 }
  0x48   : > { %v323_v27 = vadd.f32 %v322_v18, %v321_v21  ;;  %v259_v18 = vsel %vm201_vm0, %v198_v15, 0.0  ;;  %v199_v21 = vld [vmem:[%s681_s23 + $0xf0] sm:$0xff] }
  0x49   : > { %v226_v54 = vadd.f32 %v225_v44, %v224_v48  ;;  %v332_v48 = vsel %vm201_vm0, %v287_v35, 0.0  ;;  %v298_v35 = vmul.f32 %v194_v55, %v194_v55  ;;  %v303_v55 = vmul.f32 %v199_v21, %v199_v21 }
  0x4a   : > { %v325_v33 = vadd.f32 %v324_v24, %v323_v27  ;;  %v261_v24 = vsel %vm201_vm0, %v199_v21, 0.0  ;;  %v200_v27 = vld [vmem:[%s681_s23 + $0xf8] sm:$0xff] }
  0x4b   : > { %v228_v60 = vadd.f32 %v227_v50, %v226_v54  ;;  %v334_v54 = vsel %vm201_vm0, %v288_v41, 0.0 }
  0x4c   : > { %v327_v39 = vadd.f32 %v326_v30, %v325_v33  ;;  %v263_v30 = vsel %vm201_vm0, %v200_v27, 0.0 }
  0x4d   : > { %v230_v2 = vadd.f32 %v229_v56, %v228_v60  ;;  %v336_v60 = vsel %vm201_vm0, %v289_v47, 0.0  ;;  %v301_v47 = vmul.f32 %v197_v9, %v197_v9 }
  0x4e   : > { %v329_v45 = vadd.f32 %v328_v36, %v327_v39  ;;  %v350_v36 = vsel %vm201_vm0, %v296_v25, 0.0  ;;  %v299_v39 = vmul.f32 %v195_v61, %v195_v61 }
  0x4f   : > { %v232_v8 = vadd.f32 %v231_v62, %v230_v2  ;;  %v338_v2 = vsel %vm201_vm0, %v290_v53, 0.0 }
  0x50   : > { %v331_v51 = vadd.f32 %v330_v42, %v329_v45 }
  0x51   : > { %v234_v14 = vadd.f32 %v233_v4, %v232_v8  ;;  %v340_v8 = vsel %vm201_vm0, %v291_v59, 0.0  ;;  %v304_v59 = vmul.f32 %v200_v27, %v200_v27 }
  0x52   : > { %v333_v57 = vadd.f32 %v332_v48, %v331_v51  ;;  %v356_v48 = vsel %vm201_vm0, %v299_v39, 0.0  ;;  %v302_v51 = vmul.f32 %v198_v15, %v198_v15 }
  0x53   : > { %v236_v20 = vadd.f32 %v235_v10, %v234_v14  ;;  %v342_v14 = vsel %vm201_vm0, %v292_v1, 0.0  ;;  %v366_v1 = vsel %vm201_vm0, %v304_v59, 0.0 }
  0x54   : > { %v335_v63 = vadd.f32 %v334_v54, %v333_v57 }
  0x55   : > { %v238_v26 = vadd.f32 %v237_v16, %v236_v20  ;;  %v344_v20 = vsel %vm201_vm0, %v293_v7, 0.0 }
  0x56   : > { %v337_v5 = vadd.f32 %v336_v60, %v335_v63  ;;  %v362_v60 = vsel %vm201_vm0, %v302_v51, 0.0  ;;  %v364_v63 = vsel %vm201_vm0, %v303_v55, 0.0 }
  0x57   : > { %v240_v32 = vadd.f32 %v239_v22, %v238_v26  ;;  %v346_v26 = vsel %vm201_vm0, %v294_v13, 0.0 }
  0x58   : > { %v339_v11 = vadd.f32 %v338_v2, %v337_v5 }
  0x59   : > { %v242_v38 = vadd.f32 %v241_v28, %v240_v32  ;;  %v348_v32 = vsel %vm201_vm0, %v295_v19, 0.0 }
  0x5a   : > { %v341_v17 = vadd.f32 %v340_v8, %v339_v11 }
  0x5b   : > { %v244_v44 = vadd.f32 %v243_v34, %v242_v38 }
  0x5c   : > { %v343_v23 = vadd.f32 %v342_v14, %v341_v17 }
  0x5d   : > { %v246_v50 = vadd.f32 %v245_v40, %v244_v44  ;;  %v352_v40 = vsel %vm201_vm0, %v297_v31, 0.0  ;;  %v354_v44 = vsel %vm201_vm0, %v298_v35, 0.0 }
  0x5e   : > { %v345_v29 = vadd.f32 %v344_v20, %v343_v23 }
  0x5f   : > { %v248_v56 = vadd.f32 %v247_v46, %v246_v50 }
  0x60   : > { %v347_v34 = vadd.f32 %v346_v26, %v345_v29 }
  0x61   : > { %v250_v62 = vadd.f32 %v249_v52, %v248_v56  ;;  %v358_v52 = vsel %vm201_vm0, %v300_v43, 0.0  ;;  %v360_v56 = vsel %vm201_vm0, %v301_v47, 0.0 }
  0x62   : > { %v349_v38 = vadd.f32 %v348_v32, %v347_v34 }
  0x63   : > { %v252_v4 = vadd.f32 %v251_v58, %v250_v62 }
  0x64   : > { %v351_v42 = vadd.f32 %v350_v36, %v349_v38 }
  0x65   : > { %v254_v10 = vadd.f32 %v253_v0, %v252_v4 }
  0x66   : > { %v353_v46 = vadd.f32 %v352_v40, %v351_v42 }
  0x67   : > { %v256_v16 = vadd.f32 %v255_v6, %v254_v10 }
  0x68   : > { %v355_v50 = vadd.f32 %v354_v44, %v353_v46 }
  0x69   : > { %v258_v22 = vadd.f32 %v257_v12, %v256_v16 }
  0x6a   : > { %v357_v54 = vadd.f32 %v356_v48, %v355_v50 }
  0x6b   : > { %v260_v28 = vadd.f32 %v259_v18, %v258_v22 }
  0x6c   : > { %v359_v58 = vadd.f32 %v358_v52, %v357_v54 }
  0x6d   : > { %v262_v33 = vadd.f32 %v261_v24, %v260_v28 }
  0x6e   : > { %v361_v62 = vadd.f32 %v360_v56, %v359_v58 }
  0x6f   : > { %v264_v37 = vadd.f32 %v263_v30, %v262_v33 }
  0x70   : > { %v363_v0 = vadd.f32 %v362_v60, %v361_v62 }
  0x71   : > { %v265_v41 = vrot.slane %v264_v37, 4 }
  0x72   : > { %v365_v2 = vadd.f32 %v364_v63, %v363_v0 }
  0x73   : > { %v266_v45 = vadd.f32 %v265_v41, %v264_v37 }
  0x74   : > { %v367_v3 = vadd.f32 %v366_v1, %v365_v2 }
  0x75   : > { %v267_v49 = vrot.slane %v266_v45, 2 }
  0x76   : > { %v368_v4 = vrot.slane %v367_v3, 4 }
  0x77   : > { %v268_v53 = vadd.f32 %v267_v49, %v266_v45 }
  0x78   : > { %v369_v5 = vadd.f32 %v368_v4, %v367_v3 }
  0x79   : > { %v269_v57 = vrot.slane %v268_v53, 1 }
  0x7a   : > { %v370_v6 = vrot.slane %v369_v5, 2 }
  0x7b   : > { %v270_v61 = vadd.f32 %v269_v57, %v268_v53 }
  0x7c   : > { %v371_v7 = vadd.f32 %v370_v6, %v369_v5 }
  0x7d   : > { %272 = vst.msk [vmem:[%s165_s24] sm:$0x1] %vm271_vm1, %v270_v61 }
  0x7e   : > { %v372_v8 = vrot.slane %v371_v7, 1 }
  0x80   : > { %v373_v9 = vadd.f32 %v372_v8, %v371_v7 }
  0x82   : > { %374 = vst.msk [vmem:[%s168_s27] sm:$0x1] %vm271_vm1, %v373_v9 }
  0x83 PF: > { %p13_p8 = scmp.ge.s32.totalorder %s617_s14, 4   ;;  %s812_s9 = smov %s567_s10 }
  0x84   : > { %s813_s10 = smov %s571_s11  ;;  %s814_s11 = smov %s627_s17 }
  0x85   : > { %s815_s12 = smov %s617_s14  ;;  %15 = sbr.rel (!%p13_p8) target bundleno = 3 (0x3), region = 76 }
  0x8c   :  { %404 = vsyncpa [#allocation3], 1 }
  0x8d   :  { %406 = vsyncpa [#allocation3 + $0x1], 1 }

// kernel: discriminator_block2d_forward.4
= control target key start
LH: loop header
LB: loop body
LE: loop exit
PB: predicated region body
PF: predicated region fallthrough
CT: control target
= control target key end

     0   :  { %s2942_s24 = smov 0   ;;  %s3975_s0 = inlined_call_operand.vmem [shape: f32[2,16,16,32], index: 0, kind: input, shape index: {}]   ;;  %s3976_s1 = inlined_call_operand.vmem [shape: f32[1,32], index: 1, kind: input, shape index: {}]   ;;  %s3977_s2 = inlined_call_operand.vmem [shape: f32[1,32], index: 2, kind: input, shape index: {}]   ;;  %s3978_s3 = inlined_call_operand.vmem [shape: bf16[288,32], index: 3, kind: input, shape index: {}]   ;;  %s3979_s4 = inlined_call_operand.vmem [shape: f32[1,32], index: 4, kind: input, shape index: {}]   ;;  %s3980_s5 = inlined_call_operand.vmem [shape: bf16[2,16,16,32], index: 5, kind: output, shape index: {0}]   ;;  %s3981_s6 = inlined_call_operand.vmem [shape: f32[2,1,32], index: 6, kind: output, shape index: {1}]   ;;  %s3982_s7 = inlined_call_operand.vmem [shape: f32[2,1,32], index: 7, kind: output, shape index: {2}]  }
   0x1 LB: > { %s2564_s25 = sadd.s32 4294967295, %s2896_s24   ;;  %p2568_p0 = scmp.ge.s32.totalorder %s2896_s24, 1  ;;  %s2896_s24 = sphi %s2942_s24, %s18_s24  }
   0x2   : > { %p242_p1 = scmp.lt.s32.totalorder %s2896_s24, 3 }
   0x4   : > { %p243_p2 = pnand %p2568_p0, %p242_p1 }
   0x5   : > { %vm503_vm0 = vcmask (!%p243_p2), 261120   ;;  %vm506_vm1 = vcmask (!%p243_p2), 254976   ;;  %v2872_v0 = vld [vmem:[%s3978_s3 + $0x40] sm:$0xff] (!%p243_p2)   ;;  %v2898_v1 = vmov (!%p243_p2), 0.0   ;;  %p280_p3 = scmp.lt.s32.totalorder (!%p243_p2), %s2564_s25, 1  ;;  %v2874_v4 = vld [vmem:[%s3978_s3 + $0x48] sm:$0xff] (!%p243_p2)  }
   0x6   : > { %246 = sbr.rel (%p243_p2) target bundleno = 610 (0x262), region = 40  ;;  %504 = vst.msk [vmem:[#allocation2] sm:$0xff] (!%p243_p2), %vm503_vm0, %v2898_v1  ;;  %505 = vst.msk [vmem:[#allocation2 + $0x8] sm:$0xff] (!%p243_p2), %vm503_vm0, %v2898_v1  ;;  %2678 = vmatprep.subr.bf16.mxu0 (!%p243_p2), %v2872_v0  ;;  %2844 = vmatprep.subr.bf16.mxu1 (!%p243_p2), %v2872_v0  ;;  %v3016_v2 = vld [vmem:[%s3976_s1] ss:$0 sm:$0xff] (!%p243_p2)  ;;  %v2875_v6 = vld [vmem:[%s3978_s3 + $0x8] sm:$0xff] (!%p243_p2)  }
   0x7   : > { %507 = vst.msk [vmem:[#allocation2 + $0x10] sm:$0x3] (!%p243_p2), %vm506_vm1, %v2898_v1  ;;  %510 = vst.msk [vmem:[#allocation2 + $0x28] sm:$0x3] (!%p243_p2), %vm506_vm1, %v2898_v1  ;;  %v2873_v3 = vld [vmem:[%s3978_s3] sm:$0xff] (!%p243_p2)   ;;  %v2876_v7 = vld [vmem:[%s3978_s3 + $0x50] sm:$0xff] (!%p243_p2)  }
   0x8   : > { %508 = vst.msk [vmem:[#allocation2 + $0x18] sm:$0xff] (!%p243_p2), %vm503_vm0, %v2898_v1  ;;  %509 = vst.msk [vmem:[#allocation2 + $0x20] sm:$0xff] (!%p243_p2), %vm503_vm0, %v2898_v1  ;;  %v3028_v5 = vld [vmem:[%s3977_s2] ss:$0 sm:$0xff] (!%p243_p2)  ;;  %2679 = vmatpush3.bf16.msra.mxu0 (!%p243_p2), %v2873_v3  ;;  %2852 = vmatpush3.bf16.msra.mxu1 (!%p243_p2), %v2873_v3  ;;  %s2899_s21 = smov (!%p243_p2), 64   ;;  %s2900_s22 = smov (!%p243_p2), 32  }
   0x9   : > { %511 = vst.msk [vmem:[#allocation2 + $0x30] sm:$0xff] (!%p243_p2), %vm503_vm0, %v2898_v1  ;;  %512 = vst.msk [vmem:[#allocation2 + $0x38] sm:$0xff] (!%p243_p2), %vm503_vm0, %v2898_v1  ;;  %2680 = vmatprep.subr.bf16.mxu0 (!%p243_p2), %v2874_v4  ;;  %2845 = vmatprep.subr.bf16.mxu1 (!%p243_p2), %v2874_v4  ;;  %v2877_v62 = vld [vmem:[%s3978_s3 + $0x10] sm:$0xff] (!%p243_p2)   ;;  %v2878_v4 = vld [vmem:[%s3978_s3 + $0x58] sm:$0xff] (!%p243_p2)   ;;  %s2901_s29 = smov (!%p243_p2), 96  }
   0xa   : > { %513 = vst.msk [vmem:[#allocation2 + $0x40] sm:$0x3] (!%p243_p2), %vm506_vm1, %v2898_v1  ;;  %516 = vst.msk [vmem:[#allocation2 + $0x58] sm:$0x3] (!%p243_p2), %vm506_vm1, %v2898_v1 }
   0xb   : > { %514 = vst.msk [vmem:[#allocation2 + $0x48] sm:$0xff] (!%p243_p2), %vm503_vm0, %v2898_v1  ;;  %515 = vst.msk [vmem:[#allocation2 + $0x50] sm:$0xff] (!%p243_p2), %vm503_vm0, %v2898_v1 }
   0xc   : > { %517 = vst.msk [vmem:[#allocation2 + $0x60] sm:$0xff] (!%p243_p2), %vm503_vm0, %v2898_v1  ;;  %518 = vst.msk [vmem:[#allocation2 + $0x68] sm:$0xff] (!%p243_p2), %vm503_vm0, %v2898_v1  ;;  %2681 = vmatpush3.bf16.msra.mxu0 (!%p243_p2), %v2875_v6  ;;  %2853 = vmatpush3.bf16.msra.mxu1 (!%p243_p2), %v2875_v6 }
   0xd   : > { %519 = vst.msk [vmem:[#allocation2 + $0x70] sm:$0x3] %vm506_vm1, %v2898_v1  ;;  %522 = vst.msk [vmem:[#allocation2 + $0x88] sm:$0x3] %vm506_vm1, %v2898_v1  ;;  %s3984_s25 = smov (!%p280_p3, %s2564_s25), 1  ;;  %v785_v11 = vld [vmem:[#allocation2 + $0x2] sm:$0xff]  ;;  %2682 = vmatprep.subr.bf16.mxu0 %v2876_v7  ;;  %2846 = vmatprep.subr.bf16.mxu1 %v2876_v7 }
   0xe   : > { %520 = vst.msk [vmem:[#allocation2 + $0x78] sm:$0xff] %vm503_vm0, %v2898_v1  ;;  %521 = vst.msk [vmem:[#allocation2 + $0x80] sm:$0xff] %vm503_vm0, %v2898_v1  ;;  %s2644_s11 = sshll.u32 %s3984_s25, 8  ;;  %v786_v12 = vld [vmem:[#allocation2 + $0xa] sm:$0xff]  ;;  %v656_v13 = vld [vmem:[#allocation2 + $0x1] sm:$0xff]  ;;  %s292_s16 = scalar_lea.vmem %s3981_s6, %s3984_s25 }
   0xf   : > { %523 = vst.msk [vmem:[#allocation2 + $0x90] sm:$0xff] %vm503_vm0, %v2898_v1  ;;  %524 = vst.msk [vmem:[#allocation2 + $0x98] sm:$0xff] %vm503_vm0, %v2898_v1  ;;  %s3036_s18 = scalar_lea.vmem %s3975_s0, %s2644_s11  ;;  %v817_v17 = vpack.c.bf16 %v786_v12, %v785_v11  ;;  %v657_v18 = vld [vmem:[#allocation2 + $0x9] sm:$0xff]  ;;  %s295_s20 = scalar_lea.vmem %s3982_s7, %s3984_s25 }
  0x10   : > { %525 = vst.msk [vmem:[#allocation2 + $0xa0] sm:$0x3] %vm506_vm1, %v2898_v1  ;;  %528 = vst.msk [vmem:[#allocation2 + $0xb8] sm:$0x3] %vm506_vm1, %v2898_v1  ;;  %v299_v8 = vld [vmem:[%s3036_s18 + $0x10] sm:$0xff]  ;;  %v300_v9 = vld [vmem:[%s3036_s18 + $0x18] sm:$0xff]  ;;  %v688_v21 = vpack.c.bf16 %v657_v18, %v656_v13  ;;  %2683 = vmatpush3.bf16.msra.mxu0 %v2877_v62  ;;  %2854 = vmatpush3.bf16.msra.mxu1 %v2877_v62 }
  0x11   : > { %526 = vst.msk [vmem:[#allocation2 + $0xa8] sm:$0xff] %vm503_vm0, %v2898_v1  ;;  %527 = vst.msk [vmem:[#allocation2 + $0xb0] sm:$0xff] %vm503_vm0, %v2898_v1  ;;  %v297_v10 = vld [vmem:[%s3036_s18] sm:$0xff]  ;;  %v338_v14 = vmul.f32 %v3016_v2, %v299_v8  ;;  %v339_v15 = vmul.f32 %v3016_v2, %v300_v9  ;;  %v298_v19 = vld [vmem:[%s3036_s18 + $0x8] sm:$0xff]  ;;  %849 = vrot.lane.b32.xlu1 %v817_v17, %s2899_s21  ;;  %2684 = vmatprep.subr.bf16.mxu0 %v2878_v4 }
  0x12   : > { %529 = vst.msk [vmem:[#allocation2 + $0xc0] sm:$0xff] %vm503_vm0, %v2898_v1  ;;  %530 = vst.msk [vmem:[#allocation2 + $0xc8] sm:$0xff] %vm503_vm0, %v2898_v1  ;;  %v336_v16 = vmul.f32 %v3016_v2, %v297_v10  ;;  %v301_v20 = vld [vmem:[%s3036_s18 + $0x20] sm:$0xff]  ;;  %v337_v24 = vmul.f32 %v3016_v2, %v298_v19  ;;  %v302_v25 = vld [vmem:[%s3036_s18 + $0x28] sm:$0xff]  ;;  %720 = vrot.lane.b32.xlu0 %v688_v21, %s2900_s22  ;;  %2847 = vmatprep.subr.bf16.mxu1 %v2878_v4 }
  0x13   : > { %531 = vst.msk [vmem:[#allocation2 + $0xd0] sm:$0x3] %vm506_vm1, %v2898_v1  ;;  %534 = vst.msk [vmem:[#allocation2 + $0xe8] sm:$0x3] %vm506_vm1, %v2898_v1  ;;  %v377_v22 = vadd.f32 %v3028_v5, %v338_v14  ;;  %v378_v23 = vadd.f32 %v3028_v5, %v339_v15  ;;  %v321_v26 = vld [vmem:[%s3036_s18 + $0xc0] sm:$0xff]  ;;  %v340_v28 = vmul.f32 %v3016_v2, %v301_v20  ;;  %v322_v30 = vld [vmem:[%s3036_s18 + $0xc8] sm:$0xff] }
  0x14   : > { %532 = vst.msk [vmem:[#allocation2 + $0xd8] sm:$0xff] %vm503_vm0, %v2898_v1  ;;  %533 = vst.msk [vmem:[#allocation2 + $0xe0] sm:$0xff] %vm503_vm0, %v2898_v1  ;;  %v375_v27 = vadd.f32 %v3028_v5, %v336_v16  ;;  %v341_v29 = vmul.f32 %v3016_v2, %v302_v25  ;;  %v360_v31 = vmul.f32 %v3016_v2, %v321_v26  ;;  %v319_v41 = vld [vmem:[%s3036_s18 + $0xb0] sm:$0xff]  ;;  %v320_v42 = vld [vmem:[%s3036_s18 + $0xb8] sm:$0xff] }
  0x15   : > { %535 = vst.msk [vmem:[#allocation2 + $0xf0] sm:$0xff] %vm503_vm0, %v2898_v1  ;;  %536 = vst.msk [vmem:[#allocation2 + $0xf8] sm:$0xff] %vm503_vm0, %v2898_v1  ;;  %vm409_vm2 = vcmp.ge.f32.partialorder %v377_v22, 0.0  ;;  %vm410_vm3 = vcmp.ge.f32.partialorder %v378_v23, 0.0  ;;  %v441_v32 = vmul.f32 0.2, %v377_v22  ;;  %v376_v34 = vadd.f32 %v3028_v5, %v337_v24 }
  0x16   : > { %537 = vst.msk [vmem:[#allocation2 + $0x100] sm:$0x3] %vm506_vm1, %v2898_v1  ;;  %540 = vst.msk [vmem:[#allocation2 + $0x118] sm:$0x3] %vm506_vm1, %v2898_v1  ;;  %v442_v33 = vmul.f32 0.2, %v378_v23  ;;  %v379_v36 = vadd.f32 %v3028_v5, %v340_v28  ;;  %v380_v39 = vadd.f32 %v3028_v5, %v341_v29  ;;  %v361_v40 = vmul.f32 %v3016_v2, %v322_v30 }
  0x17   : > { %538 = vst.msk [vmem:[#allocation2 + $0x108] sm:$0xff] %vm503_vm0, %v2898_v1  ;;  %539 = vst.msk [vmem:[#allocation2 + $0x110] sm:$0xff] %vm503_vm0, %v2898_v1  ;;  %vm407_vm4 = vcmp.ge.f32.partialorder %v375_v27, 0.0  ;;  %v439_v35 = vmul.f32 0.2, %v375_v27  ;;  %v473_v37 = vsel %vm409_vm2, %v377_v22, %v441_v32  ;;  %vm408_vm5 = vcmp.ge.f32.partialorder %v376_v34, 0.0 }
  0x18   : > { %541 = vst.msk [vmem:[#allocation2 + $0x120] sm:$0xff] %vm503_vm0, %v2898_v1  ;;  %542 = vst.msk [vmem:[#allocation2 + $0x128] sm:$0xff] %vm503_vm0, %v2898_v1  ;;  %v474_v38 = vsel %vm410_vm3, %v378_v23, %v442_v33  ;;  %v440_v43 = vmul.f32 0.2, %v376_v34  ;;  %vm411_vm6 = vcmp.ge.f32.partialorder %v379_v36, 0.0  ;;  %vm412_vm7 = vcmp.ge.f32.partialorder %v380_v39, 0.0 }
  0x19   : > { %543 = vst.msk [vmem:[#allocation2 + $0x130] sm:$0x3] %vm506_vm1, %v2898_v1  ;;  %546 = vst.msk [vmem:[#allocation2 + $0x148] sm:$0x3] %vm506_vm1, %v2898_v1  ;;  %v471_v44 = vsel %vm407_vm4, %v375_v27, %v439_v35  ;;  %v443_v45 = vmul.f32 0.2, %v379_v36  ;;  %v399_v47 = vadd.f32 %v3028_v5, %v360_v31  ;;  %v400_v49 = vadd.f32 %v3028_v5, %v361_v40 }
  0x1a   : > { %544 = vst.msk [vmem:[#allocation2 + $0x138] sm:$0xff] %vm503_vm0, %v2898_v1  ;;  %545 = vst.msk [vmem:[#allocation2 + $0x140] sm:$0xff] %vm503_vm0, %v2898_v1  ;;  %v444_v46 = vmul.f32 0.2, %v380_v39  ;;  %v472_v48 = vsel %vm408_vm5, %v376_v34, %v440_v43  ;;  %v358_v50 = vmul.f32 %v3016_v2, %v319_v41  ;;  %v359_v51 = vmul.f32 %v3016_v2, %v320_v42  ;;  %v303_v52 = vld [vmem:[%s3036_s18 + $0x30] sm:$0xff]  ;;  %v304_v53 = vld [vmem:[%s3036_s18 + $0x38] sm:$0xff] }
  0x1b   : > { %547 = vst.msk [vmem:[#allocation2 + $0x150] sm:$0xff] %vm503_vm0, %v2898_v1  ;;  %548 = vst.msk [vmem:[#allocation2 + $0x158] sm:$0xff] %vm503_vm0, %v2898_v1  ;;  %v323_v54 = vld [vmem:[%s3036_s18 + $0xd0] sm:$0xff]  ;;  %v475_v55 = vsel %vm411_vm6, %v379_v36, %v443_v45  ;;  %vm431_vm8 = vcmp.ge.f32.partialorder %v399_v47, 0.0  ;;  %v463_v57 = vmul.f32 0.2, %v399_v47  ;;  %v342_v0 = vmul.f32 %v3016_v2, %v303_v52 }
  0x1c   : > { %549 = vst.msk [vmem:[#allocation2 + $0x160] sm:$0x3] %vm506_vm1, %v2898_v1  ;;  %552 = vst.msk [vmem:[#allocation2 + $0x178] sm:$0x3] %vm506_vm1, %v2898_v1  ;;  %v476_v56 = vsel %vm412_vm7, %v380_v39, %v444_v46  ;;  %v324_v58 = vld [vmem:[%s3036_s18 + $0xd8] sm:$0xff]  ;;  %vm432_vm9 = vcmp.ge.f32.partialorder %v400_v49, 0.0  ;;  %v397_v60 = vadd.f32 %v3028_v5, %v358_v50  ;;  %v398_v61 = vadd.f32 %v3028_v5, %v359_v51 }
  0x1d   : > { %550 = vst.msk [vmem:[#allocation2 + $0x168] sm:$0xff] %vm503_vm0, %v2898_v1  ;;  %551 = vst.msk [vmem:[#allocation2 + $0x170] sm:$0xff] %vm503_vm0, %v2898_v1  ;;  %v464_v59 = vmul.f32 0.2, %v400_v49  ;;  %v495_v63 = vsel %vm431_vm8, %v399_v47, %v463_v57  ;;  %v362_v3 = vmul.f32 %v3016_v2, %v323_v54  ;;  %v305_v8 = vld [vmem:[%s3036_s18 + $0x40] sm:$0xff]  ;;  %v381_v13 = vadd.f32 %v3028_v5, %v342_v0  ;;  %v306_v21 = vld [vmem:[%s3036_s18 + $0x48] sm:$0xff] }
  0x1e   : > { %553 = vst.msk [vmem:[#allocation2 + $0x180] sm:$0xff] %vm503_vm0, %v2898_v1  ;;  %554 = vst.msk [vmem:[#allocation2 + $0x188] sm:$0xff] %vm503_vm0, %v2898_v1  ;;  %vm429_vm10 = vcmp.ge.f32.partialorder %v397_v60, 0.0  ;;  %vm430_vm11 = vcmp.ge.f32.partialorder %v398_v61, 0.0  ;;  %v461_v7 = vmul.f32 0.2, %v397_v60  ;;  %v363_v15 = vmul.f32 %v3016_v2, %v324_v58 }
  0x1f   : > { %555 = vst.msk [vmem:[#allocation2 + $0x190] sm:$0x3] %vm506_vm1, %v2898_v1  ;;  %558 = vst.msk [vmem:[#allocation2 + $0x1a8] sm:$0x3] %vm506_vm1, %v2898_v1  ;;  %v496_v6 = vsel %vm432_vm9, %v400_v49, %v464_v59  ;;  %v462_v12 = vmul.f32 0.2, %v398_v61  ;;  %v401_v20 = vadd.f32 %v3028_v5, %v362_v3  ;;  %v344_v30 = vmul.f32 %v3016_v2, %v305_v8 }
  0x20   : > { %556 = vst.msk [vmem:[#allocation2 + $0x198] sm:$0xff] %vm503_vm0, %v2898_v1  ;;  %557 = vst.msk [vmem:[#allocation2 + $0x1a0] sm:$0xff] %vm503_vm0, %v2898_v1  ;;  %v343_v1 = vmul.f32 %v3016_v2, %v304_v53  ;;  %v493_v19 = vsel %vm429_vm10, %v397_v60, %v461_v7  ;;  %vm413_vm12 = vcmp.ge.f32.partialorder %v381_v13, 0.0  ;;  %v445_v28 = vmul.f32 0.2, %v381_v13  ;;  %v326_v49 = vld [vmem:[%s3036_s18 + $0xe8] sm:$0xff] }
  0x21   : > { %562 = vst.msk [vmem:[#allocation2 + $0x31] sm:$0xff] %vm503_vm0, %v473_v37  ;;  %563 = vst.msk [vmem:[#allocation2 + $0x39] sm:$0xff] %vm503_vm0, %v474_v38  ;;  %v494_v24 = vsel %vm430_vm11, %v398_v61, %v462_v12  ;;  %v402_v29 = vadd.f32 %v3028_v5, %v363_v15  ;;  %v345_v36 = vmul.f32 %v3016_v2, %v306_v21  ;;  %v325_v37 = vld [vmem:[%s3036_s18 + $0xe0] sm:$0xff]  ;;  %vm433_vm14 = vcmp.ge.f32.partialorder %v401_v20, 0.0  ;;  %v307_v51 = vld [vmem:[%s3036_s18 + $0x50] sm:$0xff] }
  0x22   : > { %560 = vst.msk [vmem:[#allocation2 + $0x19] sm:$0xff] %vm503_vm0, %v471_v44  ;;  %561 = vst.msk [vmem:[#allocation2 + $0x21] sm:$0xff] %vm503_vm0, %v472_v48  ;;  %v382_v14 = vadd.f32 %v3028_v5, %v343_v1  ;;  %v477_v42 = vsel %vm413_vm12, %v381_v13, %v445_v28  ;;  %v465_v45 = vmul.f32 0.2, %v401_v20  ;;  %v383_v47 = vadd.f32 %v3028_v5, %v344_v30  ;;  %v308_v52 = vld [vmem:[%s3036_s18 + $0x58] sm:$0xff]  ;;  %v327_v1 = vld [vmem:[%s3036_s18 + $0xf0] sm:$0xff] }
  0x23   : > { %564 = vst.msk [vmem:[#allocation2 + $0x49] sm:$0xff] %vm503_vm0, %v475_v55  ;;  %565 = vst.msk [vmem:[#allocation2 + $0x51] sm:$0xff] %vm503_vm0, %v476_v56  ;;  %vm434_vm15 = vcmp.ge.f32.partialorder %v402_v29, 0.0  ;;  %v466_v46 = vmul.f32 0.2, %v402_v29  ;;  %v384_v48 = vadd.f32 %v3028_v5, %v345_v36  ;;  %v364_v50 = vmul.f32 %v3016_v2, %v325_v37  ;;  %v2879_v60 = vld [vmem:[%s3978_s3 + $0x18] sm:$0xff]  }
  0x24   : > { %584 = vst.msk [vmem:[#allocation2 + $0x139] sm:$0xff] %vm503_vm0, %v495_v63  ;;  %585 = vst.msk [vmem:[#allocation2 + $0x141] sm:$0xff] %vm503_vm0, %v496_v6  ;;  %vm414_vm13 = vcmp.ge.f32.partialorder %v382_v14, 0.0  ;;  %v446_v35 = vmul.f32 0.2, %v382_v14  ;;  %v497_v54 = vsel %vm433_vm14, %v401_v20, %v465_v45  ;;  %vm415_vm1 = vcmp.ge.f32.partialorder %v383_v47, 0.0  ;;  %2685 = vmatpush3.bf16.msra.mxu0 %v2879_v60  ;;  %2855 = vmatpush3.bf16.msra.mxu1 %v2879_v60 }
  0x25   : > { %582 = vst.msk [vmem:[#allocation2 + $0x121] sm:$0xff] %vm503_vm0, %v493_v19  ;;  %583 = vst.msk [vmem:[#allocation2 + $0x129] sm:$0xff] %vm503_vm0, %v494_v24  ;;  %v498_v55 = vsel %vm434_vm15, %v402_v29, %v466_v46  ;;  %vm416_vm2 = vcmp.ge.f32.partialorder %v384_v48, 0.0  ;;  %v447_v59 = vmul.f32 0.2, %v383_v47  ;;  %v365_v62 = vmul.f32 %v3016_v2, %v326_v49  ;;  %v328_v3 = vld [vmem:[%s3036_s18 + $0xf8] sm:$0xff] }
  0x26   : > { %v478_v44 = vsel %vm414_vm13, %v382_v14, %v446_v35  ;;  %566 = vst.msk [vmem:[#allocation2 + $0x61] sm:$0xff] %vm503_vm0, %v477_v42  ;;  %586 = vst.msk [vmem:[#allocation2 + $0x151] sm:$0xff] %vm503_vm0, %v497_v54  ;;  %v448_v61 = vmul.f32 0.2, %v384_v48  ;;  %v403_v63 = vadd.f32 %v3028_v5, %v364_v50  ;;  %v346_v0 = vmul.f32 %v3016_v2, %v307_v51  ;;  %v309_v4 = vld [vmem:[%s3036_s18 + $0x60] sm:$0xff]  ;;  %v310_v24 = vld [vmem:[%s3036_s18 + $0x68] sm:$0xff] }
  0x27   : > { %567 = vst.msk [vmem:[#allocation2 + $0x69] sm:$0xff] %vm503_vm0, %v478_v44  ;;  %587 = vst.msk [vmem:[#allocation2 + $0x159] sm:$0xff] %vm503_vm0, %v498_v55  ;;  %v479_v8 = vsel %vm415_vm1, %v383_v47, %v447_v59  ;;  %v2880_v13 = vld [vmem:[%s3978_s3 + $0x60] sm:$0xff]   ;;  %v2882_v37 = vld [vmem:[%s3978_s3 + $0x68] sm:$0xff]  }
  0x28   : > { %v1236_v9 = vld [vmem:[#allocation2 + $0x30] sm:$0xff]  ;;  %v1237_v10 = vld [vmem:[#allocation2 + $0x38] sm:$0xff]  ;;  %568 = vst.msk [vmem:[#allocation2 + $0x79] sm:$0xff] %vm503_vm0, %v479_v8  ;;  %vm435_vm3 = vcmp.ge.f32.partialorder %v403_v63, 0.0  ;;  %v467_v12 = vmul.f32 0.2, %v403_v63  ;;  %v385_v14 = vadd.f32 %v3028_v5, %v346_v0  ;;  %2686 = vmatprep.subr.bf16.mxu0 %v2880_v13  ;;  %2848 = vmatprep.subr.bf16.mxu1 %v2880_v13 }
  0x29   : > { %v1364_v11 = vld [vmem:[#allocation2 + $0x31] sm:$0xff]  ;;  %v3098_v16 = vpack.c.bf16 %v1237_v10, %v1236_v9  ;;  %v1365_v17 = vld [vmem:[#allocation2 + $0x39] sm:$0xff]  ;;  %v1108_v26 = vld [vmem:[#allocation2 + $0x22] sm:$0xff]  ;;  %v347_v9 = vmul.f32 %v3016_v2, %v308_v52  ;;  %v480_v10 = vsel %vm416_vm2, %v384_v48, %v448_v61 }
  0x2a   : > { %v914_v18 = vld [vmem:[#allocation2 + $0x18] sm:$0xff]  ;;  %v3103_v22 = vpack.c.bf16 %v1365_v17, %v1364_v11  ;;  %v915_v27 = vld [vmem:[#allocation2 + $0x20] sm:$0xff]  ;;  %v1366_v40 = vld [vmem:[#allocation2 + $0x49] sm:$0xff]  ;;  %v404_v11 = vadd.f32 %v3028_v5, %v365_v62  ;;  %569 = vst.msk [vmem:[#allocation2 + $0x81] sm:$0xff] %vm503_vm0, %v480_v10  ;;  %v366_v17 = vmul.f32 %v3016_v2, %v327_v1  ;;  %vm417_vm5 = vcmp.ge.f32.partialorder %v385_v14, 0.0 }
  0x2b   : > { %v658_v23 = vld [vmem:[#allocation2 + $0x19] sm:$0xff]  ;;  %1300 = vrot.lane.b32.xlu1 %v3098_v16, %s2899_s21  ;;  %v946_v32 = vpack.c.bf16 %v915_v27, %v914_v18  ;;  %v659_v34 = vld [vmem:[#allocation2 + $0x21] sm:$0xff]  ;;  %v1367_v41 = vld [vmem:[#allocation2 + $0x51] sm:$0xff]  ;;  %v386_v15 = vadd.f32 %v3028_v5, %v347_v9  ;;  %v367_v18 = vmul.f32 %v3016_v2, %v328_v3  ;;  %v449_v29 = vmul.f32 0.2, %v385_v14 }
  0x2c   : > { %v1107_v25 = vld [vmem:[#allocation2 + $0x1a] sm:$0xff]  ;;  %v1109_v33 = vld [vmem:[#allocation2 + $0x32] sm:$0xff]  ;;  %1092 = vst.msk [vmem:[#allocation3 + $0x20] sm:$0xff] %vm503_vm0, %v3103_v22  ;;  %v689_v39 = vpack.c.bf16 %v659_v34, %v658_v23  ;;  %v3121_v43 = vpack.c.bf16 %v1367_v41, %v1366_v40  ;;  %v1238_v6 = vld [vmem:[#allocation2 + $0x48] sm:$0xff]  ;;  %vm436_vm4 = vcmp.ge.f32.partialorder %v404_v11, 0.0  ;;  %v499_v23 = vsel %vm435_vm3, %v403_v63, %v467_v12 }
  0x2d   : > { %v3112_v31 = vpack.c.bf16 %v1108_v26, %v1107_v25  ;;  %v1110_v38 = vld [vmem:[#allocation2 + $0x3a] sm:$0xff]  ;;  %641 = vst.msk [vmem:[#allocation3 + $0x18] sm:$0xff] %vm503_vm0, %v946_v32  ;;  %v1239_v7 = vld [vmem:[#allocation2 + $0x50] sm:$0xff]  ;;  %v468_v21 = vmul.f32 0.2, %v404_v11  ;;  %v1132_v25 = vld [vmem:[#allocation2 + $0x142] sm:$0xff]  ;;  %v348_v26 = vmul.f32 %v3016_v2, %v309_v4  ;;  %v405_v30 = vadd.f32 %v3028_v5, %v366_v17 }
  0x2e   : > { %1091 = vst.msk [vmem:[#allocation3 + $0x8] sm:$0xff] %vm503_vm0, %v689_v39  ;;  %v3135_v53 = vpack.c.bf16 %v1110_v38, %v1109_v33  ;;  %v682_v56 = vld [vmem:[#allocation2 + $0x139] sm:$0xff]  ;;  %v683_v57 = vld [vmem:[#allocation2 + $0x141] sm:$0xff]  ;;  %1093 = vst.msk [vmem:[#allocation3 + $0x38] sm:$0xff] %vm503_vm0, %v3121_v43  ;;  %v3173_v19 = vpack.c.bf16 %v1239_v7, %v1238_v6  ;;  %vm418_vm6 = vcmp.ge.f32.partialorder %v386_v15, 0.0  ;;  %v406_v33 = vadd.f32 %v3028_v5, %v367_v18 }
  0x2f   : > { %1171 = vrot.lane.b32.xlu0 %v3112_v31, %s2900_s22  ;;  %978 = vrot.lane.b32.xlu1 %v946_v32, %s2901_s29  ;;  %v3143_v58 = vpack.c.bf16 %v683_v57, %v682_v56  ;;  %v1131_v20 = vld [vmem:[#allocation2 + $0x13a] sm:$0xff]  ;;  %588 = vst.msk [vmem:[#allocation2 + $0x169] sm:$0xff] %vm503_vm0, %v499_v23  ;;  %v500_v28 = vsel %vm436_vm4, %v404_v11, %v468_v21  ;;  %v1111_v32 = vld [vmem:[#allocation2 + $0x4a] sm:$0xff]  ;;  %vm437_vm7 = vcmp.ge.f32.partialorder %v405_v30, 0.0  ;;  %v1112_v38 = vld [vmem:[#allocation2 + $0x52] sm:$0xff]  ;;  %vm768_vm4 = vcmask 523520  }
  0x30   : > { %v2881_v27 = vld [vmem:[%s3978_s3 + $0x20] sm:$0xff]   ;;  %589 = vst.msk [vmem:[#allocation2 + $0x171] sm:$0xff] %vm503_vm0, %v500_v28  ;;  %v349_v34 = vmul.f32 %v3016_v2, %v310_v24  ;;  %v3189_v35 = vpack.c.bf16 %v1132_v25, %v1131_v20  ;;  %v481_v36 = vsel %vm417_vm5, %v385_v14, %v449_v29  ;;  %vm438_vm8 = vcmp.ge.f32.partialorder %v406_v33, 0.0  ;;  %v2883_v44 = vld [vmem:[%s3978_s3 + $0x28] sm:$0xff]   ;;  %v2884_v54 = vld [vmem:[%s3978_s3 + $0x70] sm:$0xff]  }
  0x31   : > { %1103 = vst.msk [vmem:[#allocation3 + $0x128] sm:$0xff] %vm503_vm0, %v3143_v58  ;;  %2687 = vmatpush3.bf16.msra.mxu0 %v2881_v27  ;;  %2856 = vmatpush3.bf16.msra.mxu1 %v2881_v27  ;;  %570 = vst.msk [vmem:[#allocation2 + $0x91] sm:$0xff] %vm503_vm0, %v481_v36  ;;  %v469_v41 = vmul.f32 0.2, %v405_v30  ;;  %v387_v42 = vadd.f32 %v3028_v5, %v348_v26  ;;  %v681_v45 = vld [vmem:[#allocation2 + $0x129] sm:$0xff]  ;;  %v592_v48 = vld [vmem:[#allocation2] sm:$0xff]  ;;  %v3208_v50 = vpack.c.bf16 %v1112_v38, %v1111_v32 }
  0x32   : > { %v470_v46 = vmul.f32 0.2, %v406_v33  ;;  %v593_v47 = vld [vmem:[#allocation2 + $0x8] sm:$0xff]  ;;  %2688 = vmatprep.subr.bf16.mxu0 %v2882_v37  ;;  %2849 = vmatprep.subr.bf16.mxu1 %v2882_v37  ;;  %v1260_v59 = vld [vmem:[#allocation2 + $0x150] sm:$0xff]  ;;  %v1261_v60 = vld [vmem:[#allocation2 + $0x158] sm:$0xff]  ;;  %vm897_vm5 = vcmask 785920  }
  0x33   : > { %1428 = vrot.lane.b32.xlu0 %v3103_v22, %s2901_s29  ;;  %722 = vrot.lane.b32.xlu1 %v689_v39, %s2900_s22  ;;  %v680_v39 = vld [vmem:[#allocation2 + $0x121] sm:$0xff]  ;;  %v501_v49 = vsel %vm437_vm7, %v405_v30, %v469_v41  ;;  %vm419_vm9 = vcmp.ge.f32.partialorder %v387_v42, 0.0  ;;  %v451_v52 = vmul.f32 0.2, %v387_v42  ;;  %v624_v57 = vpack.c.bf16 %v593_v47, %v592_v48  ;;  %v311_v63 = vld [vmem:[%s3036_s18 + $0x70] sm:$0xff]  ;;  %v312_v0 = vld [vmem:[%s3036_s18 + $0x78] sm:$0xff] }
  0x34   : > { %v502_v51 = vsel %vm438_vm8, %v406_v33, %v470_v46  ;;  %590 = vst.msk [vmem:[#allocation2 + $0x181] sm:$0xff] %vm503_vm0, %v501_v49  ;;  %v700_v55 = vpack.c.bf16 %v681_v45, %v680_v39  ;;  %v350_v1 = vmul.f32 %v3016_v2, %v311_v63  ;;  %v1240_v3 = vld [vmem:[#allocation2 + $0x60] sm:$0xff]  ;;  %v1241_v4 = vld [vmem:[#allocation2 + $0x68] sm:$0xff]  ;;  %v3228_v6 = vpack.c.bf16 %v1261_v60, %v1260_v59  ;;  %v2885_v12 = vld [vmem:[%s3978_s3 + $0x30] sm:$0xff]  }
  0x35   : > { %2689 = vmatpush3.bf16.msra.mxu0 %v2883_v44  ;;  %2857 = vmatpush3.bf16.msra.mxu1 %v2883_v44  ;;  %591 = vst.msk [vmem:[#allocation2 + $0x189] sm:$0xff] %vm503_vm0, %v502_v51  ;;  %v483_v61 = vsel %vm419_vm9, %v387_v42, %v451_v52  ;;  %640 = vst.msk [vmem:[#allocation3] sm:$0xff] %vm503_vm0, %v624_v57  ;;  %v809_v7 = vld [vmem:[#allocation2 + $0x122] sm:$0xff]  ;;  %v351_v8 = vmul.f32 %v3016_v2, %v312_v0  ;;  %v810_v9 = vld [vmem:[#allocation2 + $0x12a] sm:$0xff]  ;;  %vm2426_vm7 = vcmask 257024   ;;  %vm2194_vm8 = vcmask 253952  }
  0x36   : > { %2690 = vmatprep.subr.bf16.mxu0 %v2884_v54  ;;  %2850 = vmatprep.subr.bf16.mxu1 %v2884_v54  ;;  %572 = vst.msk [vmem:[#allocation2 + $0xa9] sm:$0xff] %vm503_vm0, %v483_v61  ;;  %v389_v10 = vadd.f32 %v3028_v5, %v350_v1  ;;  %v3238_v13 = vpack.c.bf16 %v1241_v4, %v1240_v3  ;;  %v1368_v17 = vld [vmem:[#allocation2 + $0x61] sm:$0xff]  ;;  %v1369_v18 = vld [vmem:[#allocation2 + $0x69] sm:$0xff]  ;;  %v1388_v20 = vld [vmem:[#allocation2 + $0x151] sm:$0xff] }
  0x37   : > { %1173 = vrot.lane.b32.xlu0 %v3135_v53, %s2900_s22  ;;  %851 = vrot.lane.b32.xlu1 %v3112_v31, %s2899_s21  ;;  %v450_v31 = vmul.f32 0.2, %v386_v15  ;;  %v390_v11 = vadd.f32 %v3028_v5, %v351_v8  ;;  %v3242_v21 = vld [vmem:[#allocation2 + $0x138] sm:$0xff]  ;;  %v3244_v23 = vld [vmem:[#allocation2 + $0x140] sm:$0xff]  ;;  %v1114_v28 = vld [vmem:[#allocation2 + $0x6a] sm:$0xff]  ;;  %v3262_v39 = vpack.c.bf16 %v1369_v18, %v1368_v17 }
  0x38   : > { %vm421_vm11 = vcmp.ge.f32.partialorder %v389_v10, 0.0  ;;  %v453_v14 = vmul.f32 0.2, %v389_v10  ;;  %v1389_v25 = vld [vmem:[#allocation2 + $0x159] sm:$0xff]  ;;  %v314_v41 = vld [vmem:[%s3036_s18 + $0x88] sm:$0xff]  ;;  %v596_v44 = vld [vmem:[#allocation2 + $0x30] sm:$0xff] }
  0x39   : > { %v482_v40 = vsel %vm418_vm6, %v386_v15, %v450_v31  ;;  %v829_v15 = vpack.c.bf16 %v810_v9, %v809_v7  ;;  %vm422_vm12 = vcmp.ge.f32.partialorder %v390_v11, 0.0  ;;  %v454_v24 = vmul.f32 0.2, %v390_v11  ;;  %2691 = vmatpush3.bf16.msra.mxu0 %v2885_v12  ;;  %2858 = vmatpush3.bf16.msra.mxu1 %v2885_v12  ;;  %v1133_v29 = vld [vmem:[#allocation2 + $0x152] sm:$0xff]  ;;  %v1134_v31 = vld [vmem:[#allocation2 + $0x15a] sm:$0xff]  ;;  %v617_v49 = vld [vmem:[#allocation2 + $0x128] sm:$0xff] }
  0x3a   : > { %571 = vst.msk [vmem:[#allocation2 + $0x99] sm:$0xff] %vm503_vm0, %v482_v40  ;;  %v485_v27 = vsel %vm421_vm11, %v389_v10, %v453_v14  ;;  %v3256_v36 = vpack.c.bf16 %v1389_v25, %v1388_v20  ;;  %v2887_v37 = vld [vmem:[%s3978_s3 + $0x38] sm:$0xff]   ;;  %v313_v38 = vld [vmem:[%s3036_s18 + $0x80] sm:$0xff]  ;;  %v958_v40 = vpack.c.bf16 %v3244_v23, %v3242_v21  ;;  %v315_v51 = vld [vmem:[%s3036_s18 + $0x90] sm:$0xff]  ;;  %v3276_v52 = vpack.c.bf16 %v1134_v31, %v1133_v29 }
  0x3b   : > { %1302 = vrot.lane.b32.xlu0 %v3173_v19, %s2899_s21  ;;  %980 = vrot.lane.b32.xlu1 %v3098_v16, %s2901_s29  ;;  %v388_v16 = vadd.f32 %v3028_v5, %v349_v34  ;;  %v486_v32 = vsel %vm422_vm12, %v390_v11, %v454_v24  ;;  %574 = vst.msk [vmem:[#allocation2 + $0xc1] sm:$0xff] %vm503_vm0, %v485_v27  ;;  %v2886_v34 = vld [vmem:[%s3978_s3 + $0x78] sm:$0xff]   ;;  %v616_v48 = vld [vmem:[#allocation2 + $0x120] sm:$0xff]  ;;  %v318_v60 = vld [vmem:[%s3036_s18 + $0xa8] sm:$0xff]  ;;  %vm1026_vm6 = vcmask 1048320  }
  0x3c   : > { %575 = vst.msk [vmem:[#allocation2 + $0xc9] sm:$0xff] %vm503_vm0, %v486_v32  ;;  %2692 = vmatprep.subr.bf16.mxu0 %v2886_v34  ;;  %v352_v42 = vmul.f32 %v3016_v2, %v313_v38  ;;  %v597_v45 = vld [vmem:[#allocation2 + $0x38] sm:$0xff]  ;;  %2851 = vmatprep.subr.bf16.mxu1 %v2886_v34  ;;  %v354_v57 = vmul.f32 %v3016_v2, %v315_v51  ;;  %v317_v59 = vld [vmem:[%s3036_s18 + $0xa0] sm:$0xff]  ;;  %v1050_v1 = vld [vmem:[#allocation2 + $0x69] sm:$0xff] }
  0x3d   : > { %vm420_vm10 = vcmp.ge.f32.partialorder %v388_v16, 0.0  ;;  %v452_v56 = vmul.f32 0.2, %v388_v16  ;;  %v1374_v26 = vld [vmem:[#allocation2 + $0xa9] sm:$0xff]  ;;  %2693 = vmatpush3.bf16.msra.mxu0 %v2887_v37  ;;  %v626_v47 = vpack.c.bf16 %v597_v45, %v596_v44  ;;  %2859 = vmatpush3.bf16.msra.mxu1 %v2887_v37  ;;  %v357_v63 = vmul.f32 %v3016_v2, %v318_v60  ;;  %v1049_v0 = vld [vmem:[#allocation2 + $0x61] sm:$0xff]  ;;  %v1069_v10 = vld [vmem:[#allocation2 + $0x151] sm:$0xff] }
  0x3e   : > { %v391_v54 = vadd.f32 %v3028_v5, %v352_v42  ;;  %v393_v8 = vadd.f32 %v3028_v5, %v354_v57  ;;  %v1078_v9 = vpack.c.bf16 %v1050_v1, %v1049_v0  ;;  %v1070_v11 = vld [vmem:[#allocation2 + $0x159] sm:$0xff]  ;;  %v598_v25 = vld [vmem:[#allocation2 + $0x48] sm:$0xff] }
  0x3f   : > { %1430 = vrot.lane.b32.xlu0 %v3121_v43, %s2901_s29  ;;  %1195 = vrot.lane.b32.xlu1 %v3189_v35, %s2900_s22  ;;  %v484_v62 = vsel %vm420_vm10, %v388_v16, %v452_v56  ;;  %v353_v16 = vmul.f32 %v3016_v2, %v314_v41  ;;  %v316_v56 = vld [vmem:[%s3036_s18 + $0x98] sm:$0xff]  ;;  %642 = vst.msk [vmem:[#allocation3 + $0x30] sm:$0xff] %vm503_vm0, %v626_v47  ;;  %v1385_v45 = vld [vmem:[#allocation2 + $0x129] sm:$0xff] }
  0x40   : > { %573 = vst.msk [vmem:[#allocation2 + $0xb1] sm:$0xff] %vm503_vm0, %v484_v62  ;;  %v356_v62 = vmul.f32 %v3016_v2, %v317_v59  ;;  %vm423_vm13 = vcmp.ge.f32.partialorder %v391_v54, 0.0  ;;  %v455_v7 = vmul.f32 0.2, %v391_v54  ;;  %vm425_vm15 = vcmp.ge.f32.partialorder %v393_v8, 0.0  ;;  %1094 = vst.msk [vmem:[#allocation3 + $0x50] sm:$0xff] %vm503_vm0, %v1078_v9 }
  0x41   : > { %v392_v61 = vadd.f32 %v3028_v5, %v353_v16  ;;  %v618_v29 = vld [vmem:[#allocation2 + $0x138] sm:$0xff]  ;;  %v396_v31 = vadd.f32 %v3028_v5, %v357_v63  ;;  %v1088_v38 = vpack.c.bf16 %v1070_v11, %v1069_v10  ;;  %v1262_v16 = vld [vmem:[#allocation2 + $0x168] sm:$0xff]  ;;  %v1263_v47 = vld [vmem:[#allocation2 + $0x170] sm:$0xff] }
  0x42   : > { %v1248_v3 = vld [vmem:[#allocation2 + $0xc0] sm:$0xff]  ;;  %v395_v18 = vadd.f32 %v3028_v5, %v356_v62  ;;  %v487_v24 = vsel %vm423_vm13, %v391_v54, %v455_v7  ;;  %v1242_v51 = vld [vmem:[#allocation2 + $0x78] sm:$0xff]  ;;  %v3341_v59 = vpack.c.bf16 %v1263_v47, %v1262_v16  ;;  %v1390_v10 = vld [vmem:[#allocation2 + $0x169] sm:$0xff] }
  0x43   : > { %1175 = vrot.lane.b32.xlu0 %v3208_v50, %s2900_s22  ;;  %744 = vrot.lane.b32.xlu1 %v700_v55, %s2900_s22  ;;  %v3279_v55 = vpack.c.bf16 %v617_v49, %v616_v48  ;;  %v1376_v4 = vld [vmem:[#allocation2 + $0xc1] sm:$0xff]  ;;  %v1377_v14 = vld [vmem:[#allocation2 + $0xc9] sm:$0xff]  ;;  %vm424_vm14 = vcmp.ge.f32.partialorder %v392_v61, 0.0  ;;  %v456_v17 = vmul.f32 0.2, %v392_v61  ;;  %576 = vst.msk [vmem:[#allocation2 + $0xd9] sm:$0xff] %vm503_vm0, %v487_v24 }
  0x44   : > { %v1249_v12 = vld [vmem:[#allocation2 + $0xc8] sm:$0xff]  ;;  %v3301_v21 = vpack.c.bf16 %v1377_v14, %v1376_v4  ;;  %vm427_vm2 = vcmp.ge.f32.partialorder %v395_v18, 0.0  ;;  %v459_v34 = vmul.f32 0.2, %v395_v18  ;;  %vm428_vm3 = vcmp.ge.f32.partialorder %v396_v31, 0.0  ;;  %1104 = vst.msk [vmem:[#allocation3 + $0x140] sm:$0xff] %vm503_vm0, %v1088_v38 }
  0x45   : > { %652 = vst.msk [vmem:[#allocation3 + $0x120] sm:$0xff] %vm503_vm0, %v3279_v55  ;;  %v3299_v20 = vpack.c.bf16 %v1249_v12, %v1248_v3  ;;  %v1122_v23 = vld [vmem:[#allocation2 + $0xca] sm:$0xff]  ;;  %v488_v27 = vsel %vm424_vm14, %v392_v61, %v456_v17  ;;  %v460_v42 = vmul.f32 0.2, %v396_v31  ;;  %v1243_v54 = vld [vmem:[#allocation2 + $0x80] sm:$0xff] }
  0x46   : > { %577 = vst.msk [vmem:[#allocation2 + $0xe1] sm:$0xff] %vm503_vm0, %v488_v27  ;;  %1098 = vst.msk [vmem:[#allocation3 + $0xb0] sm:$0xff] %vm503_vm0, %v3301_v21  ;;  %v491_v44 = vsel %vm427_vm2, %v395_v18, %v459_v34  ;;  %v1129_v1 = vld [vmem:[#allocation2 + $0x122] sm:$0xff]  ;;  %v1130_v3 = vld [vmem:[#allocation2 + $0x12a] sm:$0xff] }
  0x47   : > { %724 = vrot.lane.b32.xlu0 %v3103_v22, %s2900_s22  ;;  %1324 = vrot.lane.b32.xlu1 %v3228_v6, %s2899_s21  ;;  %v1113_v22 = vld [vmem:[#allocation2 + $0x62] sm:$0xff]  ;;  %v1375_v30 = vld [vmem:[#allocation2 + $0xb1] sm:$0xff]  ;;  %648 = vst.msk [vmem:[#allocation3 + $0xc0] sm:$0xff] %vm503_vm0, %v3299_v20  ;;  %580 = vst.msk [vmem:[#allocation2 + $0x109] sm:$0xff] %vm503_vm0, %v491_v44  ;;  %v492_v48 = vsel %vm428_vm3, %v396_v31, %v460_v42  ;;  %v3349_v9 = vpack.c.bf16 %v1130_v3, %v1129_v1 }
  0x48   : > { %v3249_v33 = vpack.c.bf16 %v1375_v30, %v1374_v26  ;;  %v3270_v46 = vpack.c.bf16 %v1114_v28, %v1113_v22  ;;  %v599_v22 = vld [vmem:[#allocation2 + $0x50] sm:$0xff]  ;;  %v457_v28 = vmul.f32 0.2, %v393_v8  ;;  %v619_v30 = vld [vmem:[#allocation2 + $0x140] sm:$0xff]  ;;  %581 = vst.msk [vmem:[#allocation2 + $0x111] sm:$0xff] %vm503_vm0, %v492_v48  ;;  %v1265_v1 = vld [vmem:[#allocation2 + $0x188] sm:$0xff] }
  0x49   : > { %v3316_v41 = vpack.c.bf16 %v619_v30, %v618_v29  ;;  %v1391_v11 = vld [vmem:[#allocation2 + $0x171] sm:$0xff]  ;;  %1550 = vst.msk [vmem:[#allocation3 + $0x100] sm:$0xff] %vm503_vm0, %v3349_v9  ;;  %v1052_v31 = vld [vmem:[#allocation2 + $0x81] sm:$0xff]  ;;  %v1071_v38 = vld [vmem:[#allocation2 + $0x169] sm:$0xff] }
  0x4a   : > { %1097 = vst.msk [vmem:[#allocation3 + $0x98] sm:$0xff] %vm503_vm0, %v3249_v33  ;;  %v489_v37 = vsel %vm425_vm15, %v393_v8, %v457_v28  ;;  %v1378_v57 = vld [vmem:[#allocation2 + $0xd9] sm:$0xff]  ;;  %v1371_v42 = vld [vmem:[#allocation2 + $0x81] sm:$0xff]  ;;  %v3387_v44 = vpack.c.bf16 %v1391_v11, %v1390_v10  ;;  %v620_v48 = vld [vmem:[#allocation2 + $0x150] sm:$0xff] }
  0x4b   : > { %1304 = vrot.lane.b32.xlu0 %v3238_v13, %s2899_s21  ;;  %873 = vrot.lane.b32.xlu1 %v829_v15, %s2899_s21  ;;  %v1121_v15 = vld [vmem:[#allocation2 + $0xc2] sm:$0xff]  ;;  %578 = vst.msk [vmem:[#allocation2 + $0xf1] sm:$0xff] %vm503_vm0, %v489_v37  ;;  %653 = vst.msk [vmem:[#allocation3 + $0x138] sm:$0xff] %vm503_vm0, %v3316_v41  ;;  %v1245_v3 = vld [vmem:[#allocation2 + $0x98] sm:$0xff] }
  0x4c   : > { %v3306_v26 = vpack.c.bf16 %v1122_v23, %v1121_v15  ;;  %v1393_v10 = vld [vmem:[#allocation2 + $0x189] sm:$0xff]  ;;  %v1053_v11 = vld [vmem:[#allocation2 + $0x91] sm:$0xff] }
  0x4d   : > { %v1251_v60 = vld [vmem:[#allocation2 + $0xe0] sm:$0xff] }
  0x4e   : > { %1546 = vst.msk [vmem:[#allocation3 + $0xa0] sm:$0xff] %vm503_vm0, %v3306_v26  ;;  %v1379_v61 = vld [vmem:[#allocation2 + $0xe1] sm:$0xff]  ;;  %v1382_v23 = vld [vmem:[#allocation2 + $0x109] sm:$0xff] }
  0x4f   : > { %853 = vrot.lane.b32.xlu0 %v3135_v53, %s2899_s21  ;;  %1452 = vrot.lane.b32.xlu1 %v3256_v36, %s2901_s29  ;;  %v355_v53 = vmul.f32 %v3016_v2, %v316_v56  ;;  %v1250_v56 = vld [vmem:[#allocation2 + $0xd8] sm:$0xff]  ;;  %v3345_v63 = vpack.c.bf16 %v1379_v61, %v1378_v57  ;;  %v1124_v0 = vld [vmem:[#allocation2 + $0xe2] sm:$0xff]  ;;  %v1127_v27 = vld [vmem:[#allocation2 + $0x10a] sm:$0xff] }
  0x50   : > { %v3343_v62 = vpack.c.bf16 %v1251_v60, %v1250_v56  ;;  %v1254_v18 = vld [vmem:[#allocation2 + $0x108] sm:$0xff]  ;;  %v1128_v30 = vld [vmem:[#allocation2 + $0x112] sm:$0xff] }
  0x51   : > { %v394_v2 = vadd.f32 %v3028_v5, %v355_v53  ;;  %v1123_v53 = vld [vmem:[#allocation2 + $0xda] sm:$0xff]  ;;  %1099 = vst.msk [vmem:[#allocation3 + $0xc8] sm:$0xff] %vm503_vm0, %v3345_v63  ;;  %v3381_v34 = vpack.c.bf16 %v1128_v30, %v1127_v27  ;;  %v1135_v56 = vld [vmem:[#allocation2 + $0x16a] sm:$0xff]  ;;  %v1136_v57 = vld [vmem:[#allocation2 + $0x172] sm:$0xff] }
  0x52   : > { %v3347_v4 = vpack.c.bf16 %v1124_v0, %v1123_v53  ;;  %v1252_v7 = vld [vmem:[#allocation2 + $0xf0] sm:$0xff]  ;;  %649 = vst.msk [vmem:[#allocation3 + $0xd8] sm:$0xff] %vm503_vm0, %v3343_v62  ;;  %v1116_v60 = vld [vmem:[#allocation2 + $0x82] sm:$0xff]  ;;  %v3409_v61 = vpack.c.bf16 %v1136_v57, %v1135_v56  ;;  %v605_v57 = vld [vmem:[#allocation2 + $0x98] sm:$0xff] }
  0x53   : > { %1432 = vrot.lane.b32.xlu0 %v3262_v39, %s2901_s29  ;;  %1002 = vrot.lane.b32.xlu1 %v958_v40, %s2901_s29  ;;  %vm426_vm1 = vcmp.ge.f32.partialorder %v394_v2, 0.0  ;;  %v458_v32 = vmul.f32 0.2, %v394_v2  ;;  %v627_v40 = vpack.c.bf16 %v599_v22, %v598_v25  ;;  %v1380_v8 = vld [vmem:[#allocation2 + $0xf1] sm:$0xff]  ;;  %1549 = vst.msk [vmem:[#allocation3 + $0xe8] sm:$0xff] %vm503_vm0, %v3381_v34  ;;  %v1264_v0 = vld [vmem:[#allocation2 + $0x180] sm:$0xff] }
  0x54   : > { %1547 = vst.msk [vmem:[#allocation3 + $0xb8] sm:$0xff] %vm503_vm0, %v3347_v4  ;;  %v1255_v25 = vld [vmem:[#allocation2 + $0x110] sm:$0xff] }
  0x55   : > { %v490_v5 = vsel %vm426_vm1, %v394_v2, %v458_v32  ;;  %643 = vst.msk [vmem:[#allocation3 + $0x48] sm:$0xff] %vm503_vm0, %v627_v40  ;;  %v1383_v22 = vld [vmem:[#allocation2 + $0x111] sm:$0xff]  ;;  %v3371_v28 = vpack.c.bf16 %v1255_v25, %v1254_v18  ;;  %v1051_v32 = vld [vmem:[#allocation2 + $0x79] sm:$0xff] }
  0x56   : > { %579 = vst.msk [vmem:[#allocation2 + $0xf9] sm:$0xff] %vm503_vm0, %v490_v5  ;;  %v3373_v29 = vpack.c.bf16 %v1383_v22, %v1382_v23  ;;  %v1079_v37 = vpack.c.bf16 %v1052_v31, %v1051_v32  ;;  %v1072_v40 = vld [vmem:[#allocation2 + $0x171] sm:$0xff]  ;;  %v1370_v5 = vld [vmem:[#allocation2 + $0x79] sm:$0xff]  ;;  %v622_v32 = vld [vmem:[#allocation2 + $0x168] sm:$0xff] }
  0x57   : > { %982 = vrot.lane.b32.xlu0 %v3173_v19, %s2901_s29  ;;  %1197 = vrot.lane.b32.xlu1 %v3276_v52, %s2900_s22  ;;  %v1384_v19 = vld [vmem:[#allocation2 + $0x121] sm:$0xff]  ;;  %651 = vst.msk [vmem:[#allocation3 + $0x108] sm:$0xff] %vm503_vm0, %v3371_v28  ;;  %v3399_v16 = vpack.c.bf16 %v1371_v42, %v1370_v5  ;;  %v602_v25 = vld [vmem:[#allocation2 + $0x78] sm:$0xff]  ;;  %v623_v31 = vld [vmem:[#allocation2 + $0x170] sm:$0xff] }
  0x58   : > { %v3332_v49 = vpack.c.bf16 %v1385_v45, %v1384_v19  ;;  %v1089_v19 = vpack.c.bf16 %v1072_v40, %v1071_v38  ;;  %1101 = vst.msk [vmem:[#allocation3 + $0xf8] sm:$0xff] %vm503_vm0, %v3373_v29  ;;  %1095 = vst.msk [vmem:[#allocation3 + $0x68] sm:$0xff] %vm503_vm0, %v1079_v37  ;;  %v600_v45 = vld [vmem:[#allocation2 + $0x60] sm:$0xff]  ;;  %v1138_v38 = vld [vmem:[#allocation2 + $0x18a] sm:$0xff] }
  0x59   : > { %v603_v22 = vld [vmem:[#allocation2 + $0x80] sm:$0xff] }
  0x5a   : > { %1102 = vst.msk [vmem:[#allocation3 + $0x110] sm:$0xff] %vm503_vm0, %v3332_v49  ;;  %1105 = vst.msk [vmem:[#allocation3 + $0x158] sm:$0xff] %vm503_vm0, %v1089_v19  ;;  %v629_v30 = vpack.c.bf16 %v603_v22, %v602_v25  ;;  %v1137_v37 = vld [vmem:[#allocation2 + $0x182] sm:$0xff]  ;;  %v1118_v40 = vld [vmem:[#allocation2 + $0x9a] sm:$0xff] }
  0x5b   : > { %1177 = vrot.lane.b32.xlu0 %v3270_v46, %s2900_s22  ;;  %746 = vrot.lane.b32.xlu1 %v3143_v58, %s2900_s22  ;;  %v3353_v58 = vpack.c.bf16 %v1243_v54, %v1242_v51  ;;  %v621_v51 = vld [vmem:[#allocation2 + $0x158] sm:$0xff]  ;;  %v1154_v5 = vpack.c.bf16 %v1138_v38, %v1137_v37  ;;  %v1499_v25 = vld [vmem:[#allocation2 + $0x82] sm:$0xff]  ;;  %v1502_v37 = vld [vmem:[#allocation2 + $0xaa] sm:$0xff] }
  0x5c   : > { %v638_v54 = vpack.c.bf16 %v621_v51, %v620_v48  ;;  %645 = vst.msk [vmem:[#allocation3 + $0x78] sm:$0xff] %vm503_vm0, %v629_v30  ;;  %v1266_v19 = vld [vmem:[#allocation2 + $0x198] sm:$0xff] }
  0x5d   : > { %v1253_v12 = vld [vmem:[#allocation2 + $0xf8] sm:$0xff] }
  0x5e   : > { %v1381_v14 = vld [vmem:[#allocation2 + $0xf9] sm:$0xff]  ;;  %v3361_v17 = vpack.c.bf16 %v1253_v12, %v1252_v7  ;;  %654 = vst.msk [vmem:[#allocation3 + $0x150] sm:$0xff] %vm503_vm0, %v638_v54  ;;  %v3421_v7 = vpack.c.bf16 %v1265_v1, %v1264_v0  ;;  %v1395_v54 = vld [vmem:[#allocation2 + $0x1a1] sm:$0xff] }
  0x5f   : > { %726 = vrot.lane.b32.xlu0 %v3121_v43, %s2900_s22  ;;  %v1125_v15 = vld [vmem:[#allocation2 + $0xf2] sm:$0xff]  ;;  %1326 = vrot.lane.b32.xlu1 %v3341_v59, %s2899_s21  ;;  %v3363_v2 = vpack.c.bf16 %v1381_v14, %v1380_v8  ;;  %v1126_v43 = vld [vmem:[#allocation2 + $0xfa] sm:$0xff] }
  0x60   : > { %v3369_v24 = vpack.c.bf16 %v1126_v43, %v1125_v15  ;;  %650 = vst.msk [vmem:[#allocation3 + $0xf0] sm:$0xff] %vm503_vm0, %v3361_v17  ;;  %v1392_v8 = vld [vmem:[#allocation2 + $0x181] sm:$0xff]  ;;  %v1054_v12 = vld [vmem:[#allocation2 + $0x99] sm:$0xff]  ;;  %v1074_v15 = vld [vmem:[#allocation2 + $0x189] sm:$0xff] }
  0x61   : > { %1100 = vst.msk [vmem:[#allocation3 + $0xe0] sm:$0xff] %vm503_vm0, %v3363_v2  ;;  %v1073_v14 = vld [vmem:[#allocation2 + $0x181] sm:$0xff]  ;;  %v1372_v43 = vld [vmem:[#allocation2 + $0x91] sm:$0xff]  ;;  %v1410_v18 = vpack.c.bf16 %v1393_v10, %v1392_v8  ;;  %v1394_v51 = vld [vmem:[#allocation2 + $0x199] sm:$0xff] }
  0x62   : > { %1548 = vst.msk [vmem:[#allocation3 + $0xd0] sm:$0xff] %vm503_vm0, %v3369_v24  ;;  %v1090_v23 = vpack.c.bf16 %v1074_v15, %v1073_v14  ;;  %v1493_v0 = vld [vmem:[#allocation2 + $0x3a] sm:$0xff]  ;;  %v1120_v10 = vld [vmem:[#allocation2 + $0xb2] sm:$0xff]  ;;  %v606_v15 = vld [vmem:[#allocation2 + $0xa8] sm:$0xff] }
  0x63   : > { %1306 = vrot.lane.b32.xlu0 %v3353_v58, %s2899_s21  ;;  %875 = vrot.lane.b32.xlu1 %v3189_v35, %s2899_s21  ;;  %v601_v35 = vld [vmem:[#allocation2 + $0x68] sm:$0xff]  ;;  %v3473_v8 = vld [vmem:[%s3978_s3 + $0x80] sm:$0xff]   ;;  %v1503_v38 = vld [vmem:[#allocation2 + $0xb2] sm:$0xff] }
  0x64   : > { %v628_v47 = vpack.c.bf16 %v601_v35, %v600_v45  ;;  %1106 = vst.msk [vmem:[#allocation3 + $0x170] sm:$0xff] %vm503_vm0, %v1090_v23  ;;  %v1267_v45 = vld [vmem:[#allocation2 + $0x1a0] sm:$0xff]  ;;  %v1246_v35 = vld [vmem:[#allocation2 + $0xa8] sm:$0xff]  ;;  %2808 = vmatprep.subr.bf16.mxu1 %v3473_v8 }
  0x66   : > { %644 = vst.msk [vmem:[#allocation3 + $0x60] sm:$0xff] %vm503_vm0, %v628_v47  ;;  %v1283_v47 = vpack.c.bf16 %v1267_v45, %v1266_v19 }
  0x67   : > { %855 = vrot.lane.b32.xlu0 %v3208_v50, %s2899_s21  ;;  %1454 = vrot.lane.b32.xlu1 %v3387_v44, %s2901_s29  ;;  %v1115_v50 = vld [vmem:[#allocation2 + $0x7a] sm:$0xff] }
  0x68   : > { %v3413_v53 = vpack.c.bf16 %v1116_v60, %v1115_v50  ;;  %v1492_v60 = vld [vmem:[#allocation2 + $0x32] sm:$0xff] }
  0x69   : > { %v1524_v1 = vpack.c.bf16 %v1493_v0, %v1492_v60 }
  0x6b   : > { %1434 = vrot.lane.b32.xlu0 %v3399_v16, %s2901_s29  ;;  %1004 = vrot.lane.b32.xlu1 %v3228_v6, %s2901_s29  ;;  %v1244_v6 = vld [vmem:[#allocation2 + $0x90] sm:$0xff]  ;;  %1540 = vst.msk [vmem:[#allocation3 + $0x10] sm:$0xff] %vm503_vm0, %v1524_v1  ;;  %v1517_v1 = vld [vmem:[#allocation2 + $0x15a] sm:$0xff] }
  0x6f   : > { %984 = vrot.lane.b32.xlu0 %v3238_v13, %s2901_s29  ;;  %1199 = vrot.lane.b32.xlu1 %v3409_v61, %s2900_s22  ;;  %v3425_v13 = vpack.c.bf16 %v1245_v3, %v1244_v6  ;;  %v1494_v6 = vld [vmem:[#allocation2 + $0x4a] sm:$0xff]  ;;  %v1495_v3 = vld [vmem:[#allocation2 + $0x52] sm:$0xff] }
  0x73   : > { %1179 = vrot.lane.b32.xlu0 %v3413_v53, %s2900_s22  ;;  %748 = vrot.lane.b32.xlu1 %v3256_v36, %s2900_s22  ;;  %v1080_v36 = vpack.c.bf16 %v1054_v12, %v1053_v11  ;;  %v1496_v12 = vld [vmem:[#allocation2 + $0x62] sm:$0xff] }
  0x75   : > { %1096 = vst.msk [vmem:[#allocation3 + $0x80] sm:$0xff] %vm503_vm0, %v1080_v36  ;;  %v1497_v36 = vld [vmem:[#allocation2 + $0x6a] sm:$0xff] }
  0x77   : > { %728 = vrot.lane.b32.xlu0 %v3262_v39, %s2900_s22  ;;  %1328 = vrot.lane.b32.xlu1 %v3421_v7, %s2899_s21  ;;  %v1373_v39 = vld [vmem:[#allocation2 + $0x99] sm:$0xff] }
  0x78   : > { %v3437_v27 = vpack.c.bf16 %v1373_v39, %v1372_v43  ;;  %v607_v43 = vld [vmem:[#allocation2 + $0xb0] sm:$0xff]  ;;  %v1526_v39 = vpack.c.bf16 %v1497_v36, %v1496_v12  ;;  %v2889_v36 = vld [vmem:[%s3978_s3 + $0x88] sm:$0xff]  }
  0x79   : > { %v631_v23 = vpack.c.bf16 %v607_v43, %v606_v15  ;;  %v1520_v43 = vld [vmem:[#allocation2 + $0x182] sm:$0xff] }
  0x7a   : > { %1542 = vst.msk [vmem:[#allocation3 + $0x40] sm:$0xff] %vm503_vm0, %v1526_v39  ;;  %v1521_v39 = vld [vmem:[#allocation2 + $0x18a] sm:$0xff] }
  0x7b   : > { %1308 = vrot.lane.b32.xlu0 %v3425_v13, %s2899_s21  ;;  %877 = vrot.lane.b32.xlu1 %v3276_v52, %s2899_s21  ;;  %v639_v52 = vpack.c.bf16 %v623_v31, %v622_v32  ;;  %647 = vst.msk [vmem:[#allocation3 + $0xa8] sm:$0xff] %vm503_vm0, %v631_v23  ;;  %v1500_v32 = vld [vmem:[#allocation2 + $0x92] sm:$0xff]  ;;  %v1501_v31 = vld [vmem:[#allocation2 + $0x9a] sm:$0xff]  ;;  %v1523_v23 = vld [vmem:[#allocation2 + $0x1a2] sm:$0xff] }
  0x7d   : > { %655 = vst.msk [vmem:[#allocation3 + $0x168] sm:$0xff] %vm503_vm0, %v639_v52  ;;  %v1528_v52 = vpack.c.bf16 %v1501_v31, %v1500_v32  ;;  %v1387_v31 = vld [vmem:[#allocation2 + $0x141] sm:$0xff] }
  0x7f   : > { %857 = vrot.lane.b32.xlu0 %v3270_v46, %s2899_s21  ;;  %1456 = vrot.lane.b32.xlu1 %v1410_v18, %s2901_s29  ;;  %v1117_v46 = vld [vmem:[#allocation2 + $0x92] sm:$0xff]  ;;  %v1498_v18 = vld [vmem:[#allocation2 + $0x7a] sm:$0xff]  ;;  %1544 = vst.msk [vmem:[#allocation3 + $0x70] sm:$0xff] %vm503_vm0, %v1528_v52 }
  0x80   : > { %v3448_v42 = vpack.c.bf16 %v1118_v40, %v1117_v46  ;;  %v1527_v22 = vpack.c.bf16 %v1499_v25, %v1498_v18  ;;  %v1529_v46 = vpack.c.bf16 %v1503_v38, %v1502_v37  ;;  %v1522_v18 = vld [vmem:[#allocation2 + $0x19a] sm:$0xff] }
  0x81   : > { %v1539_v25 = vpack.c.bf16 %v1523_v23, %v1522_v18 }
  0x82   : > { %1543 = vst.msk [vmem:[#allocation3 + $0x58] sm:$0xff] %vm503_vm0, %v1527_v22  ;;  %1545 = vst.msk [vmem:[#allocation3 + $0x88] sm:$0xff] %vm503_vm0, %v1529_v46 }
  0x83   : > { %1436 = vrot.lane.b32.xlu0 %v3437_v27, %s2901_s29  ;;  %1006 = vrot.lane.b32.xlu1 %v3341_v59, %s2901_s29  ;;  %v1247_v59 = vld [vmem:[#allocation2 + $0xb0] sm:$0xff]  ;;  %1555 = vst.msk [vmem:[#allocation3 + $0x178] sm:$0xff] %vm503_vm0, %v1539_v25 }
  0x84   : > { %v3457_v48 = vpack.c.bf16 %v1247_v59, %v1246_v35  ;;  %v721_v56 = vpop.permute.xlu0 %720 }
  0x85   : > { %769 = vst.msk [vmem:[#allocation3] sm:$0xff] %vm768_vm4, %v721_v56 }
  0x87   : > { %986 = vrot.lane.b32.xlu0 %v3353_v58, %s2901_s29  ;;  %1201 = vrot.lane.b32.xlu1 %v1154_v5, %s2900_s22  ;;  %v850_v58 = vpop.permute.xlu1 %849 }
  0x88   : > { %898 = vst.msk [vmem:[#allocation3] sm:$0xff] %vm897_vm5, %v850_v58 }
  0x89   : > { %v1567_v23 = vld [vmem:[#allocation3 + $0x58] sm:$0xff] }
  0x8b   : > { %1181 = vrot.lane.b32.xlu0 %v3448_v42, %s2900_s22  ;;  %750 = vrot.lane.b32.xlu1 %v3387_v44, %s2900_s22  ;;  %v604_v44 = vld [vmem:[#allocation2 + $0x90] sm:$0xff] }
  0x8c   : > { %v630_v50 = vpack.c.bf16 %v605_v57, %v604_v44  ;;  %v1515_v57 = vld [vmem:[#allocation2 + $0x142] sm:$0xff] }
  0x8e   : > { %646 = vst.msk [vmem:[#allocation3 + $0x90] sm:$0xff] %vm503_vm0, %v630_v50 }
  0x8f   : > { %730 = vrot.lane.b32.xlu0 %v3399_v16, %s2900_s22  ;;  %1330 = vrot.lane.b32.xlu1 %v1283_v47, %s2899_s21  ;;  %v1411_v16 = vpack.c.bf16 %v1395_v54, %v1394_v51 }
  0x93   : > { %1310 = vrot.lane.b32.xlu0 %v3457_v48, %s2899_s21  ;;  %879 = vrot.lane.b32.xlu1 %v3409_v61, %s2899_s21  ;;  %v1525_v61 = vpack.c.bf16 %v1495_v3, %v1494_v6  ;;  %v1518_v3 = vld [vmem:[#allocation2 + $0x16a] sm:$0xff] }
  0x95   : > { %1541 = vst.msk [vmem:[#allocation3 + $0x28] sm:$0xff] %vm503_vm0, %v1525_v61  ;;  %v1519_v61 = vld [vmem:[#allocation2 + $0x172] sm:$0xff] }
  0x97   : > { %859 = vrot.lane.b32.xlu0 %v3413_v53, %s2899_s21  ;;  %1458 = vrot.lane.b32.xlu1 %v1411_v16, %s2901_s29  ;;  %v1119_v53 = vld [vmem:[#allocation2 + $0xaa] sm:$0xff] }
  0x98   : > { %v1145_v14 = vpack.c.bf16 %v1120_v10, %v1119_v53  ;;  %v1537_v53 = vpack.c.bf16 %v1519_v61, %v1518_v3 }
  0x9a   : > { %1553 = vst.msk [vmem:[#allocation3 + $0x148] sm:$0xff] %vm503_vm0, %v1537_v53  ;;  %v1558_v53 = vld [vmem:[#allocation3 + $0x10] sm:$0xff] }
  0x9b   : > { %1438 = vrot.lane.b32.xlu0 %v3249_v33, %s2901_s29  ;;  %1008 = vrot.lane.b32.xlu1 %v3421_v7, %s2901_s29 }
  0x9d   : > { %v1301_v11 = vpop.permute.xlu1 %1300 }
  0x9f   : > { %988 = vrot.lane.b32.xlu0 %v3425_v13, %s2901_s29  ;;  %732 = vrot.lane.b32.xlu1 %v3437_v27, %s2900_s22 }
  0xa1   : > { %v1172_v7 = vpop.permute.xlu0 %1171  ;;  %v979_v30 = vpop.permute.xlu1 %978 }
  0xa2   : > { %1219 = vst.msk [vmem:[#allocation3 + $0x8] sm:$0xff] %vm768_vm4, %v1172_v7 }
  0xa3   : > { %1183 = vrot.lane.b32.xlu0 %v1145_v14, %s2900_s22  ;;  %1348 = vst.msk [vmem:[#allocation3 + $0x8] sm:$0xff] %vm897_vm5, %v1301_v11  ;;  %861 = vrot.lane.b32.xlu1 %v3448_v42, %s2899_s21 }
  0xa4   : > { %1027 = vst.msk [vmem:[#allocation3] sm:$0xff] %vm1026_vm6, %v979_v30 }
  0xa5   : > { %v1429_v13 = vpop.permute.xlu0 %1428  ;;  %v723_v27 = vpop.permute.xlu1 %722 }
  0xa6   : > { %1476 = vst.msk [vmem:[#allocation3 + $0x8] sm:$0xff] %vm1026_vm6, %v1429_v13 }
  0xa7   : > { %1312 = vrot.lane.b32.xlu0 %v3299_v20, %s2899_s21  ;;  %770 = vst.msk [vmem:[#allocation3 + $0x18] sm:$0xff] %vm768_vm4, %v723_v27  ;;  %990 = vrot.lane.b32.xlu1 %v3457_v48, %s2901_s29 }
  0xa9   : > { %v1174_v40 = vpop.permute.xlu0 %1173  ;;  %v852_v5 = vpop.permute.xlu1 %851 }
  0xaa   : > { %1220 = vst.msk [vmem:[#allocation3 + $0x20] sm:$0xff] %vm768_vm4, %v1174_v40 }
  0xab   : > { %1440 = vrot.lane.b32.xlu0 %v3301_v21, %s2901_s29  ;;  %899 = vst.msk [vmem:[#allocation3 + $0x18] sm:$0xff] %vm897_vm5, %v852_v5  ;;  %v1556_v42 = vld [vmem:[#allocation3] sm:$0xff]  ;;  %734 = vrot.lane.b32.xlu1 %v3249_v33, %s2900_s22 }
  0xad   : > { %v1303_v19 = vpop.permute.xlu0 %1302  ;;  %v1557_v45 = vld [vmem:[#allocation3 + $0x8] sm:$0xff]  ;;  %v981_v35 = vpop.permute.xlu1 %980 }
  0xae   : > { %1349 = vst.msk [vmem:[#allocation3 + $0x20] sm:$0xff] %vm897_vm5, %v1303_v19  ;;  %1835 = vmatprep.mubr.bf16.mxu0 %v1557_v45 }
  0xaf   : > { %1185 = vrot.lane.b32.xlu0 %v3306_v26, %s2900_s22  ;;  %1836 = vmatmul.mubr.bf16.vlgmr.msra.gmra.mrb[0].mxu0 %v1556_v42  ;;  %1028 = vst.msk [vmem:[#allocation3 + $0x18] sm:$0xff] %vm1026_vm6, %v981_v35 }
  0xb0   : > { %863 = vrot.lane.b32.xlu1 %v1145_v14, %s2899_s21 }
  0xb1   : > { %v1431_v59 = vpop.permute.xlu0 %1430  ;;  %v1196_v47 = vpop.permute.xlu1 %1195 }
  0xb2   : > { %1477 = vst.msk [vmem:[#allocation3 + $0x20] sm:$0xff] %vm1026_vm6, %v1431_v59 }
  0xb3   : > { %1314 = vrot.lane.b32.xlu0 %v3343_v62, %s2899_s21  ;;  %1231 = vst.msk [vmem:[#allocation3 + $0x128] sm:$0xff] %vm768_vm4, %v1196_v47 }
  0xb4   : > { %992 = vrot.lane.b32.xlu1 %v3299_v20, %s2901_s29 }
  0xb5   : > { %v1176_v33 = vpop.permute.xlu0 %1175  ;;  %v745_v48 = vpop.permute.xlu1 %744 }
  0xb6   : > { %1221 = vst.msk [vmem:[#allocation3 + $0x38] sm:$0xff] %vm768_vm4, %v1176_v33  ;;  %781 = vst.msk [vmem:[#allocation3 + $0x120] sm:$0xff] %vm768_vm4, %v745_v48  ;;  %v1559_v58 = vld [vmem:[#allocation3 + $0x18] sm:$0xff] }
  0xb7   : > { %1442 = vrot.lane.b32.xlu0 %v3345_v63, %s2901_s29 }
  0xb8   : > { %736 = vrot.lane.b32.xlu1 %v3301_v21, %s2900_s22  ;;  %v1514_v21 = vld [vmem:[#allocation2 + $0x13a] sm:$0xff] }
  0xb9   : > { %v725_v51 = vpop.permute.xlu0 %724  ;;  %v1560_v54 = vld [vmem:[#allocation3 + $0x20] sm:$0xff]  ;;  %v1325_v56 = vpop.permute.xlu1 %1324  ;;  %v1535_v16 = vpack.c.bf16 %v1515_v57, %v1514_v21 }
  0xba   : > { %771 = vst.msk [vmem:[#allocation3 + $0x30] sm:$0xff] %vm768_vm4, %v725_v51  ;;  %1843 = vmatprep.mubr.bf16.mxu0 %v1560_v54 }
  0xbb   : > { %1187 = vrot.lane.b32.xlu0 %v3347_v4, %s2900_s22  ;;  %1844 = vmatmul.mubr.bf16.gmra.mrb[4].mxu0 %v1559_v58  ;;  %1360 = vst.msk [vmem:[#allocation3 + $0x128] sm:$0xff] %vm897_vm5, %v1325_v56 }
  0xbc   : > { %865 = vrot.lane.b32.xlu1 %v3306_v26, %s2899_s21  ;;  %1551 = vst.msk [vmem:[#allocation3 + $0x118] sm:$0xff] %vm503_vm0, %v1535_v16 }
  0xbd   : > { %v1305_v20 = vpop.permute.xlu0 %1304  ;;  %v874_v44 = vpop.permute.xlu1 %873 }
  0xbe   : > { %1350 = vst.msk [vmem:[#allocation3 + $0x38] sm:$0xff] %vm897_vm5, %v1305_v20  ;;  %910 = vst.msk [vmem:[#allocation3 + $0x120] sm:$0xff] %vm897_vm5, %v874_v44 }
  0xbf   : > { %1316 = vrot.lane.b32.xlu0 %v3361_v17, %s2899_s21 }
  0xc0   : > { %994 = vrot.lane.b32.xlu1 %v3343_v62, %s2901_s29  ;;  %v1516_v62 = vld [vmem:[#allocation2 + $0x152] sm:$0xff] }
  0xc1   : > { %v854_v50 = vpop.permute.xlu0 %853  ;;  %v1453_v60 = vpop.permute.xlu1 %1452  ;;  %v1536_v6 = vpack.c.bf16 %v1517_v1, %v1516_v62 }
  0xc2   : > { %900 = vst.msk [vmem:[#allocation3 + $0x30] sm:$0xff] %vm897_vm5, %v854_v50 }
  0xc3   : > { %1444 = vrot.lane.b32.xlu0 %v3363_v2, %s2901_s29  ;;  %1488 = vst.msk [vmem:[#allocation3 + $0x128] sm:$0xff] %vm1026_vm6, %v1453_v60 }
  0xc4   : > { %738 = vrot.lane.b32.xlu1 %v3345_v63, %s2900_s22  ;;  %1552 = vst.msk [vmem:[#allocation3 + $0x130] sm:$0xff] %vm503_vm0, %v1536_v6 }
  0xc5   : > { %v1433_v26 = vpop.permute.xlu0 %1432  ;;  %v1003_v0 = vpop.permute.xlu1 %1002 }
  0xc6   : > { %1478 = vst.msk [vmem:[#allocation3 + $0x38] sm:$0xff] %vm1026_vm6, %v1433_v26  ;;  %1039 = vst.msk [vmem:[#allocation3 + $0x120] sm:$0xff] %vm1026_vm6, %v1003_v0 }
  0xc7   : > { %1189 = vrot.lane.b32.xlu0 %v3369_v24, %s2900_s22 }
  0xc8   : > { %867 = vrot.lane.b32.xlu1 %v3347_v4, %s2899_s21 }
  0xc9   : > { %v983_v10 = vpop.permute.xlu0 %982  ;;  %v1198_v63 = vpop.permute.xlu1 %1197 }
  0xca   : > { %1029 = vst.msk [vmem:[#allocation3 + $0x30] sm:$0xff] %vm1026_vm6, %v983_v10  ;;  %v1593_v11 = vld [vmem:[#allocation3 + $0x128] sm:$0xff] }
  0xcb   : > { %1318 = vrot.lane.b32.xlu0 %v3371_v28, %s2899_s21  ;;  %1232 = vst.msk [vmem:[#allocation3 + $0x140] sm:$0xff] %vm768_vm4, %v1198_v63  ;;  %1931 = vmatprep.mubr.bf16.mxu1 %v1593_v11 }
  0xcc   : > { %996 = vrot.lane.b32.xlu1 %v3361_v17, %s2901_s29  ;;  %v1538_v17 = vpack.c.bf16 %v1521_v39, %v1520_v43 }
  0xcd   : > { %v1178_v4 = vpop.permute.xlu0 %1177  ;;  %v1563_v12 = vld [vmem:[#allocation3 + $0x38] sm:$0xff]  ;;  %v747_v14 = vpop.permute.xlu1 %746  ;;  %v1592_v15 = vld [vmem:[#allocation3 + $0x120] sm:$0xff] }
  0xce   : > { %1222 = vst.msk [vmem:[#allocation3 + $0x50] sm:$0xff] %vm768_vm4, %v1178_v4  ;;  %1851 = vmatprep.mubr.bf16.mxu0 %v1563_v12  ;;  %782 = vst.msk [vmem:[#allocation3 + $0x138] sm:$0xff] %vm768_vm4, %v747_v14  ;;  %1932 = vmatmul.mubr.bf16.vlgmr.msra.gmra.mrb[0].mxu1 %v1592_v15  ;;  %v1564_v15 = vld [vmem:[#allocation3 + $0x40] sm:$0xff] }
  0xcf   : > { %1446 = vrot.lane.b32.xlu0 %v3373_v29, %s2901_s29  ;;  %2809 = vmatpush3.bf16.msra.mxu1 %v3473_v8  ;;  %1554 = vst.msk [vmem:[#allocation3 + $0x160] sm:$0xff] %vm503_vm0, %v1538_v17 }
  0xd0   : > { %740 = vrot.lane.b32.xlu1 %v3363_v2, %s2900_s22  ;;  %2810 = vmatprep.subr.bf16.mxu1 %v2889_v36 }
  0xd1   : > { %v727_v7 = vpop.permute.xlu0 %726  ;;  %v1562_v22 = vld [vmem:[#allocation3 + $0x30] sm:$0xff]  ;;  %v1327_v30 = vpop.permute.xlu1 %1326 }
  0xd2   : > { %772 = vst.msk [vmem:[#allocation3 + $0x48] sm:$0xff] %vm768_vm4, %v727_v7  ;;  %1852 = vmatmul.mubr.bf16.gmra.mrb[8].mxu0 %v1562_v22  ;;  %v1570_v22 = vld [vmem:[#allocation3 + $0x70] sm:$0xff] }
  0xd3   : > { %1191 = vrot.lane.b32.xlu0 %v3381_v34, %s2900_s22  ;;  %1361 = vst.msk [vmem:[#allocation3 + $0x140] sm:$0xff] %vm897_vm5, %v1327_v30  ;;  %2811 = vmatpush3.bf16.msra.mxu1 %v2889_v36  ;;  %v1561_v36 = vld [vmem:[#allocation3 + $0x28] sm:$0xff] }
  0xd4   : > { %869 = vrot.lane.b32.xlu1 %v3369_v24, %s2899_s21 }
  0xd5   : > { %v1307_v2 = vpop.permute.xlu0 %1306  ;;  %v876_v8 = vpop.permute.xlu1 %875 }
  0xd6   : > { %1351 = vst.msk [vmem:[#allocation3 + $0x50] sm:$0xff] %vm897_vm5, %v1307_v2  ;;  %911 = vst.msk [vmem:[#allocation3 + $0x138] sm:$0xff] %vm897_vm5, %v876_v8 }
  0xd7   : > { %1320 = vrot.lane.b32.xlu0 %v3279_v55, %s2899_s21 }
  0xd8   : > { %998 = vrot.lane.b32.xlu1 %v3371_v28, %s2901_s29  ;;  %v1386_v28 = vld [vmem:[#allocation2 + $0x139] sm:$0xff] }
  0xd9   : > { %v856_v13 = vpop.permute.xlu0 %855  ;;  %v1455_v27 = vpop.permute.xlu1 %1454 }
  0xda   : > { %901 = vst.msk [vmem:[#allocation3 + $0x48] sm:$0xff] %vm897_vm5, %v856_v13  ;;  %v1573_v13 = vld [vmem:[#allocation3 + $0x88] sm:$0xff] }
  0xdb   : > { %1448 = vrot.lane.b32.xlu0 %v3332_v49, %s2901_s29  ;;  %1489 = vst.msk [vmem:[#allocation3 + $0x140] sm:$0xff] %vm1026_vm6, %v1455_v27 }
  0xdc   : > { %742 = vrot.lane.b32.xlu1 %v3373_v29, %s2900_s22  ;;  %v1407_v29 = vpack.c.bf16 %v1387_v31, %v1386_v28 }
  0xdd   : > { %v1435_v24 = vpop.permute.xlu0 %1434  ;;  %v1005_v32 = vpop.permute.xlu1 %1004 }
  0xde   : > { %1479 = vst.msk [vmem:[#allocation3 + $0x50] sm:$0xff] %vm1026_vm6, %v1435_v24  ;;  %1040 = vst.msk [vmem:[#allocation3 + $0x138] sm:$0xff] %vm1026_vm6, %v1005_v32  ;;  %v1576_v24 = vld [vmem:[#allocation3 + $0xa0] sm:$0xff] }
  0xdf   : > { %1193 = vrot.lane.b32.xlu0 %v3349_v9, %s2900_s22 }
  0xe0   : > { %871 = vrot.lane.b32.xlu1 %v3381_v34, %s2899_s21 }
  0xe1   : > { %v985_v49 = vpop.permute.xlu0 %984  ;;  %v1200_v52 = vpop.permute.xlu1 %1199 }
  0xe2   : > { %1030 = vst.msk [vmem:[#allocation3 + $0x48] sm:$0xff] %vm1026_vm6, %v985_v49  ;;  %v1596_v37 = vld [vmem:[#allocation3 + $0x140] sm:$0xff] }
  0xe3   : > { %1322 = vrot.lane.b32.xlu0 %v3316_v41, %s2899_s21  ;;  %1233 = vst.msk [vmem:[#allocation3 + $0x158] sm:$0xff] %vm768_vm4, %v1200_v52  ;;  %1939 = vmatprep.mubr.bf16.mxu1 %v1596_v37  ;;  %v1579_v37 = vld [vmem:[#allocation3 + $0xb8] sm:$0xff] }
  0xe4   : > { %1000 = vrot.lane.b32.xlu1 %v3279_v55, %s2901_s29 }
  0xe5   : > { %v1180_v9 = vpop.permute.xlu0 %1179  ;;  %v1566_v38 = vld [vmem:[#allocation3 + $0x50] sm:$0xff]  ;;  %v749_v34 = vpop.permute.xlu1 %748  ;;  %v1595_v46 = vld [vmem:[#allocation3 + $0x138] sm:$0xff] }
  0xe6   : > { %1223 = vst.msk [vmem:[#allocation3 + $0x68] sm:$0xff] %vm768_vm4, %v1180_v9  ;;  %1859 = vmatprep.mubr.bf16.mxu0 %v1566_v38  ;;  %783 = vst.msk [vmem:[#allocation3 + $0x150] sm:$0xff] %vm768_vm4, %v749_v34  ;;  %1940 = vmatmul.mubr.bf16.gmra.mrb[4].mxu1 %v1595_v46  ;;  %v1582_v9 = vld [vmem:[#allocation3 + $0xd0] sm:$0xff] }
  0xe7   : > { %1450 = vrot.lane.b32.xlu0 %v1407_v29, %s2901_s29  ;;  %s2645_s29 = sshll.u32 %s3984_s25, 7 }
  0xe8   : > { %s3721_s13 = scalar_lea.vmem %s3980_s5, %s2645_s29 }
  0xe9   : > { %v729_v41 = vpop.permute.xlu0 %728  ;;  %v1565_v40 = vld [vmem:[#allocation3 + $0x48] sm:$0xff]  ;;  %v1329_v5 = vpop.permute.xlu1 %1328 }
  0xea   : > { %773 = vst.msk [vmem:[#allocation3 + $0x60] sm:$0xff] %vm768_vm4, %v729_v41  ;;  %1860 = vmatmul.mubr.bf16.gmra.mrb[12].mxu0 %v1565_v40  ;;  %v1585_v40 = vld [vmem:[#allocation3 + $0xe8] sm:$0xff] }
  0xeb   : > { %1362 = vst.msk [vmem:[#allocation3 + $0x158] sm:$0xff] %vm897_vm5, %v1329_v5 }
  0xed   : > { %v1309_v55 = vpop.permute.xlu0 %1308  ;;  %v878_v42 = vpop.permute.xlu1 %877 }
  0xee   : > { %1352 = vst.msk [vmem:[#allocation3 + $0x68] sm:$0xff] %vm897_vm5, %v1309_v55  ;;  %912 = vst.msk [vmem:[#allocation3 + $0x150] sm:$0xff] %vm897_vm5, %v878_v42  ;;  %v1588_v42 = vld [vmem:[#allocation3 + $0x100] sm:$0xff] }
  0xf1   : > { %v858_v19 = vpop.permute.xlu0 %857  ;;  %v1457_v45 = vpop.permute.xlu1 %1456 }
  0xf2   : > { %902 = vst.msk [vmem:[#allocation3 + $0x60] sm:$0xff] %vm897_vm5, %v858_v19 }
  0xf3   : > { %1490 = vst.msk [vmem:[#allocation3 + $0x158] sm:$0xff] %vm1026_vm6, %v1457_v45 }
  0xf5   : > { %v1437_v35 = vpop.permute.xlu0 %1436  ;;  %v1007_v59 = vpop.permute.xlu1 %1006 }
  0xf6   : > { %1480 = vst.msk [vmem:[#allocation3 + $0x68] sm:$0xff] %vm1026_vm6, %v1437_v35  ;;  %1041 = vst.msk [vmem:[#allocation3 + $0x150] sm:$0xff] %vm1026_vm6, %v1007_v59  ;;  %v1591_v59 = vld [vmem:[#allocation3 + $0x118] sm:$0xff] }
  0xf9   : > { %v987_v47 = vpop.permute.xlu0 %986  ;;  %v1202_v33 = vpop.permute.xlu1 %1201 }
  0xfa   : > { %1031 = vst.msk [vmem:[#allocation3 + $0x60] sm:$0xff] %vm1026_vm6, %v987_v47  ;;  %v1599_v48 = vld [vmem:[#allocation3 + $0x158] sm:$0xff] }
  0xfb   : > { %1234 = vst.msk [vmem:[#allocation3 + $0x170] sm:$0xff] %vm768_vm4, %v1202_v33  ;;  %1947 = vmatprep.mubr.bf16.mxu1 %v1599_v48  ;;  %v1594_v33 = vld [vmem:[#allocation3 + $0x130] sm:$0xff] }
  0xfd   : > { %v1182_v58 = vpop.permute.xlu0 %1181  ;;  %v1569_v51 = vld [vmem:[#allocation3 + $0x68] sm:$0xff]  ;;  %v751_v54 = vpop.permute.xlu1 %750  ;;  %v1598_v56 = vld [vmem:[#allocation3 + $0x150] sm:$0xff] }
  0xfe   : > { %1224 = vst.msk [vmem:[#allocation3 + $0x80] sm:$0xff] %vm768_vm4, %v1182_v58  ;;  %1867 = vmatprep.mubr.bf16.mxu0 %v1569_v51  ;;  %784 = vst.msk [vmem:[#allocation3 + $0x168] sm:$0xff] %vm768_vm4, %v751_v54  ;;  %1948 = vmatmul.mubr.bf16.gmra.mrb[8].mxu1 %v1598_v56 }
 0x101   : > { %v731_v20 = vpop.permute.xlu0 %730  ;;  %v1568_v44 = vld [vmem:[#allocation3 + $0x60] sm:$0xff]  ;;  %v1331_v21 = vpop.permute.xlu1 %1330 }
 0x102   : > { %774 = vst.msk [vmem:[#allocation3 + $0x78] sm:$0xff] %vm768_vm4, %v731_v20  ;;  %1868 = vmatmul.mubr.bf16.gmra.mrb[16].mxu0 %v1568_v44  ;;  %v1597_v20 = vld [vmem:[#allocation3 + $0x148] sm:$0xff] }
 0x103   : > { %1363 = vst.msk [vmem:[#allocation3 + $0x170] sm:$0xff] %vm897_vm5, %v1331_v21  ;;  %v1600_v21 = vld [vmem:[#allocation3 + $0x160] sm:$0xff] }
 0x105   : > { %v1311_v57 = vpop.permute.xlu0 %1310  ;;  %v880_v16 = vpop.permute.xlu1 %879 }
 0x106   : > { %1353 = vst.msk [vmem:[#allocation3 + $0x80] sm:$0xff] %vm897_vm5, %v1311_v57  ;;  %913 = vst.msk [vmem:[#allocation3 + $0x168] sm:$0xff] %vm897_vm5, %v880_v16 }
 0x109   : > { %v860_v50 = vpop.permute.xlu0 %859  ;;  %v1459_v60 = vpop.permute.xlu1 %1458 }
 0x10a   : > { %903 = vst.msk [vmem:[#allocation3 + $0x78] sm:$0xff] %vm897_vm5, %v860_v50 }
 0x10b   : > { %1491 = vst.msk [vmem:[#allocation3 + $0x170] sm:$0xff] %vm1026_vm6, %v1459_v60 }
 0x10d   : > { %v1439_v26 = vpop.permute.xlu0 %1438  ;;  %v1009_v0 = vpop.permute.xlu1 %1008 }
 0x10e   : > { %1481 = vst.msk [vmem:[#allocation3 + $0x80] sm:$0xff] %vm1026_vm6, %v1439_v26  ;;  %1042 = vst.msk [vmem:[#allocation3 + $0x168] sm:$0xff] %vm1026_vm6, %v1009_v0  ;;  %v1603_v26 = vld [vmem:[#allocation3 + $0x178] sm:$0xff] }
 0x111   : > { %v989_v62 = vpop.permute.xlu0 %988  ;;  %v733_v1 = vpop.permute.xlu1 %732 }
 0x112   : > { %1032 = vst.msk [vmem:[#allocation3 + $0x78] sm:$0xff] %vm1026_vm6, %v989_v62  ;;  %v1602_v6 = vld [vmem:[#allocation3 + $0x170] sm:$0xff] }
 0x113   : > { %775 = vst.msk [vmem:[#allocation3 + $0x90] sm:$0xff] %vm768_vm4, %v733_v1  ;;  %1955 = vmatprep.mubr.bf16.mxu1 %v1602_v6 }
 0x115   : > { %v1184_v3 = vpop.permute.xlu0 %1183  ;;  %v1572_v61 = vld [vmem:[#allocation3 + $0x80] sm:$0xff]  ;;  %v1601_v10 = vld [vmem:[#allocation3 + $0x168] sm:$0xff]  ;;  %v862_v63 = vpop.permute.xlu1 %861 }
 0x116   : > { %1225 = vst.msk [vmem:[#allocation3 + $0x98] sm:$0xff] %vm768_vm4, %v1184_v3  ;;  %1875 = vmatprep.mubr.bf16.mxu0 %v1572_v61  ;;  %1956 = vmatmul.mubr.bf16.gmra.mrb[12].mxu1 %v1601_v10 }
 0x117   : > { %904 = vst.msk [vmem:[#allocation3 + $0x90] sm:$0xff] %vm897_vm5, %v862_v63  ;;  %2812 = vmatprep.mubr.msk.bf16.mxu1 %vm503_vm0, %v1558_v53 }
 0x119   : > { %v1313_v11 = vpop.permute.xlu0 %1312  ;;  %v1571_v4 = vld [vmem:[#allocation3 + $0x78] sm:$0xff]  ;;  %v991_v12 = vpop.permute.xlu1 %990 }
 0x11a   : > { %1354 = vst.msk [vmem:[#allocation3 + $0x98] sm:$0xff] %vm897_vm5, %v1313_v11  ;;  %1876 = vmatmul.mubr.bf16.gmra.mrb[20].mxu0 %v1571_v4 }
 0x11b   : > { %1033 = vst.msk [vmem:[#allocation3 + $0x90] sm:$0xff] %vm1026_vm6, %v991_v12 }
 0x11d   : > { %v1441_v14 = vpop.permute.xlu0 %1440  ;;  %v735_v43 = vpop.permute.xlu1 %734 }
 0x11e   : > { %1482 = vst.msk [vmem:[#allocation3 + $0x98] sm:$0xff] %vm1026_vm6, %v1441_v14  ;;  %2813 = vmatmul.mubr.msk.bf16.vlgmr.msra.gmra.mrb[16].mxu1 %vm503_vm0, %v1561_v36 }
 0x11f   : > { %776 = vst.msk [vmem:[#allocation3 + $0xa8] sm:$0xff] %vm768_vm4, %v735_v43  ;;  %2816 = vmatprep.mubr.msk.bf16.mxu1 %vm503_vm0, %v1564_v15 }
 0x121   : > { %v1186_v39 = vpop.permute.xlu0 %1185 }
 0x122   : > { %1226 = vst.msk [vmem:[#allocation3 + $0xb0] sm:$0xff] %vm768_vm4, %v1186_v39  ;;  %v864_v17 = vpop.permute.xlu1 %863  ;;  %v1574_v18 = vld [vmem:[#allocation3 + $0x90] sm:$0xff] }
 0x123   : > { %905 = vst.msk [vmem:[#allocation3 + $0xa8] sm:$0xff] %vm897_vm5, %v864_v17 }
 0x125   : > { %v1315_v25 = vpop.permute.xlu0 %1314  ;;  %v1575_v7 = vld [vmem:[#allocation3 + $0x98] sm:$0xff] }
 0x126   : > { %1355 = vst.msk [vmem:[#allocation3 + $0xb0] sm:$0xff] %vm897_vm5, %v1315_v25  ;;  %1883 = vmatprep.mubr.bf16.mxu0 %v1575_v7  ;;  %v993_v30 = vpop.permute.xlu1 %992  ;;  %2817 = vmatmul.mubr.msk.bf16.gmra.mrb[20].mxu1 %vm503_vm0, %v1567_v23 }
 0x127   : > { %1884 = vmatmul.mubr.bf16.gmra.mrb[24].mxu0 %v1574_v18  ;;  %1034 = vst.msk [vmem:[#allocation3 + $0xa8] sm:$0xff] %vm1026_vm6, %v993_v30  ;;  %2820 = vmatprep.mubr.msk.bf16.mxu1 %vm503_vm0, %v1570_v22 }
 0x129   : > { %v1443_v2 = vpop.permute.xlu0 %1442 }
 0x12a   : > { %1483 = vst.msk [vmem:[#allocation3 + $0xb0] sm:$0xff] %vm1026_vm6, %v1443_v2  ;;  %v737_v8 = vpop.permute.xlu1 %736 }
 0x12b   : > { %777 = vst.msk [vmem:[#allocation3 + $0xc0] sm:$0xff] %vm768_vm4, %v737_v8 }
 0x12d   : > { %v1188_v27 = vpop.permute.xlu0 %1187 }
 0x12e   : > { %1227 = vst.msk [vmem:[#allocation3 + $0xc8] sm:$0xff] %vm768_vm4, %v1188_v27  ;;  %v866_v32 = vpop.permute.xlu1 %865  ;;  %2821 = vmatmul.mubr.msk.bf16.gmra.mrb[24].mxu1 %vm503_vm0, %v1573_v13  ;;  %v1577_v28 = vld [vmem:[#allocation3 + $0xa8] sm:$0xff] }
 0x12f   : > { %906 = vst.msk [vmem:[#allocation3 + $0xc0] sm:$0xff] %vm897_vm5, %v866_v32  ;;  %2824 = vmatprep.mubr.msk.bf16.mxu1 %vm503_vm0, %v1576_v24 }
 0x131   : > { %v1317_v31 = vpop.permute.xlu0 %1316  ;;  %v1578_v49 = vld [vmem:[#allocation3 + $0xb0] sm:$0xff] }
 0x132   : > { %1356 = vst.msk [vmem:[#allocation3 + $0xc8] sm:$0xff] %vm897_vm5, %v1317_v31  ;;  %1891 = vmatprep.mubr.bf16.mxu0 %v1578_v49  ;;  %v995_v52 = vpop.permute.xlu1 %994 }
 0x133   : > { %1892 = vmatmul.mubr.bf16.gmra.mrb[28].mxu0 %v1577_v28  ;;  %1035 = vst.msk [vmem:[#allocation3 + $0xc0] sm:$0xff] %vm1026_vm6, %v995_v52 }
 0x135   : > { %v1445_v29 = vpop.permute.xlu0 %1444 }
 0x136   : > { %1484 = vst.msk [vmem:[#allocation3 + $0xc8] sm:$0xff] %vm1026_vm6, %v1445_v29  ;;  %v739_v38 = vpop.permute.xlu1 %738  ;;  %2825 = vmatmul.mubr.msk.bf16.gmra.mrb[28].mxu1 %vm503_vm0, %v1579_v37 }
 0x137   : > { %778 = vst.msk [vmem:[#allocation3 + $0xd8] sm:$0xff] %vm768_vm4, %v739_v38  ;;  %2828 = vmatprep.mubr.msk.bf16.mxu1 %vm503_vm0, %v1582_v9 }
 0x139   : > { %v1190_v34 = vpop.permute.xlu0 %1189 }
 0x13a   : > { %1228 = vst.msk [vmem:[#allocation3 + $0xe0] sm:$0xff] %vm768_vm4, %v1190_v34  ;;  %v868_v46 = vpop.permute.xlu1 %867  ;;  %v1580_v41 = vld [vmem:[#allocation3 + $0xc0] sm:$0xff] }
 0x13b   : > { %907 = vst.msk [vmem:[#allocation3 + $0xd8] sm:$0xff] %vm897_vm5, %v868_v46 }
 0x13d   : > { %v1319_v5 = vpop.permute.xlu0 %1318  ;;  %v1581_v55 = vld [vmem:[#allocation3 + $0xc8] sm:$0xff] }
 0x13e   : > { %1357 = vst.msk [vmem:[#allocation3 + $0xe0] sm:$0xff] %vm897_vm5, %v1319_v5  ;;  %1899 = vmatprep.mubr.bf16.mxu0 %v1581_v55  ;;  %v997_v19 = vpop.permute.xlu1 %996  ;;  %2829 = vmatmul.mubr.msk.bf16.gmra.mrb[32].mxu1 %vm503_vm0, %v1585_v40 }
 0x13f   : > { %1900 = vmatmul.mubr.bf16.gmra.mrb[32].mxu0 %v1580_v41  ;;  %1036 = vst.msk [vmem:[#allocation3 + $0xd8] sm:$0xff] %vm1026_vm6, %v997_v19  ;;  %2832 = vmatprep.mubr.msk.bf16.mxu1 %vm503_vm0, %v1588_v42 }
 0x141   : > { %v1447_v45 = vpop.permute.xlu0 %1446 }
 0x142   : > { %1485 = vst.msk [vmem:[#allocation3 + $0xe0] sm:$0xff] %vm1026_vm6, %v1447_v45  ;;  %v741_v35 = vpop.permute.xlu1 %740 }
 0x143   : > { %779 = vst.msk [vmem:[#allocation3 + $0xf0] sm:$0xff] %vm768_vm4, %v741_v35 }
 0x145   : > { %v1192_v47 = vpop.permute.xlu0 %1191 }
 0x146   : > { %1229 = vst.msk [vmem:[#allocation3 + $0xf8] sm:$0xff] %vm768_vm4, %v1192_v47  ;;  %v870_v48 = vpop.permute.xlu1 %869  ;;  %2833 = vmatmul.mubr.msk.bf16.gmra.mrb[36].mxu1 %vm503_vm0, %v1591_v59  ;;  %v1583_v58 = vld [vmem:[#allocation3 + $0xd8] sm:$0xff] }
 0x147   : > { %908 = vst.msk [vmem:[#allocation3 + $0xf0] sm:$0xff] %vm897_vm5, %v870_v48  ;;  %2836 = vmatprep.mubr.msk.bf16.mxu1 %vm503_vm0, %v1594_v33 }
 0x149   : > { %v1321_v51 = vpop.permute.xlu0 %1320  ;;  %v1584_v54 = vld [vmem:[#allocation3 + $0xe0] sm:$0xff] }
 0x14a   : > { %1358 = vst.msk [vmem:[#allocation3 + $0xf8] sm:$0xff] %vm897_vm5, %v1321_v51  ;;  %1907 = vmatprep.mubr.bf16.mxu0 %v1584_v54  ;;  %v999_v56 = vpop.permute.xlu1 %998 }
 0x14b   : > { %1908 = vmatmul.mubr.bf16.gmra.mrb[36].mxu0 %v1583_v58  ;;  %1037 = vst.msk [vmem:[#allocation3 + $0xf0] sm:$0xff] %vm1026_vm6, %v999_v56 }
 0x14d   : > { %v1449_v44 = vpop.permute.xlu0 %1448 }
 0x14e   : > { %1486 = vst.msk [vmem:[#allocation3 + $0xf8] sm:$0xff] %vm1026_vm6, %v1449_v44  ;;  %v743_v57 = vpop.permute.xlu1 %742  ;;  %2837 = vmatmul.mubr.msk.bf16.gmra.mrb[40].mxu1 %vm503_vm0, %v1597_v20 }
 0x14f   : > { %780 = vst.msk [vmem:[#allocation3 + $0x108] sm:$0xff] %vm768_vm4, %v743_v57  ;;  %2840 = vmatprep.mubr.msk.bf16.mxu1 %vm503_vm0, %v1600_v21 }
 0x151   : > { %v1194_v16 = vpop.permute.xlu0 %1193 }
 0x152   : > { %1230 = vst.msk [vmem:[#allocation3 + $0x110] sm:$0xff] %vm768_vm4, %v1194_v16  ;;  %v872_v50 = vpop.permute.xlu1 %871  ;;  %v1586_v60 = vld [vmem:[#allocation3 + $0xf0] sm:$0xff] }
 0x153   : > { %909 = vst.msk [vmem:[#allocation3 + $0x108] sm:$0xff] %vm897_vm5, %v872_v50 }
 0x155   : > { %v1323_v0 = vpop.permute.xlu0 %1322  ;;  %v1587_v62 = vld [vmem:[#allocation3 + $0xf8] sm:$0xff] }
 0x156   : > { %1359 = vst.msk [vmem:[#allocation3 + $0x110] sm:$0xff] %vm897_vm5, %v1323_v0  ;;  %1915 = vmatprep.mubr.bf16.mxu0 %v1587_v62  ;;  %v1001_v1 = vpop.permute.xlu1 %1000  ;;  %2841 = vmatmul.mubr.msk.bf16.gmra.mrb[44].mxu1 %vm503_vm0, %v1603_v26  ;;  %v3710_v0 = vld [vmem:[%s3979_s4] ss:$0 sm:$0xff] }
 0x157   : > { %1916 = vmatmul.mubr.bf16.gmra.mrb[40].mxu0 %v1586_v60  ;;  %1038 = vst.msk [vmem:[#allocation3 + $0x108] sm:$0xff] %vm1026_vm6, %v1001_v1 }
 0x159   : > { %v1451_v6 = vpop.permute.xlu0 %1450 }
 0x15a   : > { %1487 = vst.msk [vmem:[#allocation3 + $0x110] sm:$0xff] %vm1026_vm6, %v1451_v6 }
 0x15e   : > { %v1589_v3 = vld [vmem:[#allocation3 + $0x108] sm:$0xff] }
 0x161   : > { %v1590_v61 = vld [vmem:[#allocation3 + $0x110] sm:$0xff] }
 0x162   : > { %1923 = vmatprep.mubr.bf16.mxu0 %v1590_v61 }
 0x163   : > { %1924 = vmatmul.mubr.bf16.gmra.mrb[44].mxu0 %v1589_v3 }
 0x182   : > { %v2694_v53 = vpop.f32.mrb[0].mxu0 }
 0x183   : > { %v2695_v10 = vpop.f32.mrb[1].mxu0 }
 0x184   : > { %v2696_v63 = vadd.f32 %v2695_v10, %v2694_v53  ;;  %v2697_v11 = vpop.f32.mrb[2].mxu0 }
 0x185   : > { %v2698_v4 = vpop.f32.mrb[3].mxu0 }
 0x186   : > { %v3677_v12 = vadd.f32 %v2698_v4, %v2697_v11  ;;  %v1838_v61 = vadd.f32 %v2696_v63, %v3710_v0 }
 0x18e   : > { %v2700_v36 = vpop.f32.mrb[4].mxu0 }
 0x18f   : > { %v2701_v14 = vpop.f32.mrb[5].mxu0 }
 0x190   : > { %v2702_v15 = vadd.f32 %v2701_v14, %v2700_v36  ;;  %v2703_v43 = vpop.f32.mrb[6].mxu0  ;;  %v1841_v14 = vadd.f32 %v3677_v12, %v3710_v0 }
 0x191   : > { %v2704_v39 = vpop.f32.mrb[7].mxu0 }
 0x192   : > { %v2705_v17 = vadd.f32 %v2704_v39, %v2703_v43  ;;  %v1846_v6 = vadd.f32 %v2702_v15, %v3710_v0 }
 0x194   : > { %v1849_v11 = vadd.f32 %v2705_v17, %v3710_v0 }
 0x1a1   : > { %v2766_v18 = vpop.f32.mrb[0].mxu1 }
 0x1a2   : > { %v2767_v23 = vpop.f32.mrb[1].mxu1 }
 0x1a3   : > { %v3679_v25 = vadd.f32 %v2767_v23, %v2766_v18  ;;  %v2769_v7 = vpop.f32.mrb[2].mxu1 }
 0x1a4   : > { %v2770_v30 = vpop.f32.mrb[3].mxu1 }
 0x1a5   : > { %v2706_v22 = vpop.f32.mrb[8].mxu0  ;;  %v3681_v8 = vadd.f32 %v2770_v30, %v2769_v7 }
 0x1a6   : > { %v2707_v2 = vpop.f32.mrb[9].mxu0 }
 0x1a7   : > { %v3683_v13 = vadd.f32 %v2707_v2, %v2706_v22  ;;  %v2709_v27 = vpop.f32.mrb[10].mxu0 }
 0x1a8   : > { %v2710_v24 = vpop.f32.mrb[11].mxu0 }
 0x1a9   : > { %v3685_v32 = vadd.f32 %v2710_v24, %v2709_v27 }
 0x1b9   : > { %v2772_v28 = vpop.f32.mrb[4].mxu1 }
 0x1ba   : > { %v2773_v31 = vpop.f32.mrb[5].mxu1 }
 0x1bb   : > { %v3687_v49 = vadd.f32 %v2773_v31, %v2772_v28  ;;  %v2775_v52 = vpop.f32.mrb[6].mxu1 }
 0x1bc   : > { %v2776_v29 = vpop.f32.mrb[7].mxu1 }
 0x1bd   : > { %v2712_v37 = vpop.f32.mrb[12].mxu0  ;;  %v3689_v38 = vadd.f32 %v2776_v29, %v2775_v52 }
 0x1be   : > { %v2713_v9 = vpop.f32.mrb[13].mxu0 }
 0x1bf   : > { %v2714_v34 = vadd.f32 %v2713_v9, %v2712_v37  ;;  %v2715_v46 = vpop.f32.mrb[14].mxu0 }
 0x1c0   : > { %v2716_v41 = vpop.f32.mrb[15].mxu0 }
 0x1c1   : > { %v3691_v40 = vadd.f32 %v2716_v41, %v2715_v46  ;;  %v1862_v28 = vadd.f32 %v2714_v34, %v3710_v0  ;;  %v1854_v46 = vadd.f32 %v3683_v13, %v3710_v0  ;;  %v1857_v34 = vadd.f32 %v3685_v32, %v3710_v0 }
 0x1d1   : > { %v2778_v5 = vpop.f32.mrb[8].mxu1 }
 0x1d2   : > { %v2779_v55 = vpop.f32.mrb[9].mxu1 }
 0x1d3   : > { %v3693_v42 = vadd.f32 %v2779_v55, %v2778_v5  ;;  %v2781_v19 = vpop.f32.mrb[10].mxu1 }
 0x1d4   : > { %v2782_v35 = vpop.f32.mrb[11].mxu1 }
 0x1d5   : > { %v2718_v45 = vpop.f32.mrb[16].mxu0  ;;  %v3695_v47 = vadd.f32 %v2782_v35, %v2781_v19 }
 0x1d6   : > { %v2719_v59 = vpop.f32.mrb[17].mxu0 }
 0x1d7   : > { %v3697_v33 = vadd.f32 %v2719_v59, %v2718_v45  ;;  %v2721_v48 = vpop.f32.mrb[18].mxu0 }
 0x1d8   : > { %v2722_v58 = vpop.f32.mrb[19].mxu0 }
 0x1d9   : > { %v3699_v51 = vadd.f32 %v2722_v58, %v2721_v48 }
 0x1e9   : > { %v2784_v54 = vpop.f32.mrb[12].mxu1 }
 0x1ea   : > { %v2785_v56 = vpop.f32.mrb[13].mxu1 }
 0x1eb   : > { %v3701_v20 = vadd.f32 %v2785_v56, %v2784_v54  ;;  %v2787_v44 = vpop.f32.mrb[14].mxu1  ;;  %v1865_v54 = vadd.f32 %v3691_v40, %v3710_v0 }
 0x1ec   : > { %v2788_v57 = vpop.f32.mrb[15].mxu1 }
 0x1ed   : > { %v2724_v21 = vpop.f32.mrb[20].mxu0  ;;  %v3703_v50 = vadd.f32 %v2788_v57, %v2787_v44 }
 0x1ee   : > { %v2725_v16 = vpop.f32.mrb[21].mxu0 }
 0x1ef   : > { %v3705_v60 = vadd.f32 %v2725_v16, %v2724_v21  ;;  %v2727_v26 = vpop.f32.mrb[22].mxu0 }
 0x1f0   : > { %v2728_v62 = vpop.f32.mrb[23].mxu0 }
 0x1f1   : > { %v3712_v1 = vadd.f32 %v2728_v62, %v2727_v26  ;;  %v2814_v3 = vpop.f32.mrb[16].mxu1 }
 0x1f2   : > { %v2007_v53 = vadd.f32 %v2814_v3, %v1846_v6  ;;  %v1998_v10 = vpop.f32.mrb[17].mxu1 }
 0x1f3   : > { %v1999_v4 = vadd.f32 %v1998_v10, %v1838_v61  ;;  %v2815_v36 = vpop.f32.mrb[18].mxu1 }
 0x1f4   : > { %v2648_v15 = vpack.c.bf16 %v2007_v53, %v2007_v53  ;;  %v2010_v63 = vadd.f32 %v2815_v36, %v1849_v11  ;;  %v2001_v43 = vpop.f32.mrb[19].mxu1  ;;  %v2198_v23 = vmul.f32 %v2007_v53, %v2007_v53  ;;  %v2128_v31 = vsel %vm503_vm0, %v2007_v53, 0.0 }
 0x1f5   : > { %v2196_v39 = vmul.f32 %v1999_v4, %v1999_v4  ;;  %v2646_v18 = vpack.c.bf16 %v1999_v4, %v1999_v4  ;;  %v2002_v17 = vadd.f32 %v2001_v43, %v1841_v14  ;;  %v2125_v22 = vsel %vm503_vm0, %v1999_v4, 0.0 }
 0x1f6   : > { %2429 = vst.msk [vmem:[%s3721_s13 + $0x8] sm:$0xf] %vm2426_vm7, %v2648_v15  ;;  %v2649_v7 = vpack.c.bf16 %v2010_v63, %v2010_v63  ;;  %v2199_v27 = vmul.f32 %v2010_v63, %v2010_v63  ;;  %v2231_v35 = vsel %vm503_vm0, %v2198_v23, 0.0  ;;  %v2130_v13 = vsel %vm503_vm0, %v2010_v63, 0.0 }
 0x1f7   : > { %2427 = vst.msk [vmem:[%s3721_s13] sm:$0xf] %vm2426_vm7, %v2646_v18  ;;  %v2126_v30 = vsel %vm503_vm0, %v2002_v17, 0.0  ;;  %v2197_v2 = vmul.f32 %v2002_v17, %v2002_v17  ;;  %v2647_v12 = vpack.c.bf16 %v2002_v17, %v2002_v17  ;;  %v2228_v52 = vsel %vm503_vm0, %v2196_v39, 0.0 }
 0x1f8   : > { %2430 = vst.msk [vmem:[%s3721_s13 + $0xc] sm:$0xf] %vm2426_vm7, %v2649_v7  ;;  %v2127_v24 = vadd.f32 %v2126_v30, %v2125_v22  ;;  %v2233_v44 = vsel %vm503_vm0, %v2199_v27, 0.0  ;;  %v1878_v63 = vadd.f32 %v3705_v60, %v3710_v0  ;;  %v1870_v43 = vadd.f32 %v3697_v33, %v3710_v0 }
 0x1f9   : > { %v2229_v37 = vsel %vm503_vm0, %v2197_v2, 0.0  ;;  %2428 = vst.msk [vmem:[%s3721_s13 + $0x4] sm:$0xf] %vm2426_vm7, %v2647_v12  ;;  %v2818_v9 = vpop.f32.mrb[20].mxu1  ;;  %v1873_v7 = vadd.f32 %v3699_v51, %v3710_v0  ;;  %v1881_v60 = vadd.f32 %v3712_v1, %v3710_v0 }
 0x1fa   : > { %v2730_v29 = vpop.f32.mrb[24].mxu0  ;;  %v2129_v41 = vadd.f32 %v2128_v31, %v2127_v24  ;;  %v2230_v5 = vadd.f32 %v2229_v37, %v2228_v52  ;;  %v2023_v19 = vadd.f32 %v2818_v9, %v1862_v28  ;;  %v2014_v45 = vpop.f32.mrb[21].mxu1 }
 0x1fb   : > { %v2731_v55 = vpop.f32.mrb[25].mxu0  ;;  %v2015_v58 = vadd.f32 %v2014_v45, %v1854_v46  ;;  %v2819_v56 = vpop.f32.mrb[22].mxu1 }
 0x1fc   : > { %v2732_v59 = vadd.f32 %v2731_v55, %v2730_v29  ;;  %v2733_v48 = vpop.f32.mrb[26].mxu0  ;;  %v2232_v21 = vadd.f32 %v2231_v35, %v2230_v5  ;;  %v2652_v16 = vpack.c.bf16 %v2023_v19, %v2023_v19  ;;  %v2017_v26 = vpop.f32.mrb[23].mxu1  ;;  %v2131_v62 = vadd.f32 %v2130_v13, %v2129_v41 }
 0x1fd   : > { %v2734_v57 = vpop.f32.mrb[27].mxu0  ;;  %v2132_v6 = vsel %vm503_vm0, %v2015_v58, 0.0  ;;  %v2200_v3 = vmul.f32 %v2015_v58, %v2015_v58  ;;  %v2650_v53 = vpack.c.bf16 %v2015_v58, %v2015_v58  ;;  %v2026_v40 = vadd.f32 %v2819_v56, %v1865_v54 }
 0x1fe   : > { %v2735_v32 = vadd.f32 %v2734_v57, %v2733_v48  ;;  %2433 = vst.msk [vmem:[%s3721_s13 + $0x18] sm:$0xf] %vm2426_vm7, %v2652_v16  ;;  %v2234_v61 = vadd.f32 %v2233_v44, %v2232_v21  ;;  %v2202_v10 = vmul.f32 %v2023_v19, %v2023_v19  ;;  %v2133_v11 = vadd.f32 %v2132_v6, %v2131_v62 }
 0x1ff   : > { %v2235_v4 = vsel %vm503_vm0, %v2200_v3, 0.0  ;;  %v2018_v36 = vadd.f32 %v2017_v26, %v1857_v34  ;;  %2431 = vst.msk [vmem:[%s3721_s13 + $0x10] sm:$0xf] %vm2426_vm7, %v2650_v53  ;;  %v2653_v15 = vpack.c.bf16 %v2026_v40, %v2026_v40  ;;  %v2136_v22 = vsel %vm503_vm0, %v2023_v19, 0.0 }
 0x200   : > { %v2236_v14 = vadd.f32 %v2235_v4, %v2234_v61  ;;  %v2239_v33 = vsel %vm503_vm0, %v2202_v10, 0.0  ;;  %v2203_v27 = vmul.f32 %v2026_v40, %v2026_v40  ;;  %v2138_v51 = vsel %vm503_vm0, %v2026_v40, 0.0 }
 0x201   : > { %v2134_v39 = vsel %vm503_vm0, %v2018_v36, 0.0  ;;  %v2201_v18 = vmul.f32 %v2018_v36, %v2018_v36  ;;  %v2651_v17 = vpack.c.bf16 %v2018_v36, %v2018_v36  ;;  %v2822_v23 = vpop.f32.mrb[24].mxu1  ;;  %2434 = vst.msk [vmem:[%s3721_s13 + $0x1c] sm:$0xf] %vm2426_vm7, %v2653_v15  ;;  %v1886_v9 = vadd.f32 %v2732_v59, %v3710_v0 }
 0x202   : > { %v2135_v30 = vadd.f32 %v2134_v39, %v2133_v11  ;;  %v2039_v2 = vadd.f32 %v2822_v23, %v1878_v63  ;;  %v2030_v12 = vpop.f32.mrb[25].mxu1  ;;  %v2241_v58 = vsel %vm503_vm0, %v2203_v27, 0.0  ;;  %v1889_v26 = vadd.f32 %v2735_v32, %v3710_v0 }
 0x203   : > { %v2237_v24 = vsel %vm503_vm0, %v2201_v18, 0.0  ;;  %2432 = vst.msk [vmem:[%s3721_s13 + $0x14] sm:$0xf] %vm2426_vm7, %v2651_v17  ;;  %v2031_v28 = vadd.f32 %v2030_v12, %v1870_v43  ;;  %v2823_v31 = vpop.f32.mrb[26].mxu1 }
 0x204   : > { %v2137_v52 = vadd.f32 %v2136_v22, %v2135_v30  ;;  %v2238_v37 = vadd.f32 %v2237_v24, %v2236_v14  ;;  %v2033_v29 = vpop.f32.mrb[27].mxu1  ;;  %v2656_v46 = vpack.c.bf16 %v2039_v2, %v2039_v2  ;;  %v2206_v45 = vmul.f32 %v2039_v2, %v2039_v2 }
 0x205   : > { %v2140_v41 = vsel %vm503_vm0, %v2031_v28, 0.0  ;;  %v2204_v5 = vmul.f32 %v2031_v28, %v2031_v28  ;;  %v2654_v55 = vpack.c.bf16 %v2031_v28, %v2031_v28  ;;  %v2042_v48 = vadd.f32 %v2823_v31, %v1881_v60 }
 0x206   : > { %v2736_v1 = vpop.f32.mrb[28].mxu0  ;;  %v2240_v19 = vadd.f32 %v2239_v33, %v2238_v37  ;;  %v2139_v34 = vadd.f32 %v2138_v51, %v2137_v52  ;;  %2437 = vst.msk [vmem:[%s3721_s13 + $0x28] sm:$0xf] %vm2426_vm7, %v2656_v46  ;;  %v2034_v13 = vadd.f32 %v2033_v29, %v1873_v7  ;;  %v2144_v44 = vsel %vm503_vm0, %v2039_v2, 0.0 }
 0x207   : > { %v2737_v35 = vpop.f32.mrb[29].mxu0  ;;  %v2243_v54 = vsel %vm503_vm0, %v2204_v5, 0.0  ;;  %2435 = vst.msk [vmem:[%s3721_s13 + $0x20] sm:$0xf] %vm2426_vm7, %v2654_v55  ;;  %v2657_v62 = vpack.c.bf16 %v2042_v48, %v2042_v48  ;;  %v2247_v40 = vsel %vm503_vm0, %v2206_v45, 0.0  ;;  %v2207_v14 = vmul.f32 %v2042_v48, %v2042_v48 }
 0x208   : > { %v2738_v59 = vadd.f32 %v2737_v35, %v2736_v1  ;;  %v2739_v56 = vpop.f32.mrb[30].mxu0  ;;  %v2141_v21 = vadd.f32 %v2140_v41, %v2139_v34  ;;  %v2242_v57 = vadd.f32 %v2241_v58, %v2240_v19  ;;  %v2142_v6 = vsel %vm503_vm0, %v2034_v13, 0.0 }
 0x209   : > { %v2740_v16 = vpop.f32.mrb[31].mxu0  ;;  %v2205_v3 = vmul.f32 %v2034_v13, %v2034_v13  ;;  %v2655_v61 = vpack.c.bf16 %v2034_v13, %v2034_v13  ;;  %v2826_v53 = vpop.f32.mrb[28].mxu1  ;;  %2438 = vst.msk [vmem:[%s3721_s13 + $0x2c] sm:$0xf] %vm2426_vm7, %v2657_v62  ;;  %v2146_v39 = vsel %vm503_vm0, %v2042_v48, 0.0  ;;  %v2249_v28 = vsel %vm503_vm0, %v2207_v14, 0.0 }
 0x20a   : > { %v2244_v10 = vadd.f32 %v2243_v54, %v2242_v57  ;;  %v2143_v11 = vadd.f32 %v2142_v6, %v2141_v21  ;;  %v2741_v4 = vadd.f32 %v2740_v16, %v2739_v56  ;;  %v2046_v36 = vpop.f32.mrb[29].mxu1  ;;  %v1894_v32 = vadd.f32 %v2738_v59, %v3710_v0 }
 0x20b   : > { %v2245_v15 = vsel %vm503_vm0, %v2205_v3, 0.0  ;;  %2436 = vst.msk [vmem:[%s3721_s13 + $0x24] sm:$0xf] %vm2426_vm7, %v2655_v61  ;;  %v2047_v63 = vadd.f32 %v2046_v36, %v1886_v9  ;;  %v2827_v43 = vpop.f32.mrb[30].mxu1 }
 0x20c   : > { %v2145_v18 = vadd.f32 %v2144_v44, %v2143_v11  ;;  %v2246_v17 = vadd.f32 %v2245_v15, %v2244_v10  ;;  %v1897_v23 = vadd.f32 %v2741_v4, %v3710_v0  ;;  %v2049_v7 = vpop.f32.mrb[31].mxu1  ;;  %v2055_v22 = vadd.f32 %v2826_v53, %v1894_v32 }
 0x20d   : > { %v2148_v30 = vsel %vm503_vm0, %v2047_v63, 0.0  ;;  %v2208_v2 = vmul.f32 %v2047_v63, %v2047_v63  ;;  %v2658_v12 = vpack.c.bf16 %v2047_v63, %v2047_v63  ;;  %v2050_v24 = vadd.f32 %v2049_v7, %v1889_v26 }
 0x20e   : > { %v2248_v60 = vadd.f32 %v2247_v40, %v2246_v17  ;;  %v2147_v33 = vadd.f32 %v2146_v39, %v2145_v18  ;;  %v2058_v27 = vadd.f32 %v2827_v43, %v1897_v23  ;;  %v2660_v31 = vpack.c.bf16 %v2055_v22, %v2055_v22 }
 0x20f   : > { %v2251_v51 = vsel %vm503_vm0, %v2208_v2, 0.0  ;;  %2439 = vst.msk [vmem:[%s3721_s13 + $0x30] sm:$0xf] %vm2426_vm7, %v2658_v12  ;;  %v2210_v29 = vmul.f32 %v2055_v22, %v2055_v22  ;;  %v2150_v46 = vsel %vm503_vm0, %v2050_v24, 0.0  ;;  %v2209_v1 = vmul.f32 %v2050_v24, %v2050_v24 }
 0x210   : > { %v2149_v52 = vadd.f32 %v2148_v30, %v2147_v33  ;;  %v2250_v37 = vadd.f32 %v2249_v28, %v2248_v60  ;;  %2441 = vst.msk [vmem:[%s3721_s13 + $0x38] sm:$0xf] %vm2426_vm7, %v2660_v31  ;;  %v2661_v9 = vpack.c.bf16 %v2058_v27, %v2058_v27  ;;  %v2659_v45 = vpack.c.bf16 %v2050_v24, %v2050_v24 }
 0x211   : > { %v2830_v5 = vpop.f32.mrb[32].mxu1  ;;  %v2152_v48 = vsel %vm503_vm0, %v2055_v22, 0.0  ;;  %v2211_v58 = vmul.f32 %v2058_v27, %v2058_v27  ;;  %v2253_v54 = vsel %vm503_vm0, %v2209_v1, 0.0  ;;  %v2255_v26 = vsel %vm503_vm0, %v2210_v29, 0.0 }
 0x212   : > { %v2742_v41 = vpop.f32.mrb[32].mxu0  ;;  %v2252_v55 = vadd.f32 %v2251_v51, %v2250_v37  ;;  %v2151_v19 = vadd.f32 %v2150_v46, %v2149_v52  ;;  %v2062_v35 = vpop.f32.mrb[33].mxu1  ;;  %2442 = vst.msk [vmem:[%s3721_s13 + $0x3c] sm:$0xf] %vm2426_vm7, %v2661_v9  ;;  %2440 = vst.msk [vmem:[%s3721_s13 + $0x34] sm:$0xf] %vm2426_vm7, %v2659_v45  ;;  %v1942_v52 = vadd.f32 %v3687_v49, %v3710_v0 }
 0x213   : > { %v2743_v34 = vpop.f32.mrb[33].mxu0  ;;  %v2831_v13 = vpop.f32.mrb[34].mxu1  ;;  %v2154_v62 = vsel %vm503_vm0, %v2058_v27, 0.0  ;;  %v2257_v40 = vsel %vm503_vm0, %v2211_v58, 0.0  ;;  %v1934_v46 = vadd.f32 %v3679_v25, %v3710_v0 }
 0x214   : > { %v2744_v59 = vadd.f32 %v2743_v34, %v2742_v41  ;;  %v2745_v56 = vpop.f32.mrb[34].mxu0  ;;  %v2153_v44 = vadd.f32 %v2152_v48, %v2151_v19  ;;  %v2254_v21 = vadd.f32 %v2253_v54, %v2252_v55  ;;  %v2065_v16 = vpop.f32.mrb[35].mxu1  ;;  %v1945_v55 = vadd.f32 %v3689_v38, %v3710_v0 }
 0x215   : > { %v2746_v57 = vpop.f32.mrb[35].mxu0 }
 0x216   : > { %v2747_v6 = vadd.f32 %v2746_v57, %v2745_v56  ;;  %v1902_v3 = vadd.f32 %v2744_v59, %v3710_v0  ;;  %v2256_v61 = vadd.f32 %v2255_v26, %v2254_v21  ;;  %v2155_v53 = vadd.f32 %v2154_v62, %v2153_v44 }
 0x218   : > { %v2063_v10 = vadd.f32 %v2062_v35, %v1902_v3  ;;  %v1905_v11 = vadd.f32 %v2747_v6, %v3710_v0  ;;  %v2258_v4 = vadd.f32 %v2257_v40, %v2256_v61  ;;  %v1958_v6 = vadd.f32 %v3701_v20, %v3710_v0 }
 0x219   : > { %v3811_v63 = vpop.f32.mrb[36].mxu1  ;;  %v1950_v40 = vadd.f32 %v3693_v42, %v3710_v0 }
 0x21a   : > { %v2156_v36 = vsel %vm503_vm0, %v2063_v10, 0.0  ;;  %v2212_v14 = vmul.f32 %v2063_v10, %v2063_v10  ;;  %v2662_v15 = vpack.c.bf16 %v2063_v10, %v2063_v10  ;;  %v2066_v32 = vadd.f32 %v2065_v16, %v1905_v11  ;;  %v3813_v39 = vpop.f32.mrb[37].mxu1 }
 0x21b   : > { %v2157_v43 = vadd.f32 %v2156_v36, %v2155_v53  ;;  %v3819_v22 = vpop.f32.mrb[38].mxu1 }
 0x21c   : > { %v2259_v18 = vsel %vm503_vm0, %v2212_v14, 0.0  ;;  %2443 = vst.msk [vmem:[%s3721_s13 + $0x40] sm:$0xf] %vm2426_vm7, %v2662_v15  ;;  %v2158_v17 = vsel %vm503_vm0, %v2066_v32, 0.0  ;;  %v2213_v23 = vmul.f32 %v2066_v32, %v2066_v32  ;;  %v2663_v7 = vpack.c.bf16 %v2066_v32, %v2066_v32  ;;  %v3821_v12 = vpop.f32.mrb[39].mxu1 }
 0x21d   : > { %v2260_v30 = vadd.f32 %v2259_v18, %v2258_v4  ;;  %v2159_v2 = vadd.f32 %v2158_v17, %v2157_v43 }
 0x21e   : > { %v2261_v60 = vsel %vm503_vm0, %v2213_v23, 0.0  ;;  %2444 = vst.msk [vmem:[%s3721_s13 + $0x44] sm:$0xf] %vm2426_vm7, %v2663_v7  ;;  %v2748_v33 = vpop.f32.mrb[36].mxu0 }
 0x21f   : > { %v2262_v27 = vadd.f32 %v2261_v60, %v2260_v30  ;;  %v2749_v24 = vpop.f32.mrb[37].mxu0 }
 0x220   : > { %v2750_v28 = vadd.f32 %v2749_v24, %v2748_v33  ;;  %v2751_v31 = vpop.f32.mrb[38].mxu0  ;;  %v1953_v33 = vadd.f32 %v3695_v47, %v3710_v0 }
 0x221   : > { %v2752_v51 = vpop.f32.mrb[39].mxu0  ;;  %v2838_v9 = vpop.f32.mrb[40].mxu1 }
 0x222   : > { %v1910_v37 = vadd.f32 %v2750_v28, %v3710_v0  ;;  %v2753_v29 = vadd.f32 %v2752_v51, %v2751_v31  ;;  %v3831_v1 = vadd.f32 %v2838_v9, %v1942_v52  ;;  %v2094_v41 = vpop.f32.mrb[41].mxu1 }
 0x223   : > { %v3836_v34 = vadd.f32 %v2094_v41, %v1934_v46  ;;  %v2839_v49 = vpop.f32.mrb[42].mxu1 }
 0x224   : > { %v2071_v19 = vadd.f32 %v2830_v5, %v1910_v37  ;;  %v1913_v45 = vadd.f32 %v2753_v29, %v3710_v0  ;;  %v2672_v35 = vpack.c.bf16 %v3831_v1, %v3831_v1  ;;  %v3840_v48 = vadd.f32 %v2839_v49, %v1945_v55  ;;  %v2097_v25 = vpop.f32.mrb[43].mxu1 }
 0x225   : > { %v1937_v5 = vadd.f32 %v3681_v8, %v3710_v0 }
 0x226   : > { %v2160_v58 = vsel %vm503_vm0, %v2071_v19, 0.0  ;;  %v2214_v54 = vmul.f32 %v2071_v19, %v2071_v19  ;;  %v2664_v59 = vpack.c.bf16 %v2071_v19, %v2071_v19  ;;  %v2074_v56 = vadd.f32 %v2831_v13, %v1913_v45  ;;  %2453 = vst.msk [vmem:[%s3721_s13 + $0x68] sm:$0xf] %vm2426_vm7, %v2672_v35 }
 0x227   : > { %v2161_v38 = vadd.f32 %v2160_v58, %v2159_v2  ;;  %v2670_v13 = vpack.c.bf16 %v3836_v34, %v3836_v34  ;;  %v2673_v3 = vpack.c.bf16 %v3840_v48, %v3840_v48  ;;  %v3864_v11 = vadd.f32 %v2097_v25, %v1937_v5 }
 0x228   : > { %v2263_v44 = vsel %vm503_vm0, %v2214_v54, 0.0  ;;  %2445 = vst.msk [vmem:[%s3721_s13 + $0x48] sm:$0xf] %vm2426_vm7, %v2664_v59  ;;  %v2162_v21 = vsel %vm503_vm0, %v2074_v56, 0.0  ;;  %v2215_v57 = vmul.f32 %v2074_v56, %v2074_v56  ;;  %v2665_v16 = vpack.c.bf16 %v2074_v56, %v2074_v56 }
 0x229   : > { %v2264_v26 = vadd.f32 %v2263_v44, %v2262_v27  ;;  %v2163_v62 = vadd.f32 %v2162_v21, %v2161_v38  ;;  %v2842_v53 = vpop.f32.mrb[44].mxu1  ;;  %2451 = vst.msk [vmem:[%s3721_s13 + $0x60] sm:$0xf] %vm2426_vm7, %v2670_v13  ;;  %2454 = vst.msk [vmem:[%s3721_s13 + $0x6c] sm:$0xf] %vm2426_vm7, %v2673_v3  ;;  %v2671_v42 = vpack.c.bf16 %v3864_v11, %v3864_v11 }
 0x22a   : > { %v2265_v8 = vsel %vm503_vm0, %v2215_v57, 0.0  ;;  %2446 = vst.msk [vmem:[%s3721_s13 + $0x4c] sm:$0xf] %vm2426_vm7, %v2665_v16  ;;  %v2754_v61 = vpop.f32.mrb[40].mxu0  ;;  %v3866_v20 = vadd.f32 %v2842_v53, %v1958_v6  ;;  %v2110_v36 = vpop.f32.mrb[45].mxu1  ;;  %v1961_v2 = vadd.f32 %v3703_v50, %v3710_v0  ;;  %v2172_v53 = vsel %vm503_vm0, %v3836_v34, 0.0 }
 0x22b   : > { %v2266_v10 = vadd.f32 %v2265_v8, %v2264_v26  ;;  %v2755_v4 = vpop.f32.mrb[41].mxu0  ;;  %v3870_v32 = vadd.f32 %v2110_v36, %v1950_v40  ;;  %v2843_v43 = vpop.f32.mrb[46].mxu1  ;;  %2452 = vst.msk [vmem:[%s3721_s13 + $0x64] sm:$0xf] %vm2426_vm7, %v2671_v42  ;;  %v2222_v36 = vmul.f32 %v3831_v1, %v3831_v1 }
 0x22c   : > { %v2756_v14 = vadd.f32 %v2755_v4, %v2754_v61  ;;  %v2757_v15 = vpop.f32.mrb[42].mxu0  ;;  %v2113_v17 = vpop.f32.mrb[47].mxu1  ;;  %v2676_v30 = vpack.c.bf16 %v3866_v20, %v3866_v20  ;;  %v3889_v28 = vadd.f32 %v2843_v43, %v1961_v2  ;;  %v2178_v2 = vsel %vm503_vm0, %v3840_v48, 0.0 }
 0x22d   : > { %v2758_v18 = vpop.f32.mrb[43].mxu0  ;;  %v2674_v60 = vpack.c.bf16 %v3870_v32, %v3870_v32  ;;  %v3893_v50 = vadd.f32 %v2113_v17, %v1953_v33 }
 0x22e   : > { %v1918_v23 = vadd.f32 %v2756_v14, %v3710_v0  ;;  %v2759_v7 = vadd.f32 %v2758_v18, %v2757_v15  ;;  %2457 = vst.msk [vmem:[%s3721_s13 + $0x78] sm:$0xf] %vm2426_vm7, %v2676_v30  ;;  %v2174_v15 = vsel %vm503_vm0, %v3864_v11, 0.0  ;;  %v2223_v18 = vmul.f32 %v3840_v48, %v3840_v48 }
 0x22f   : > { %2455 = vst.msk [vmem:[%s3721_s13 + $0x70] sm:$0xf] %vm2426_vm7, %v2674_v60  ;;  %v2279_v30 = vsel %vm503_vm0, %v2222_v36, 0.0 }
 0x230   : > { %v2079_v27 = vadd.f32 %v3813_v39, %v1918_v23  ;;  %v1921_v24 = vadd.f32 %v2759_v7, %v3710_v0  ;;  %v2677_v39 = vpack.c.bf16 %v3889_v28, %v3889_v28 }
 0x232   : > { %v2164_v31 = vsel %vm503_vm0, %v2079_v27, 0.0  ;;  %v2216_v51 = vmul.f32 %v2079_v27, %v2079_v27  ;;  %v2666_v52 = vpack.c.bf16 %v2079_v27, %v2079_v27  ;;  %v2082_v47 = vadd.f32 %v3821_v12, %v1921_v24  ;;  %2458 = vst.msk [vmem:[%s3721_s13 + $0x7c] sm:$0xf] %vm2426_vm7, %v2677_v39 }
 0x233   : > { %v2165_v37 = vadd.f32 %v2164_v31, %v2163_v62  ;;  %v2675_v12 = vpack.c.bf16 %v3893_v50, %v3893_v50  ;;  %v2220_v62 = vmul.f32 %v3836_v34, %v3836_v34  ;;  %v2176_v34 = vsel %vm503_vm0, %v3831_v1, 0.0 }
 0x234   : > { %v2267_v29 = vsel %vm503_vm0, %v2216_v51, 0.0  ;;  %2447 = vst.msk [vmem:[%s3721_s13 + $0x50] sm:$0xf] %vm2426_vm7, %v2666_v52  ;;  %v2166_v9 = vsel %vm503_vm0, %v2082_v47, 0.0  ;;  %v2217_v46 = vmul.f32 %v2082_v47, %v2082_v47  ;;  %v2667_v41 = vpack.c.bf16 %v2082_v47, %v2082_v47 }
 0x235   : > { %v2268_v55 = vadd.f32 %v2267_v29, %v2266_v10  ;;  %v2167_v19 = vadd.f32 %v2166_v9, %v2165_v37  ;;  %2456 = vst.msk [vmem:[%s3721_s13 + $0x74] sm:$0xf] %vm2426_vm7, %v2675_v12  ;;  %v2275_v14 = vsel %vm503_vm0, %v2220_v62, 0.0  ;;  %v2281_v27 = vsel %vm503_vm0, %v2223_v18, 0.0 }
 0x236   : > { %v2269_v45 = vsel %vm503_vm0, %v2217_v46, 0.0  ;;  %2448 = vst.msk [vmem:[%s3721_s13 + $0x54] sm:$0xf] %vm2426_vm7, %v2667_v41  ;;  %v2760_v49 = vpop.f32.mrb[44].mxu0  ;;  %v2180_v1 = vsel %vm503_vm0, %v3870_v32, 0.0  ;;  %v2225_v24 = vmul.f32 %v3893_v50, %v3893_v50  ;;  %v2226_v52 = vmul.f32 %v3866_v20, %v3866_v20 }
 0x237   : > { %v2270_v35 = vadd.f32 %v2269_v45, %v2268_v55  ;;  %v2761_v25 = vpop.f32.mrb[45].mxu0  ;;  %v2182_v47 = vsel %vm503_vm0, %v3893_v50, 0.0  ;;  %v2184_v29 = vsel %vm503_vm0, %v3866_v20, 0.0 }
 0x238   : > { %v2762_v58 = vadd.f32 %v2761_v25, %v2760_v49  ;;  %v2763_v54 = vpop.f32.mrb[46].mxu0  ;;  %v2285_v9 = vsel %vm503_vm0, %v2225_v24, 0.0  ;;  %v2287_v55 = vsel %vm503_vm0, %v2226_v52, 0.0 }
 0x239   : > { %v2764_v59 = vpop.f32.mrb[47].mxu0 }
 0x23a   : > { %v1926_v56 = vadd.f32 %v2762_v58, %v3710_v0  ;;  %v2765_v38 = vadd.f32 %v2764_v59, %v2763_v54 }
 0x23c   : > { %v2087_v5 = vadd.f32 %v3811_v63, %v1926_v56  ;;  %v1929_v44 = vadd.f32 %v2765_v38, %v3710_v0 }
 0x23e   : > { %v2168_v21 = vsel %vm503_vm0, %v2087_v5, 0.0  ;;  %v2218_v57 = vmul.f32 %v2087_v5, %v2087_v5  ;;  %v2668_v16 = vpack.c.bf16 %v2087_v5, %v2087_v5  ;;  %v2090_v26 = vadd.f32 %v3819_v22, %v1929_v44 }
 0x23f   : > { %v2169_v13 = vadd.f32 %v2168_v21, %v2167_v19  ;;  %v2221_v22 = vmul.f32 %v3864_v11, %v3864_v11  ;;  %v2224_v11 = vmul.f32 %v3870_v32, %v3870_v32  ;;  %v2227_v32 = vmul.f32 %v3889_v28, %v3889_v28 }
 0x240   : > { %v2271_v6 = vsel %vm503_vm0, %v2218_v57, 0.0  ;;  %2449 = vst.msk [vmem:[%s3721_s13 + $0x58] sm:$0xf] %vm2426_vm7, %v2668_v16  ;;  %v2170_v8 = vsel %vm503_vm0, %v2090_v26, 0.0  ;;  %v2219_v63 = vmul.f32 %v2090_v26, %v2090_v26  ;;  %v2669_v3 = vpack.c.bf16 %v2090_v26, %v2090_v26 }
 0x241   : > { %v2272_v0 = vadd.f32 %v2271_v6, %v2270_v35  ;;  %v2171_v61 = vadd.f32 %v2170_v8, %v2169_v13  ;;  %v2277_v17 = vsel %vm503_vm0, %v2221_v22, 0.0  ;;  %v2283_v48 = vsel %vm503_vm0, %v2224_v11, 0.0 }
 0x242   : > { %v2273_v40 = vsel %vm503_vm0, %v2219_v63, 0.0  ;;  %2450 = vst.msk [vmem:[%s3721_s13 + $0x5c] sm:$0xf] %vm2426_vm7, %v2669_v3  ;;  %v2186_v19 = vsel %vm503_vm0, %v3889_v28, 0.0  ;;  %v2289_v12 = vsel %vm503_vm0, %v2227_v32, 0.0 }
 0x243   : > { %v2173_v10 = vadd.f32 %v2172_v53, %v2171_v61  ;;  %v2274_v4 = vadd.f32 %v2273_v40, %v2272_v0 }
 0x245   : > { %v2175_v43 = vadd.f32 %v2174_v15, %v2173_v10  ;;  %v2276_v42 = vadd.f32 %v2275_v14, %v2274_v4 }
 0x247   : > { %v2177_v23 = vadd.f32 %v2176_v34, %v2175_v43  ;;  %v2278_v7 = vadd.f32 %v2277_v17, %v2276_v42 }
 0x249   : > { %v2179_v60 = vadd.f32 %v2178_v2, %v2177_v23  ;;  %v2280_v33 = vadd.f32 %v2279_v30, %v2278_v7 }
 0x24b   : > { %v2181_v31 = vadd.f32 %v2180_v1, %v2179_v60  ;;  %v2282_v51 = vadd.f32 %v2281_v27, %v2280_v33 }
 0x24d   : > { %v2183_v37 = vadd.f32 %v2182_v47, %v2181_v31  ;;  %v2284_v39 = vadd.f32 %v2283_v48, %v2282_v51 }
 0x24f   : > { %v2185_v46 = vadd.f32 %v2184_v29, %v2183_v37  ;;  %v2286_v41 = vadd.f32 %v2285_v9, %v2284_v39 }
 0x251   : > { %v2187_v45 = vadd.f32 %v2186_v19, %v2185_v46  ;;  %v2288_v50 = vadd.f32 %v2287_v55, %v2286_v41 }
 0x253   : > { %v2188_v49 = vrot.slane %v2187_v45, 4  ;;  %v2290_v20 = vadd.f32 %v2289_v12, %v2288_v50 }
 0x255   : > { %v2189_v35 = vadd.f32 %v2188_v49, %v2187_v45  ;;  %v2291_v25 = vrot.slane %v2290_v20, 4 }
 0x257   : > { %v2190_v58 = vrot.slane %v2189_v35, 2  ;;  %v2292_v54 = vadd.f32 %v2291_v25, %v2290_v20 }
 0x259   : > { %v2191_v59 = vadd.f32 %v2190_v58, %v2189_v35  ;;  %v2293_v56 = vrot.slane %v2292_v54, 2 }
 0x25b   : > { %v2192_v38 = vrot.slane %v2191_v59, 1  ;;  %v2294_v5 = vadd.f32 %v2293_v56, %v2292_v54 }
 0x25d   : > { %v2193_v28 = vadd.f32 %v2192_v38, %v2191_v59  ;;  %v2295_v44 = vrot.slane %v2294_v5, 1 }
 0x25f   : > { %2195 = vst.msk [vmem:[%s292_s16] sm:$0x1] %vm2194_vm8, %v2193_v28  ;;  %v2296_v21 = vadd.f32 %v2295_v44, %v2294_v5 }
 0x261   : > { %2297 = vst.msk [vmem:[%s295_s20] sm:$0x1] %vm2194_vm8, %v2296_v21 }
 0x262 PF: > { %s18_s24 = sadd.s32 1, %s2896_s24  }
 0x263   : > { %p15_p4 = scmp.ge.s32.totalorder %s18_s24, 4  }
 0x265   :  { %17 = sbr.rel (!%p15_p4) target bundleno = 1 (0x1), region = 96 }

// kernel: discriminator_block2d_forward.5
= control target key start
LH: loop header
LB: loop body
LE: loop exit
PB: predicated region body
PF: predicated region fallthrough
CT: control target
= control target key end

     0   :  { %11 = vsyncpa [#allocation5], 0  ;;  %s3776_s0 = inlined_call_operand.vmem [shape: bf16[2,16,16,32], index: 0, kind: input, shape index: {}]   ;;  %s3777_s1 = inlined_call_operand.vmem [shape: f32[1,32], index: 1, kind: input, shape index: {}]   ;;  %s3778_s2 = inlined_call_operand.vmem [shape: f32[1,32], index: 2, kind: input, shape index: {}]   ;;  %s3779_s3 = inlined_call_operand.vmem [shape: bf16[288,32], index: 3, kind: input, shape index: {}]   ;;  %s3780_s4 = inlined_call_operand.vmem [shape: f32[1,32], index: 4, kind: input, shape index: {}]   ;;  %s3781_s5 = inlined_call_operand.vmem [shape: f32[2,16,16,32], index: 5, kind: input, shape index: {}]   ;;  %s3782_s6 = inlined_call_operand.hbm [shape: f32[2,16,16,32], index: 6, kind: output, shape index: {}]  }
   0x1   :  { %13 = vsyncpa [#allocation5 + $0x1], 0  ;;  %s2799_s21 = smov 0   ;;  %s2801_s22 = smov 0  }
   0x2   :  { %s2803_s23 = smov 0   ;;  %s2805_s24 = smov 0  }
   0x3 LB: > { %s2820_s25 = sadd.s32 4294967295, %s2755_s24   ;;  %s2315_s26 = sadd.s32 4294967294, %s2755_s24   ;;  %s2755_s24 = sphi %s2805_s24, %s3788_s24   ;;  %s2751_s23 = sphi %s2803_s23, %s3787_s23   ;;  %s2747_s22 = sphi %s2801_s22, %s3786_s22   ;;  %s2743_s21 = sphi %s2799_s21, %s3785_s21  }
   0x4   : > { %s2824_s27 = sadd.s32 1, %s2755_s24   ;;  %s162_s28 = sadd.s32 1, %s2751_s23 }
   0x5   : > { %s159_s29 = ssub.s32 %s2755_s24, %s2824_s27  ;;  %p172_p0 = scmp.ne.s32.totalorder %s2751_s23, %s2747_s22 }
   0x6   : > { %p160_p1 = scmp.eq.s32.totalorder %s159_s29, 0  ;;  %p173_p2 = scmp.eq.s32.totalorder %s2820_s25, 1 }
   0x7   : > { %p178_p3 = scmp.ne.s32.totalorder %s2747_s22, %s2743_s21  ;;  %p179_p4 = scmp.eq.s32.totalorder %s2315_s26, 1 }
   0x8   : > { %s2835_s30 = scalar_select %p160_p1, %s2751_s23, %s162_s28  }
   0x9   : > { %p2837_p5 = por %p173_p2, %p172_p0  ;;  %p2841_p6 = por %p179_p4, %p178_p3 }
   0xa   : > { %p2318_p7 = scmp.ge.s32.totalorder %s2755_s24, 1  ;;  %p225_p8 = scmp.lt.s32.totalorder %s2755_s24, 3 }
   0xc   : > { %p226_p9 = pnand %p2318_p7, %p225_p8 }
   0xd   : > { %vm509_vm0 = vcmask (!%p226_p9), 261120   ;;  %vm512_vm1 = vcmask (!%p226_p9), 254976   ;;  %v2675_v0 = vld [vmem:[%s3779_s3 + $0x40] sm:$0xff] (!%p226_p9)   ;;  %v2757_v1 = vmov (!%p226_p9), 0.0   ;;  %p260_p10 = scmp.lt.s32.totalorder (!%p226_p9), %s2820_s25, 1  ;;  %v2677_v3 = vld [vmem:[%s3779_s3 + $0x48] sm:$0xff] (!%p226_p9)  }
   0xe   : > { %229 = sbr.rel (%p226_p9) target bundleno = 598 (0x256), region = 44  ;;  %510 = vst.msk [vmem:[#allocation2] sm:$0xff] (!%p226_p9), %vm509_vm0, %v2757_v1  ;;  %511 = vst.msk [vmem:[#allocation2 + $0x8] sm:$0xff] (!%p226_p9), %vm509_vm0, %v2757_v1  ;;  %2448 = vmatprep.subr.bf16.mxu0 (!%p226_p9), %v2675_v0  ;;  %2614 = vmatprep.subr.bf16.mxu1 (!%p226_p9), %v2675_v0  ;;  %v2676_v2 = vld [vmem:[%s3779_s3] sm:$0xff] (!%p226_p9)   ;;  %v2678_v5 = vld [vmem:[%s3779_s3 + $0x8] sm:$0xff] (!%p226_p9)   ;;  %s2758_s14 = smov (!%p226_p9), 32  }
   0xf   : > { %513 = vst.msk [vmem:[#allocation2 + $0x10] sm:$0x3] (!%p226_p9), %vm512_vm1, %v2757_v1  ;;  %516 = vst.msk [vmem:[#allocation2 + $0x28] sm:$0x3] (!%p226_p9), %vm512_vm1, %v2757_v1  ;;  %v2918_v4 = vld [vmem:[%s3777_s1] ss:$0 sm:$0xff] (!%p226_p9)  ;;  %2449 = vmatpush3.bf16.msra.mxu0 (!%p226_p9), %v2676_v2  ;;  %2622 = vmatpush3.bf16.msra.mxu1 (!%p226_p9), %v2676_v2 }
  0x10   : > { %514 = vst.msk [vmem:[#allocation2 + $0x18] sm:$0xff] (!%p226_p9), %vm509_vm0, %v2757_v1  ;;  %515 = vst.msk [vmem:[#allocation2 + $0x20] sm:$0xff] (!%p226_p9), %vm509_vm0, %v2757_v1  ;;  %v2679_v6 = vld [vmem:[%s3779_s3 + $0x50] sm:$0xff] (!%p226_p9)   ;;  %2450 = vmatprep.subr.bf16.mxu0 (!%p226_p9), %v2677_v3  ;;  %2615 = vmatprep.subr.bf16.mxu1 (!%p226_p9), %v2677_v3  ;;  %v2937_v19 = vld [vmem:[%s3778_s2] ss:$0 sm:$0xff] (!%p226_p9)  ;;  %s2759_s15 = smov (!%p226_p9), 64  }
  0x11   : > { %517 = vst.msk [vmem:[#allocation2 + $0x30] sm:$0xff] (!%p226_p9), %vm509_vm0, %v2757_v1  ;;  %518 = vst.msk [vmem:[#allocation2 + $0x38] sm:$0xff] (!%p226_p9), %vm509_vm0, %v2757_v1  ;;  %v2680_v40 = vld [vmem:[%s3779_s3 + $0x10] sm:$0xff] (!%p226_p9)   ;;  %v2681_v53 = vld [vmem:[%s3779_s3 + $0x58] sm:$0xff] (!%p226_p9)   ;;  %s2760_s19 = smov (!%p226_p9), 96   ;;  %s2368_s13 = sshll.u32 (!%p226_p9), %s2820_s25, 12 }
  0x12   : > { %519 = vst.msk [vmem:[#allocation2 + $0x40] sm:$0x3] (!%p226_p9), %vm512_vm1, %v2757_v1  ;;  %522 = vst.msk [vmem:[#allocation2 + $0x58] sm:$0x3] (!%p226_p9), %vm512_vm1, %v2757_v1  ;;  %v2682_v58 = vld [vmem:[%s3779_s3 + $0x18] sm:$0xff] (!%p226_p9)   ;;  %v2683_v2 = vld [vmem:[%s3779_s3 + $0x60] sm:$0xff] (!%p226_p9)   ;;  %s3725_s18 = scalar_lea.hbm (!%p226_p9), %s3782_s6, %s2368_s13 }
  0x13   : > { %520 = vst.msk [vmem:[#allocation2 + $0x48] sm:$0xff] (!%p226_p9), %vm509_vm0, %v2757_v1  ;;  %521 = vst.msk [vmem:[#allocation2 + $0x50] sm:$0xff] (!%p226_p9), %vm509_vm0, %v2757_v1  ;;  %2451 = vmatpush3.bf16.msra.mxu0 (!%p226_p9), %v2678_v5  ;;  %2623 = vmatpush3.bf16.msra.mxu1 (!%p226_p9), %v2678_v5 }
  0x14   : > { %523 = vst.msk [vmem:[#allocation2 + $0x60] sm:$0xff] (!%p226_p9), %vm509_vm0, %v2757_v1  ;;  %524 = vst.msk [vmem:[#allocation2 + $0x68] sm:$0xff] (!%p226_p9), %vm509_vm0, %v2757_v1  ;;  %2452 = vmatprep.subr.bf16.mxu0 (!%p226_p9), %v2679_v6  ;;  %2616 = vmatprep.subr.bf16.mxu1 (!%p226_p9), %v2679_v6 }
  0x15   : > { %525 = vst.msk [vmem:[#allocation2 + $0x70] sm:$0x3] %vm512_vm1, %v2757_v1  ;;  %528 = vst.msk [vmem:[#allocation2 + $0x88] sm:$0x3] %vm512_vm1, %v2757_v1  ;;  %s2906_s11 = scalar_select %p260_p10, %s2820_s25, 1  ;;  %v662_v10 = vld [vmem:[#allocation2 + $0x1] sm:$0xff] }
  0x16   : > { %526 = vst.msk [vmem:[#allocation2 + $0x78] sm:$0xff] %vm509_vm0, %v2757_v1  ;;  %527 = vst.msk [vmem:[#allocation2 + $0x80] sm:$0xff] %vm509_vm0, %v2757_v1  ;;  %v663_v11 = vld [vmem:[#allocation2 + $0x9] sm:$0xff] }
  0x17   : > { %529 = vst.msk [vmem:[#allocation2 + $0x90] sm:$0xff] %vm509_vm0, %v2757_v1  ;;  %530 = vst.msk [vmem:[#allocation2 + $0x98] sm:$0xff] %vm509_vm0, %v2757_v1  ;;  %s2366_s16 = sshll.u32 %s2906_s11, 7  ;;  %v791_v12 = vld [vmem:[#allocation2 + $0x2] sm:$0xff]  ;;  %v694_v17 = vpack.c.bf16 %v663_v11, %v662_v10  ;;  %v792_v18 = vld [vmem:[#allocation2 + $0xa] sm:$0xff]  ;;  %2453 = vmatpush3.bf16.msra.mxu0 %v2680_v40  ;;  %2624 = vmatpush3.bf16.msra.mxu1 %v2680_v40 }
  0x18   : > { %531 = vst.msk [vmem:[#allocation2 + $0xa0] sm:$0x3] %vm512_vm1, %v2757_v1  ;;  %534 = vst.msk [vmem:[#allocation2 + $0xb8] sm:$0x3] %vm512_vm1, %v2757_v1  ;;  %s2929_s10 = scalar_lea.vmem %s3776_s0, %s2366_s16  ;;  %v823_v23 = vpack.c.bf16 %v792_v18, %v791_v12  ;;  %2454 = vmatprep.subr.bf16.mxu0 %v2681_v53  ;;  %2617 = vmatprep.subr.bf16.mxu1 %v2681_v53  ;;  %v2685_v12 = vld [vmem:[%s3779_s3 + $0x68] sm:$0xff]  }
  0x19   : > { %532 = vst.msk [vmem:[#allocation2 + $0xa8] sm:$0xff] %vm509_vm0, %v2757_v1  ;;  %533 = vst.msk [vmem:[#allocation2 + $0xb0] sm:$0xff] %vm509_vm0, %v2757_v1  ;;  %v2370_v7 = vld [vmem:[%s2929_s10] sm:$0xff]   ;;  %v2433_v8 = vld [vmem:[%s2929_s10 + $0x8] sm:$0xff]   ;;  %726 = vrot.lane.b32.xlu0 %v694_v17, %s2758_s14 }
  0x1a   : > { %535 = vst.msk [vmem:[#allocation2 + $0xc0] sm:$0xff] %vm509_vm0, %v2757_v1  ;;  %536 = vst.msk [vmem:[#allocation2 + $0xc8] sm:$0xff] %vm509_vm0, %v2757_v1  ;;  %v2444_v9 = vld [vmem:[%s2929_s10 + $0x60] sm:$0xff]   ;;  %v2371_v13 = vunpack.c.l.bf16 %v2370_v7  ;;  %v2372_v14 = vunpack.c.h.bf16 %v2370_v7  ;;  %v2375_v15 = vunpack.c.l.bf16 %v2433_v8  ;;  %v2376_v16 = vunpack.c.h.bf16 %v2433_v8  ;;  %v2443_v22 = vld [vmem:[%s2929_s10 + $0x58] sm:$0xff]   ;;  %855 = vrot.lane.b32.xlu1 %v823_v23, %s2759_s15 }
  0x1b   : > { %537 = vst.msk [vmem:[#allocation2 + $0xd0] sm:$0x3] %vm512_vm1, %v2757_v1  ;;  %540 = vst.msk [vmem:[#allocation2 + $0xe8] sm:$0x3] %vm512_vm1, %v2757_v1  ;;  %v2419_v20 = vunpack.c.l.bf16 %v2444_v9  ;;  %v2420_v21 = vunpack.c.h.bf16 %v2444_v9  ;;  %v2415_v30 = vunpack.c.l.bf16 %v2443_v22  ;;  %v2416_v34 = vunpack.c.h.bf16 %v2443_v22  ;;  %v2445_v39 = vld [vmem:[%s2929_s10 + $0x68] sm:$0xff]   ;;  %v2434_v43 = vld [vmem:[%s2929_s10 + $0x10] sm:$0xff]   ;;  %2455 = vmatpush3.bf16.msra.mxu0 %v2682_v58  ;;  %2625 = vmatpush3.bf16.msra.mxu1 %v2682_v58 }
  0x1c   : > { %538 = vst.msk [vmem:[#allocation2 + $0xd8] sm:$0xff] %vm509_vm0, %v2757_v1  ;;  %539 = vst.msk [vmem:[#allocation2 + $0xe0] sm:$0xff] %vm509_vm0, %v2757_v1  ;;  %v342_v24 = vmul.f32 %v2371_v13, %v2918_v4  ;;  %v343_v25 = vmul.f32 %v2372_v14, %v2918_v4  ;;  %v344_v26 = vmul.f32 %v2375_v15, %v2918_v4  ;;  %v2446_v52 = vld [vmem:[%s2929_s10 + $0x70] sm:$0xff]   ;;  %v2423_v56 = vunpack.c.l.bf16 %v2445_v39  ;;  %v2684_v8 = vld [vmem:[%s3779_s3 + $0x20] sm:$0xff]  }
  0x1d   : > { %541 = vst.msk [vmem:[#allocation2 + $0xf0] sm:$0xff] %vm509_vm0, %v2757_v1  ;;  %542 = vst.msk [vmem:[#allocation2 + $0xf8] sm:$0xff] %vm509_vm0, %v2757_v1  ;;  %v345_v27 = vmul.f32 %v2376_v16, %v2918_v4  ;;  %v366_v28 = vmul.f32 %v2419_v20, %v2918_v4  ;;  %v367_v29 = vmul.f32 %v2420_v21, %v2918_v4  ;;  %v2424_v57 = vunpack.c.h.bf16 %v2445_v39 }
  0x1e   : > { %543 = vst.msk [vmem:[#allocation2 + $0x100] sm:$0x3] %vm512_vm1, %v2757_v1  ;;  %546 = vst.msk [vmem:[#allocation2 + $0x118] sm:$0x3] %vm512_vm1, %v2757_v1  ;;  %v381_v31 = vadd.f32 %v2937_v19, %v342_v24  ;;  %v382_v32 = vadd.f32 %v2937_v19, %v343_v25  ;;  %v383_v33 = vadd.f32 %v2937_v19, %v344_v26  ;;  %v2379_v61 = vunpack.c.l.bf16 %v2434_v43 }
  0x1f   : > { %544 = vst.msk [vmem:[#allocation2 + $0x108] sm:$0xff] %vm509_vm0, %v2757_v1  ;;  %545 = vst.msk [vmem:[#allocation2 + $0x110] sm:$0xff] %vm509_vm0, %v2757_v1  ;;  %v384_v35 = vadd.f32 %v2937_v19, %v345_v27  ;;  %v405_v36 = vadd.f32 %v2937_v19, %v366_v28  ;;  %v406_v37 = vadd.f32 %v2937_v19, %v367_v29  ;;  %v2380_v62 = vunpack.c.h.bf16 %v2434_v43 }
  0x20   : > { %547 = vst.msk [vmem:[#allocation2 + $0x120] sm:$0xff] %vm509_vm0, %v2757_v1  ;;  %548 = vst.msk [vmem:[#allocation2 + $0x128] sm:$0xff] %vm509_vm0, %v2757_v1  ;;  %v364_v38 = vmul.f32 %v2415_v30, %v2918_v4  ;;  %vm413_vm2 = vcmp.ge.f32.partialorder %v381_v31, 0.0  ;;  %vm414_vm3 = vcmp.ge.f32.partialorder %v382_v32, 0.0  ;;  %v445_v41 = vmul.f32 0.2, %v381_v31  ;;  %2456 = vmatprep.subr.bf16.mxu0 %v2683_v2  ;;  %2618 = vmatprep.subr.bf16.mxu1 %v2683_v2 }
  0x21   : > { %549 = vst.msk [vmem:[#allocation2 + $0x130] sm:$0x3] %vm512_vm1, %v2757_v1  ;;  %552 = vst.msk [vmem:[#allocation2 + $0x148] sm:$0x3] %vm512_vm1, %v2757_v1  ;;  %v446_v42 = vmul.f32 0.2, %v382_v32  ;;  %v365_v54 = vmul.f32 %v2416_v34, %v2918_v4  ;;  %v369_v3 = vmul.f32 %v2424_v57, %v2918_v4  ;;  %v346_v5 = vmul.f32 %v2379_v61, %v2918_v4 }
  0x22   : > { %550 = vst.msk [vmem:[#allocation2 + $0x138] sm:$0xff] %vm509_vm0, %v2757_v1  ;;  %551 = vst.msk [vmem:[#allocation2 + $0x140] sm:$0xff] %vm509_vm0, %v2757_v1  ;;  %vm415_vm4 = vcmp.ge.f32.partialorder %v383_v33, 0.0  ;;  %vm416_vm5 = vcmp.ge.f32.partialorder %v384_v35, 0.0  ;;  %v447_v44 = vmul.f32 0.2, %v383_v33  ;;  %v477_v46 = vsel %vm413_vm2, %v381_v31, %v445_v41  ;;  %2457 = vmatpush3.bf16.msra.mxu0 %v2684_v8  ;;  %2626 = vmatpush3.bf16.msra.mxu1 %v2684_v8 }
  0x23   : > { %553 = vst.msk [vmem:[#allocation2 + $0x150] sm:$0xff] %vm509_vm0, %v2757_v1  ;;  %554 = vst.msk [vmem:[#allocation2 + $0x158] sm:$0xff] %vm509_vm0, %v2757_v1  ;;  %v448_v45 = vmul.f32 0.2, %v384_v35  ;;  %v478_v47 = vsel %vm414_vm3, %v382_v32, %v446_v42  ;;  %vm437_vm6 = vcmp.ge.f32.partialorder %v405_v36, 0.0  ;;  %vm438_vm7 = vcmp.ge.f32.partialorder %v406_v37, 0.0  ;;  %2458 = vmatprep.subr.bf16.mxu0 %v2685_v12  ;;  %2619 = vmatprep.subr.bf16.mxu1 %v2685_v12 }
  0x24   : > { %555 = vst.msk [vmem:[#allocation2 + $0x160] sm:$0x3] %vm512_vm1, %v2757_v1  ;;  %558 = vst.msk [vmem:[#allocation2 + $0x178] sm:$0x3] %vm512_vm1, %v2757_v1  ;;  %v479_v48 = vsel %vm415_vm4, %v383_v33, %v447_v44  ;;  %v469_v50 = vmul.f32 0.2, %v405_v36  ;;  %v403_v55 = vadd.f32 %v2937_v19, %v364_v38  ;;  %v404_v63 = vadd.f32 %v2937_v19, %v365_v54 }
  0x25   : > { %556 = vst.msk [vmem:[#allocation2 + $0x168] sm:$0xff] %vm509_vm0, %v2757_v1  ;;  %557 = vst.msk [vmem:[#allocation2 + $0x170] sm:$0xff] %vm509_vm0, %v2757_v1  ;;  %v480_v49 = vsel %vm416_vm5, %v384_v35, %v448_v45  ;;  %v470_v51 = vmul.f32 0.2, %v406_v37  ;;  %v347_v6 = vmul.f32 %v2380_v62, %v2918_v4  ;;  %v2427_v7 = vunpack.c.l.bf16 %v2446_v52  ;;  %v2435_v34 = vld [vmem:[%s2929_s10 + $0x18] sm:$0xff]   ;;  %v2686_v57 = vld [vmem:[%s3779_s3 + $0x28] sm:$0xff]  }
  0x26   : > { %559 = vst.msk [vmem:[#allocation2 + $0x180] sm:$0xff] %vm509_vm0, %v2757_v1  ;;  %560 = vst.msk [vmem:[#allocation2 + $0x188] sm:$0xff] %vm509_vm0, %v2757_v1  ;;  %v501_v59 = vsel %vm437_vm6, %v405_v36, %v469_v50  ;;  %vm435_vm8 = vcmp.ge.f32.partialorder %v403_v55, 0.0  ;;  %v467_v0 = vmul.f32 0.2, %v403_v55  ;;  %vm436_vm9 = vcmp.ge.f32.partialorder %v404_v63, 0.0  ;;  %2459 = vmatpush3.bf16.msra.mxu0 %v2686_v57  ;;  %2627 = vmatpush3.bf16.msra.mxu1 %v2686_v57 }
  0x27   : > { %561 = vst.msk [vmem:[#allocation2 + $0x190] sm:$0x3] %vm512_vm1, %v2757_v1  ;;  %564 = vst.msk [vmem:[#allocation2 + $0x1a8] sm:$0x3] %vm512_vm1, %v2757_v1  ;;  %v502_v60 = vsel %vm438_vm7, %v406_v37, %v470_v51  ;;  %v468_v9 = vmul.f32 0.2, %v404_v63  ;;  %v408_v13 = vadd.f32 %v2937_v19, %v369_v3  ;;  %v385_v14 = vadd.f32 %v2937_v19, %v346_v5 }
  0x28   : > { %562 = vst.msk [vmem:[#allocation2 + $0x198] sm:$0xff] %vm509_vm0, %v2757_v1  ;;  %563 = vst.msk [vmem:[#allocation2 + $0x1a0] sm:$0xff] %vm509_vm0, %v2757_v1  ;;  %v368_v1 = vmul.f32 %v2423_v56, %v2918_v4  ;;  %v499_v10 = vsel %vm435_vm8, %v403_v55, %v467_v0  ;;  %v386_v15 = vadd.f32 %v2937_v19, %v347_v6  ;;  %v2428_v16 = vunpack.c.h.bf16 %v2446_v52  ;;  %v2447_v45 = vld [vmem:[%s2929_s10 + $0x78] sm:$0xff]   ;;  %v2687_v61 = vld [vmem:[%s3779_s3 + $0x70] sm:$0xff]  }
  0x29   : > { %566 = vst.msk [vmem:[#allocation2 + $0x19] sm:$0xff] %vm509_vm0, %v477_v46  ;;  %567 = vst.msk [vmem:[#allocation2 + $0x21] sm:$0xff] %vm509_vm0, %v478_v47  ;;  %v500_v21 = vsel %vm436_vm9, %v404_v63, %v468_v9  ;;  %v370_v23 = vmul.f32 %v2427_v7, %v2918_v4  ;;  %vm440_vm11 = vcmp.ge.f32.partialorder %v408_v13, 0.0  ;;  %v472_v28 = vmul.f32 0.2, %v408_v13  ;;  %v3017_v46 = vld [vmem:[%s2929_s10 + $0x20] sm:$0xff]   ;;  %2460 = vmatprep.subr.bf16.mxu0 %v2687_v61 }
  0x2a   : > { %568 = vst.msk [vmem:[#allocation2 + $0x31] sm:$0xff] %vm509_vm0, %v479_v48  ;;  %569 = vst.msk [vmem:[#allocation2 + $0x39] sm:$0xff] %vm509_vm0, %v480_v49  ;;  %v407_v11 = vadd.f32 %v2937_v19, %v368_v1  ;;  %v371_v29 = vmul.f32 %v2428_v16, %v2918_v4  ;;  %vm417_vm12 = vcmp.ge.f32.partialorder %v385_v14, 0.0  ;;  %vm418_vm13 = vcmp.ge.f32.partialorder %v386_v15, 0.0  ;;  %2620 = vmatprep.subr.bf16.mxu1 %v2687_v61 }
  0x2b   : > { %590 = vst.msk [vmem:[#allocation2 + $0x139] sm:$0xff] %vm509_vm0, %v501_v59  ;;  %591 = vst.msk [vmem:[#allocation2 + $0x141] sm:$0xff] %vm509_vm0, %v502_v60  ;;  %v504_v38 = vsel %vm440_vm11, %v408_v13, %v472_v28  ;;  %v449_v39 = vmul.f32 0.2, %v385_v14  ;;  %v450_v42 = vmul.f32 0.2, %v386_v15  ;;  %v409_v43 = vadd.f32 %v2937_v19, %v370_v23 }
  0x2c   : > { %588 = vst.msk [vmem:[#allocation2 + $0x121] sm:$0xff] %vm509_vm0, %v499_v10  ;;  %vm439_vm10 = vcmp.ge.f32.partialorder %v407_v11, 0.0  ;;  %v471_v22 = vmul.f32 0.2, %v407_v11  ;;  %589 = vst.msk [vmem:[#allocation2 + $0x129] sm:$0xff] %vm509_vm0, %v500_v21  ;;  %v410_v44 = vadd.f32 %v2937_v19, %v371_v29  ;;  %v2383_v52 = vunpack.c.l.bf16 %v2435_v34  ;;  %v2688_v23 = vld [vmem:[%s3779_s3 + $0x30] sm:$0xff]  }
  0x2d   : > { %593 = vst.msk [vmem:[#allocation2 + $0x159] sm:$0xff] %vm509_vm0, %v504_v38  ;;  %v481_v49 = vsel %vm417_vm12, %v385_v14, %v449_v39  ;;  %v482_v55 = vsel %vm418_vm13, %v386_v15, %v450_v42  ;;  %vm441_vm14 = vcmp.ge.f32.partialorder %v409_v43, 0.0  ;;  %v473_v58 = vmul.f32 0.2, %v409_v43  ;;  %2461 = vmatpush3.bf16.msra.mxu0 %v2688_v23  ;;  %2628 = vmatpush3.bf16.msra.mxu1 %v2688_v23 }
  0x2e   : > { %v503_v33 = vsel %vm439_vm10, %v407_v11, %v471_v22  ;;  %570 = vst.msk [vmem:[#allocation2 + $0x49] sm:$0xff] %vm509_vm0, %v481_v49  ;;  %571 = vst.msk [vmem:[#allocation2 + $0x51] sm:$0xff] %vm509_vm0, %v482_v55  ;;  %vm442_vm15 = vcmp.ge.f32.partialorder %v410_v44, 0.0  ;;  %v474_v59 = vmul.f32 0.2, %v410_v44  ;;  %v2384_v60 = vunpack.c.h.bf16 %v2435_v34  ;;  %v598_v55 = vld [vmem:[#allocation2] sm:$0xff] }
  0x2f   : > { %592 = vst.msk [vmem:[#allocation2 + $0x151] sm:$0xff] %vm509_vm0, %v503_v33  ;;  %v348_v0 = vmul.f32 %v2383_v52, %v2918_v4  ;;  %v2431_v1 = vunpack.c.l.bf16 %v2447_v45  ;;  %v2432_v2 = vunpack.c.h.bf16 %v2447_v45  ;;  %v2387_v3 = vunpack.c.l.bf16 %v3017_v46 }
  0x30   : > { %v1113_v17 = vld [vmem:[#allocation2 + $0x1a] sm:$0xff]  ;;  %v1114_v18 = vld [vmem:[#allocation2 + $0x22] sm:$0xff]  ;;  %v505_v7 = vsel %vm441_vm14, %v409_v43, %v473_v58  ;;  %v506_v8 = vsel %vm442_vm15, %v410_v44, %v474_v59  ;;  %v349_v10 = vmul.f32 %v2384_v60, %v2918_v4  ;;  %v2388_v15 = vunpack.c.h.bf16 %v3017_v46 }
  0x31   : > { %v920_v20 = vld [vmem:[#allocation2 + $0x18] sm:$0xff]  ;;  %v2997_v24 = vpack.c.bf16 %v1114_v18, %v1113_v17  ;;  %v1242_v25 = vld [vmem:[#allocation2 + $0x30] sm:$0xff]  ;;  %v921_v32 = vld [vmem:[#allocation2 + $0x20] sm:$0xff]  ;;  %594 = vst.msk [vmem:[#allocation2 + $0x169] sm:$0xff] %vm509_vm0, %v505_v7  ;;  %v387_v11 = vadd.f32 %v2937_v19, %v348_v0  ;;  %v372_v12 = vmul.f32 %v2431_v1, %v2918_v4  ;;  %v373_v13 = vmul.f32 %v2432_v2, %v2918_v4 }
  0x32   : > { %v1243_v26 = vld [vmem:[#allocation2 + $0x38] sm:$0xff]  ;;  %v1138_v37 = vld [vmem:[#allocation2 + $0x142] sm:$0xff]  ;;  %v952_v40 = vpack.c.bf16 %v921_v32, %v920_v20  ;;  %595 = vst.msk [vmem:[#allocation2 + $0x171] sm:$0xff] %vm509_vm0, %v506_v8  ;;  %v350_v16 = vmul.f32 %v2387_v3, %v2918_v4  ;;  %v388_v22 = vadd.f32 %v2937_v19, %v349_v10  ;;  %v351_v33 = vmul.f32 %v2388_v15, %v2918_v4 }
  0x33   : > { %v1370_v27 = vld [vmem:[#allocation2 + $0x31] sm:$0xff]  ;;  %v3001_v30 = vpack.c.bf16 %v1243_v26, %v1242_v25  ;;  %v1371_v31 = vld [vmem:[#allocation2 + $0x39] sm:$0xff]  ;;  %1177 = vrot.lane.b32.xlu0 %v2997_v24, %s2758_s14  ;;  %v665_v48 = vld [vmem:[#allocation2 + $0x21] sm:$0xff]  ;;  %vm419_vm1 = vcmp.ge.f32.partialorder %v387_v11, 0.0  ;;  %v411_v28 = vadd.f32 %v2937_v19, %v372_v12  ;;  %v412_v29 = vadd.f32 %v2937_v19, %v373_v13 }
  0x34   : > { %v3007_v35 = vpack.c.bf16 %v1371_v31, %v1370_v27  ;;  %v1137_v36 = vld [vmem:[#allocation2 + $0x13a] sm:$0xff]  ;;  %v687_v62 = vld [vmem:[#allocation2 + $0x129] sm:$0xff]  ;;  %v451_v27 = vmul.f32 0.2, %v387_v11  ;;  %v1115_v31 = vld [vmem:[#allocation2 + $0x32] sm:$0xff]  ;;  %vm420_vm2 = vcmp.ge.f32.partialorder %v388_v22, 0.0  ;;  %v389_v34 = vadd.f32 %v2937_v19, %v350_v16 }
  0x35   : > { %1306 = vrot.lane.b32.xlu1 %v3001_v30, %s2759_s15  ;;  %v664_v41 = vld [vmem:[#allocation2 + $0x19] sm:$0xff]  ;;  %v3019_v47 = vpack.c.bf16 %v1138_v37, %v1137_v36  ;;  %v689_v51 = vld [vmem:[#allocation2 + $0x141] sm:$0xff]  ;;  %v816_v6 = vld [vmem:[#allocation2 + $0x12a] sm:$0xff]  ;;  %v452_v32 = vmul.f32 0.2, %v388_v22  ;;  %vm443_vm3 = vcmp.ge.f32.partialorder %v411_v28, 0.0  ;;  %v390_v45 = vadd.f32 %v2937_v19, %v351_v33 }
  0x36   : > { %v688_v50 = vld [vmem:[#allocation2 + $0x139] sm:$0xff]  ;;  %v686_v53 = vld [vmem:[#allocation2 + $0x121] sm:$0xff]  ;;  %v3022_v54 = vpack.c.bf16 %v665_v48, %v664_v41  ;;  %v1266_v9 = vld [vmem:[#allocation2 + $0x150] sm:$0xff]  ;;  %v483_v39 = vsel %vm419_vm1, %v387_v11, %v451_v27  ;;  %vm444_vm4 = vcmp.ge.f32.partialorder %v412_v29, 0.0  ;;  %v475_v42 = vmul.f32 0.2, %v411_v28 }
  0x37   : > { %v3026_v56 = vpack.c.bf16 %v689_v51, %v688_v50  ;;  %1434 = vrot.lane.b32.xlu0 %v3007_v35, %s2760_s19  ;;  %v815_v63 = vld [vmem:[#allocation2 + $0x122] sm:$0xff]  ;;  %v706_v5 = vpack.c.bf16 %v687_v62, %v686_v53  ;;  %v1267_v14 = vld [vmem:[#allocation2 + $0x158] sm:$0xff]  ;;  %v484_v41 = vsel %vm420_vm2, %v388_v22, %v452_v32  ;;  %572 = vst.msk [vmem:[#allocation2 + $0x61] sm:$0xff] %vm509_vm0, %v483_v39  ;;  %v476_v44 = vmul.f32 0.2, %v412_v29  ;;  %v2438_v48 = vld [vmem:[%s2929_s10 + $0x30] sm:$0xff]  }
  0x38   : > { %1097 = vst.msk [vmem:[#allocation3 + $0x8] sm:$0xff] %vm509_vm0, %v3022_v54  ;;  %v3057_v17 = vpack.c.bf16 %v1267_v14, %v1266_v9  ;;  %v835_v18 = vpack.c.bf16 %v816_v6, %v815_v63  ;;  %v1394_v20 = vld [vmem:[#allocation2 + $0x151] sm:$0xff]  ;;  %v1395_v21 = vld [vmem:[#allocation2 + $0x159] sm:$0xff]  ;;  %v2437_v36 = vld [vmem:[%s2929_s10 + $0x28] sm:$0xff]   ;;  %vm421_vm5 = vcmp.ge.f32.partialorder %v389_v34, 0.0  ;;  %v507_v50 = vsel %vm443_vm3, %v411_v28, %v475_v42 }
  0x39   : > { %984 = vrot.lane.b32.xlu1 %v952_v40, %s2760_s19  ;;  %1109 = vst.msk [vmem:[#allocation3 + $0x128] sm:$0xff] %vm509_vm0, %v3026_v56  ;;  %v944_v25 = vld [vmem:[#allocation2 + $0x138] sm:$0xff]  ;;  %v945_v26 = vld [vmem:[#allocation2 + $0x140] sm:$0xff]  ;;  %v3070_v37 = vpack.c.bf16 %v1395_v21, %v1394_v20  ;;  %573 = vst.msk [vmem:[#allocation2 + $0x69] sm:$0xff] %vm509_vm0, %v484_v41  ;;  %v2391_v46 = vunpack.c.l.bf16 %v2437_v36  ;;  %v453_v51 = vmul.f32 0.2, %v389_v34  ;;  %v2392_v52 = vunpack.c.h.bf16 %v2437_v36 }
  0x3a   : > { %v1116_v38 = vld [vmem:[#allocation2 + $0x3a] sm:$0xff]  ;;  %v964_v40 = vpack.c.bf16 %v945_v26, %v944_v25  ;;  %v1244_v49 = vld [vmem:[#allocation2 + $0x48] sm:$0xff]  ;;  %v1245_v58 = vld [vmem:[#allocation2 + $0x50] sm:$0xff]  ;;  %v508_v59 = vsel %vm444_vm4, %v412_v29, %v476_v44  ;;  %596 = vst.msk [vmem:[#allocation2 + $0x181] sm:$0xff] %vm509_vm0, %v507_v50  ;;  %vm422_vm6 = vcmp.ge.f32.partialorder %v390_v45, 0.0  ;;  %v2395_v2 = vunpack.c.l.bf16 %v2438_v48 }
  0x3b   : > { %1201 = vrot.lane.b32.xlu0 %v3019_v47, %s2758_s14  ;;  %v2689_v43 = vld [vmem:[%s3779_s3 + $0x78] sm:$0xff]   ;;  %v599_v53 = vld [vmem:[#allocation2 + $0x8] sm:$0xff]  ;;  %v3083_v57 = vpack.c.bf16 %v1116_v38, %v1115_v31  ;;  %597 = vst.msk [vmem:[#allocation2 + $0x189] sm:$0xff] %vm509_vm0, %v508_v59  ;;  %v454_v61 = vmul.f32 0.2, %v390_v45  ;;  %v485_v62 = vsel %vm421_vm5, %v389_v34, %v453_v51  ;;  %v352_v63 = vmul.f32 %v2391_v46, %v2918_v4  ;;  %v622_v6 = vld [vmem:[#allocation2 + $0x120] sm:$0xff] }
  0x3c   : > { %2462 = vmatprep.subr.bf16.mxu0 %v2689_v43  ;;  %2621 = vmatprep.subr.bf16.mxu1 %v2689_v43  ;;  %v2690_v60 = vld [vmem:[%s3779_s3 + $0x38] sm:$0xff]   ;;  %v353_v0 = vmul.f32 %v2392_v52, %v2918_v4  ;;  %574 = vst.msk [vmem:[#allocation2 + $0x79] sm:$0xff] %vm509_vm0, %v485_v62  ;;  %v2396_v3 = vunpack.c.h.bf16 %v2438_v48  ;;  %v623_v7 = vld [vmem:[#allocation2 + $0x128] sm:$0xff]  ;;  %v3097_v8 = vpack.c.bf16 %v1245_v58, %v1244_v49  ;;  %v2440_v20 = vld [vmem:[%s2929_s10 + $0x40] sm:$0xff]   ;;  %vm774_vm4 = vcmask 523520  }
  0x3d   : > { %750 = vrot.lane.b32.xlu1 %v706_v5, %s2758_s14  ;;  %v2439_v1 = vld [vmem:[%s2929_s10 + $0x38] sm:$0xff]   ;;  %v630_v5 = vpack.c.bf16 %v599_v53, %v598_v55  ;;  %2463 = vmatpush3.bf16.msra.mxu0 %v2690_v60  ;;  %v1372_v9 = vld [vmem:[#allocation2 + $0x49] sm:$0xff]  ;;  %v486_v11 = vsel %vm422_vm6, %v390_v45, %v454_v61  ;;  %v391_v12 = vadd.f32 %v2937_v19, %v352_v63  ;;  %v2403_v29 = vunpack.c.l.bf16 %v2440_v20  ;;  %v601_v50 = vld [vmem:[#allocation2 + $0x20] sm:$0xff] }
  0x3e   : > { %2629 = vmatpush3.bf16.msra.mxu1 %v2690_v60  ;;  %v1373_v10 = vld [vmem:[#allocation2 + $0x51] sm:$0xff]  ;;  %v392_v13 = vadd.f32 %v2937_v19, %v353_v0  ;;  %575 = vst.msk [vmem:[#allocation2 + $0x81] sm:$0xff] %vm509_vm0, %v486_v11  ;;  %v354_v14 = vmul.f32 %v2395_v2, %v2918_v4  ;;  %v355_v15 = vmul.f32 %v2396_v3, %v2918_v4  ;;  %v2399_v16 = vunpack.c.l.bf16 %v2439_v1  ;;  %v1052_v36 = vld [vmem:[#allocation2 + $0x39] sm:$0xff]  ;;  %v1268_v43 = vld [vmem:[#allocation2 + $0x168] sm:$0xff] }
  0x3f   : > { %1330 = vrot.lane.b32.xlu0 %v3057_v17, %s2759_s15  ;;  %646 = vst.msk [vmem:[#allocation3] sm:$0xff] %vm509_vm0, %v630_v5  ;;  %vm423_vm7 = vcmp.ge.f32.partialorder %v391_v12, 0.0  ;;  %v3111_v21 = vpack.c.bf16 %v623_v7, %v622_v6  ;;  %v3113_v22 = vpack.c.bf16 %v1373_v10, %v1372_v9  ;;  %v455_v23 = vmul.f32 0.2, %v391_v12  ;;  %v1051_v34 = vld [vmem:[#allocation2 + $0x31] sm:$0xff]  ;;  %v1140_v39 = vld [vmem:[#allocation2 + $0x15a] sm:$0xff] }
  0x40   : > { %vm424_vm8 = vcmp.ge.f32.partialorder %v392_v13, 0.0  ;;  %v456_v25 = vmul.f32 0.2, %v392_v13  ;;  %v393_v26 = vadd.f32 %v2937_v19, %v354_v14  ;;  %v394_v27 = vadd.f32 %v2937_v19, %v355_v15  ;;  %v1139_v38 = vld [vmem:[#allocation2 + $0x152] sm:$0xff]  ;;  %v2441_v55 = vld [vmem:[%s2929_s10 + $0x48] sm:$0xff]   ;;  %v625_v62 = vld [vmem:[#allocation2 + $0x140] sm:$0xff] }
  0x41   : > { %879 = vrot.lane.b32.xlu1 %v835_v18, %s2759_s15  ;;  %v2400_v18 = vunpack.c.h.bf16 %v2439_v1  ;;  %v356_v28 = vmul.f32 %v2399_v16, %v2918_v4  ;;  %658 = vst.msk [vmem:[#allocation3 + $0x120] sm:$0xff] %vm509_vm0, %v3111_v21  ;;  %v2404_v33 = vunpack.c.h.bf16 %v2440_v20  ;;  %v1269_v44 = vld [vmem:[#allocation2 + $0x170] sm:$0xff]  ;;  %v358_v46 = vmul.f32 %v2403_v29, %v2918_v4  ;;  %v600_v49 = vld [vmem:[#allocation2 + $0x18] sm:$0xff] }
  0x42   : > { %v488_v31 = vsel %vm424_vm8, %v392_v13, %v456_v25  ;;  %vm425_vm9 = vcmp.ge.f32.partialorder %v393_v26, 0.0  ;;  %vm426_vm10 = vcmp.ge.f32.partialorder %v394_v27, 0.0  ;;  %v458_v41 = vmul.f32 0.2, %v394_v27  ;;  %v1075_v58 = vld [vmem:[#allocation2 + $0x151] sm:$0xff]  ;;  %v1076_v59 = vld [vmem:[#allocation2 + $0x159] sm:$0xff] }
  0x43   : > { %1458 = vrot.lane.b32.xlu0 %v3070_v37, %s2760_s19  ;;  %v357_v32 = vmul.f32 %v2400_v18, %v2918_v4  ;;  %577 = vst.msk [vmem:[#allocation2 + $0x99] sm:$0xff] %vm509_vm0, %v488_v31  ;;  %v395_v42 = vadd.f32 %v2937_v19, %v356_v28  ;;  %v1082_v48 = vpack.c.bf16 %v1052_v36, %v1051_v34  ;;  %v624_v61 = vld [vmem:[#allocation2 + $0x138] sm:$0xff]  ;;  %v1396_v3 = vld [vmem:[#allocation2 + $0x169] sm:$0xff]  ;;  %v2407_v6 = vunpack.c.l.bf16 %v2441_v55 }
  0x44   : > { %v3133_v51 = vpack.c.bf16 %v1140_v39, %v1139_v38  ;;  %v490_v53 = vsel %vm426_vm10, %v394_v27, %v458_v41  ;;  %v397_v0 = vadd.f32 %v2937_v19, %v358_v46  ;;  %v631_v2 = vpack.c.bf16 %v601_v50, %v600_v49  ;;  %v2442_v10 = vld [vmem:[%s2929_s10 + $0x50] sm:$0xff]   ;;  %v603_v25 = vld [vmem:[#allocation2 + $0x38] sm:$0xff] }
  0x45   : > { %1008 = vrot.lane.b32.xlu1 %v964_v40, %s2760_s19  ;;  %v457_v40 = vmul.f32 0.2, %v393_v26  ;;  %v396_v45 = vadd.f32 %v2937_v19, %v357_v32  ;;  %579 = vst.msk [vmem:[#allocation2 + $0xb1] sm:$0xff] %vm509_vm0, %v490_v53  ;;  %vm427_vm11 = vcmp.ge.f32.partialorder %v395_v42, 0.0  ;;  %v459_v60 = vmul.f32 0.2, %v395_v42 }
  0x46   : > { %1098 = vst.msk [vmem:[#allocation3 + $0x20] sm:$0xff] %vm509_vm0, %v1082_v48  ;;  %v2408_v7 = vunpack.c.h.bf16 %v2441_v55  ;;  %v1094_v9 = vpack.c.bf16 %v1076_v59, %v1075_v58  ;;  %v3146_v11 = vpack.c.bf16 %v1269_v44, %v1268_v43  ;;  %vm429_vm13 = vcmp.ge.f32.partialorder %v397_v0, 0.0  ;;  %647 = vst.msk [vmem:[#allocation3 + $0x18] sm:$0xff] %vm509_vm0, %v631_v2  ;;  %v1053_v14 = vld [vmem:[#allocation2 + $0x49] sm:$0xff]  ;;  %v1054_v20 = vld [vmem:[#allocation2 + $0x51] sm:$0xff] }
  0x47   : > { %1179 = vrot.lane.b32.xlu0 %v3083_v57, %s2758_s14  ;;  %v489_v52 = vsel %vm425_vm9, %v393_v26, %v457_v40  ;;  %vm428_vm12 = vcmp.ge.f32.partialorder %v396_v45, 0.0  ;;  %v460_v63 = vmul.f32 0.2, %v396_v45  ;;  %v491_v5 = vsel %vm427_vm11, %v395_v42, %v459_v60  ;;  %v1117_v38 = vld [vmem:[#allocation2 + $0x4a] sm:$0xff]  ;;  %v1118_v39 = vld [vmem:[#allocation2 + $0x52] sm:$0xff]  ;;  %v1246_v43 = vld [vmem:[#allocation2 + $0x60] sm:$0xff] }
  0x48   : > { %578 = vst.msk [vmem:[#allocation2 + $0xa9] sm:$0xff] %vm509_vm0, %v489_v52  ;;  %580 = vst.msk [vmem:[#allocation2 + $0xc1] sm:$0xff] %vm509_vm0, %v491_v5  ;;  %v3151_v13 = vpack.c.bf16 %v625_v62, %v624_v61  ;;  %v461_v15 = vmul.f32 0.2, %v397_v0  ;;  %v360_v16 = vmul.f32 %v2407_v6, %v2918_v4  ;;  %v361_v18 = vmul.f32 %v2408_v7, %v2918_v4  ;;  %v1077_v46 = vld [vmem:[#allocation2 + $0x169] sm:$0xff] }
  0x49   : > { %728 = vrot.lane.b32.xlu1 %v3022_v54, %s2758_s14  ;;  %v487_v54 = vsel %vm423_vm7, %v391_v12, %v455_v23  ;;  %v492_v12 = vsel %vm428_vm12, %v396_v45, %v460_v63  ;;  %1110 = vst.msk [vmem:[#allocation3 + $0x140] sm:$0xff] %vm509_vm0, %v1094_v9  ;;  %v602_v23 = vld [vmem:[#allocation2 + $0x30] sm:$0xff]  ;;  %v2412_v31 = vunpack.c.h.bf16 %v2442_v10  ;;  %v1083_v34 = vpack.c.bf16 %v1054_v20, %v1053_v14  ;;  %v1247_v48 = vld [vmem:[#allocation2 + $0x68] sm:$0xff]  ;;  %v627_v63 = vld [vmem:[#allocation2 + $0x158] sm:$0xff] }
  0x4a   : > { %576 = vst.msk [vmem:[#allocation2 + $0x91] sm:$0xff] %vm509_vm0, %v487_v54  ;;  %581 = vst.msk [vmem:[#allocation2 + $0xc9] sm:$0xff] %vm509_vm0, %v492_v12  ;;  %v493_v28 = vsel %vm429_vm13, %v397_v0, %v461_v15  ;;  %v399_v29 = vadd.f32 %v2937_v19, %v360_v16  ;;  %v400_v54 = vadd.f32 %v2937_v19, %v361_v18  ;;  %v626_v58 = vld [vmem:[#allocation2 + $0x150] sm:$0xff]  ;;  %v1390_v0 = vld [vmem:[#allocation2 + $0x121] sm:$0xff]  ;;  %vm903_vm5 = vcmask 785920  }
  0x4b   : > { %1308 = vrot.lane.b32.xlu0 %v3097_v8, %s2759_s15  ;;  %659 = vst.msk [vmem:[#allocation3 + $0x138] sm:$0xff] %vm509_vm0, %v3151_v13  ;;  %582 = vst.msk [vmem:[#allocation2 + $0xd9] sm:$0xff] %vm509_vm0, %v493_v28  ;;  %v632_v36 = vpack.c.bf16 %v603_v25, %v602_v23  ;;  %v363_v40 = vmul.f32 %v2412_v31, %v2918_v4  ;;  %v1391_v5 = vld [vmem:[#allocation2 + $0x129] sm:$0xff]  ;;  %v3197_v6 = vpack.c.bf16 %v1247_v48, %v1246_v43  ;;  %v1142_v28 = vld [vmem:[#allocation2 + $0x172] sm:$0xff]  ;;  %vm1032_vm6 = vcmask 1048320  }
  0x4c   : > { %vm431_vm15 = vcmp.ge.f32.partialorder %v399_v29, 0.0  ;;  %vm432_vm1 = vcmp.ge.f32.partialorder %v400_v54, 0.0  ;;  %v463_v41 = vmul.f32 0.2, %v399_v29  ;;  %v464_v42 = vmul.f32 0.2, %v400_v54 }
  0x4d   : > { %857 = vrot.lane.b32.xlu1 %v2997_v24, %s2759_s15  ;;  %v359_v24 = vmul.f32 %v2404_v33, %v2918_v4  ;;  %1099 = vst.msk [vmem:[#allocation3 + $0x38] sm:$0xff] %vm509_vm0, %v1083_v34  ;;  %648 = vst.msk [vmem:[#allocation3 + $0x30] sm:$0xff] %vm509_vm0, %v632_v36  ;;  %v3202_v15 = vpack.c.bf16 %v1391_v5, %v1390_v0  ;;  %v1135_v23 = vld [vmem:[#allocation2 + $0x122] sm:$0xff]  ;;  %v1136_v25 = vld [vmem:[#allocation2 + $0x12a] sm:$0xff] }
  0x4e   : > { %v495_v50 = vsel %vm431_vm15, %v399_v29, %v463_v41  ;;  %v496_v52 = vsel %vm432_vm1, %v400_v54, %v464_v42  ;;  %v1270_v41 = vld [vmem:[#allocation2 + $0x180] sm:$0xff]  ;;  %v1271_v42 = vld [vmem:[#allocation2 + $0x188] sm:$0xff] }
  0x4f   : > { %1436 = vrot.lane.b32.xlu0 %v3113_v22, %s2760_s19  ;;  %v398_v1 = vadd.f32 %v2937_v19, %v359_v24  ;;  %v1382_v44 = vld [vmem:[#allocation2 + $0xc1] sm:$0xff]  ;;  %v3181_v24 = vpack.c.bf16 %v1118_v39, %v1117_v38  ;;  %584 = vst.msk [vmem:[#allocation2 + $0xf1] sm:$0xff] %vm509_vm0, %v495_v50  ;;  %585 = vst.msk [vmem:[#allocation2 + $0xf9] sm:$0xff] %vm509_vm0, %v496_v52 }
  0x50   : > { %1108 = vst.msk [vmem:[#allocation3 + $0x110] sm:$0xff] %vm509_vm0, %v3202_v15  ;;  %v1055_v43 = vld [vmem:[#allocation2 + $0x61] sm:$0xff] }
  0x51   : > { %986 = vrot.lane.b32.xlu1 %v3001_v30, %s2760_s19  ;;  %v1397_v30 = vld [vmem:[#allocation2 + $0x171] sm:$0xff]  ;;  %vm430_vm14 = vcmp.ge.f32.partialorder %v398_v1, 0.0  ;;  %v462_v27 = vmul.f32 0.2, %v398_v1  ;;  %v1127_v49 = vld [vmem:[#allocation2 + $0xc2] sm:$0xff] }
  0x52   : > { %v3159_v26 = vpack.c.bf16 %v1397_v30, %v1396_v3  ;;  %v1128_v55 = vld [vmem:[#allocation2 + $0xca] sm:$0xff]  ;;  %v1256_v2 = vld [vmem:[#allocation2 + $0xd8] sm:$0xff]  ;;  %v644_v30 = vpack.c.bf16 %v627_v63, %v626_v58 }
  0x53   : > { %1203 = vrot.lane.b32.xlu0 %v3133_v51, %s2758_s14  ;;  %v494_v32 = vsel %vm430_vm14, %v398_v1, %v462_v27  ;;  %v3191_v59 = vpack.c.bf16 %v1128_v55, %v1127_v49  ;;  %v1374_v1 = vld [vmem:[#allocation2 + $0x61] sm:$0xff]  ;;  %v1384_v3 = vld [vmem:[#allocation2 + $0xd9] sm:$0xff]  ;;  %v1399_v63 = vld [vmem:[#allocation2 + $0x189] sm:$0xff] }
  0x54   : > { %583 = vst.msk [vmem:[#allocation2 + $0xe1] sm:$0xff] %vm509_vm0, %v494_v32  ;;  %660 = vst.msk [vmem:[#allocation3 + $0x150] sm:$0xff] %vm509_vm0, %v644_v30  ;;  %v604_v58 = vld [vmem:[#allocation2 + $0x48] sm:$0xff] }
  0x55   : > { %752 = vrot.lane.b32.xlu1 %v3026_v56, %s2758_s14  ;;  %v2411_v56 = vunpack.c.l.bf16 %v2442_v10  ;;  %1552 = vst.msk [vmem:[#allocation3 + $0xa0] sm:$0xff] %vm509_vm0, %v3191_v59  ;;  %v628_v5 = vld [vmem:[#allocation2 + $0x168] sm:$0xff] }
  0x56   : > { %v1258_v54 = vld [vmem:[#allocation2 + $0xf0] sm:$0xff]  ;;  %v1259_v31 = vld [vmem:[#allocation2 + $0xf8] sm:$0xff] }
  0x57   : > { %1332 = vrot.lane.b32.xlu0 %v3146_v11, %s2759_s15  ;;  %v362_v33 = vmul.f32 %v2411_v56, %v2918_v4  ;;  %v1383_v4 = vld [vmem:[#allocation2 + $0xc9] sm:$0xff]  ;;  %v3217_v56 = vpack.c.bf16 %v1136_v25, %v1135_v23  ;;  %v1386_v32 = vld [vmem:[#allocation2 + $0xf1] sm:$0xff]  ;;  %v1387_v34 = vld [vmem:[#allocation2 + $0xf9] sm:$0xff] }
  0x58   : > { %v3187_v53 = vpack.c.bf16 %v1383_v4, %v1382_v44  ;;  %v1131_v36 = vld [vmem:[#allocation2 + $0xf2] sm:$0xff]  ;;  %v1132_v38 = vld [vmem:[#allocation2 + $0xfa] sm:$0xff]  ;;  %v3237_v39 = vpack.c.bf16 %v1387_v34, %v1386_v32  ;;  %v1056_v44 = vld [vmem:[#allocation2 + $0x69] sm:$0xff] }
  0x59   : > { %881 = vrot.lane.b32.xlu1 %v3019_v47, %s2759_s15  ;;  %v401_v45 = vadd.f32 %v2937_v19, %v362_v33  ;;  %v402_v47 = vadd.f32 %v2937_v19, %v363_v40  ;;  %v1078_v19 = vld [vmem:[#allocation2 + $0x171] sm:$0xff]  ;;  %1556 = vst.msk [vmem:[#allocation3 + $0x100] sm:$0xff] %vm509_vm0, %v3217_v56  ;;  %v3235_v33 = vpack.c.bf16 %v1259_v31, %v1258_v54  ;;  %v1143_v23 = vld [vmem:[#allocation2 + $0x182] sm:$0xff] }
  0x5a   : > { %v1095_v62 = vpack.c.bf16 %v1078_v19, %v1077_v46  ;;  %1104 = vst.msk [vmem:[#allocation3 + $0xb0] sm:$0xff] %vm509_vm0, %v3187_v53  ;;  %v3239_v40 = vpack.c.bf16 %v1132_v38, %v1131_v36  ;;  %v1084_v48 = vpack.c.bf16 %v1056_v44, %v1055_v43  ;;  %1106 = vst.msk [vmem:[#allocation3 + $0xe0] sm:$0xff] %vm509_vm0, %v3237_v39  ;;  %v1144_v25 = vld [vmem:[#allocation2 + $0x18a] sm:$0xff]  ;;  %v1272_v34 = vld [vmem:[#allocation2 + $0x198] sm:$0xff] }
  0x5b   : > { %1460 = vrot.lane.b32.xlu0 %v3159_v26, %s2760_s19  ;;  %vm433_vm2 = vcmp.ge.f32.partialorder %v401_v45, 0.0  ;;  %vm434_vm3 = vcmp.ge.f32.partialorder %v402_v47, 0.0  ;;  %v465_v60 = vmul.f32 0.2, %v401_v45  ;;  %v466_v61 = vmul.f32 0.2, %v402_v47 }
  0x5c   : > { %v1257_v7 = vld [vmem:[#allocation2 + $0xe0] sm:$0xff]  ;;  %1111 = vst.msk [vmem:[#allocation3 + $0x158] sm:$0xff] %vm509_vm0, %v1095_v62  ;;  %656 = vst.msk [vmem:[#allocation3 + $0xf0] sm:$0xff] %vm509_vm0, %v3235_v33  ;;  %v1160_v54 = vpack.c.bf16 %v1144_v25, %v1143_v23  ;;  %v607_v32 = vld [vmem:[#allocation2 + $0x68] sm:$0xff] }
  0x5d   : > { %1010 = vrot.lane.b32.xlu1 %v3057_v17, %s2760_s19  ;;  %v1375_v17 = vld [vmem:[#allocation2 + $0x69] sm:$0xff]  ;;  %v1385_v9 = vld [vmem:[#allocation2 + $0xe1] sm:$0xff]  ;;  %v497_v12 = vsel %vm433_vm2, %v401_v45, %v465_v60  ;;  %v498_v14 = vsel %vm434_vm3, %v402_v47, %v466_v61  ;;  %v3208_v16 = vpack.c.bf16 %v1257_v7, %v1256_v2  ;;  %1554 = vst.msk [vmem:[#allocation3 + $0xd0] sm:$0xff] %vm509_vm0, %v3239_v40  ;;  %1100 = vst.msk [vmem:[#allocation3 + $0x50] sm:$0xff] %vm509_vm0, %v1084_v48 }
  0x5e   : > { %v1129_v10 = vld [vmem:[#allocation2 + $0xda] sm:$0xff]  ;;  %v3210_v18 = vpack.c.bf16 %v1385_v9, %v1384_v3  ;;  %v1130_v20 = vld [vmem:[#allocation2 + $0xe2] sm:$0xff]  ;;  %586 = vst.msk [vmem:[#allocation2 + $0x109] sm:$0xff] %vm509_vm0, %v497_v12  ;;  %587 = vst.msk [vmem:[#allocation2 + $0x111] sm:$0xff] %vm509_vm0, %v498_v14  ;;  %v3227_v29 = vpack.c.bf16 %v1375_v17, %v1374_v1 }
  0x5f   : > { %1181 = vrot.lane.b32.xlu0 %v3181_v24, %s2758_s14  ;;  %v3215_v27 = vpack.c.bf16 %v1130_v20, %v1129_v10  ;;  %655 = vst.msk [vmem:[#allocation3 + $0xd8] sm:$0xff] %vm509_vm0, %v3208_v16  ;;  %v605_v60 = vld [vmem:[#allocation2 + $0x50] sm:$0xff]  ;;  %v1398_v62 = vld [vmem:[#allocation2 + $0x181] sm:$0xff]  ;;  %v1248_v9 = vld [vmem:[#allocation2 + $0x78] sm:$0xff] }
  0x60   : > { %1105 = vst.msk [vmem:[#allocation3 + $0xc8] sm:$0xff] %vm509_vm0, %v3210_v18  ;;  %v633_v61 = vpack.c.bf16 %v605_v60, %v604_v58  ;;  %v1416_v0 = vpack.c.bf16 %v1399_v63, %v1398_v62  ;;  %v1119_v1 = vld [vmem:[#allocation2 + $0x62] sm:$0xff]  ;;  %v1120_v17 = vld [vmem:[#allocation2 + $0x6a] sm:$0xff]  ;;  %v1376_v14 = vld [vmem:[#allocation2 + $0x79] sm:$0xff] }
  0x61   : > { %730 = vrot.lane.b32.xlu1 %v3007_v35, %s2758_s14  ;;  %v1141_v35 = vld [vmem:[#allocation2 + $0x16a] sm:$0xff]  ;;  %1553 = vst.msk [vmem:[#allocation3 + $0xb8] sm:$0xff] %vm509_vm0, %v3215_v27  ;;  %v1079_v2 = vld [vmem:[#allocation2 + $0x181] sm:$0xff]  ;;  %v3278_v30 = vpack.c.bf16 %v1120_v17, %v1119_v1  ;;  %v1251_v58 = vld [vmem:[#allocation2 + $0x98] sm:$0xff] }
  0x62   : > { %649 = vst.msk [vmem:[#allocation3 + $0x48] sm:$0xff] %vm509_vm0, %v633_v61  ;;  %v1080_v3 = vld [vmem:[#allocation2 + $0x189] sm:$0xff]  ;;  %v1249_v10 = vld [vmem:[#allocation2 + $0x80] sm:$0xff]  ;;  %v1059_v60 = vld [vmem:[#allocation2 + $0x91] sm:$0xff] }
  0x63   : > { %1310 = vrot.lane.b32.xlu0 %v3197_v6, %s2759_s15  ;;  %v629_v7 = vld [vmem:[#allocation2 + $0x170] sm:$0xff]  ;;  %v1377_v20 = vld [vmem:[#allocation2 + $0x81] sm:$0xff]  ;;  %v1060_v61 = vld [vmem:[#allocation2 + $0x99] sm:$0xff] }
  0x64   : > { %v645_v12 = vpack.c.bf16 %v629_v7, %v628_v5  ;;  %v1273_v36 = vld [vmem:[#allocation2 + $0x1a0] sm:$0xff]  ;;  %v1086_v63 = vpack.c.bf16 %v1060_v61, %v1059_v60 }
  0x65   : > { %859 = vrot.lane.b32.xlu1 %v3083_v57, %s2759_s15  ;;  %v3245_v57 = vpack.c.bf16 %v1142_v28, %v1141_v35  ;;  %v1260_v45 = vld [vmem:[#allocation2 + $0x108] sm:$0xff]  ;;  %v1261_v47 = vld [vmem:[#allocation2 + $0x110] sm:$0xff]  ;;  %v1057_v35 = vld [vmem:[#allocation2 + $0x79] sm:$0xff] }
  0x66   : > { %v1388_v46 = vld [vmem:[#allocation2 + $0x109] sm:$0xff]  ;;  %v3253_v4 = vpack.c.bf16 %v1261_v47, %v1260_v45  ;;  %v1389_v49 = vld [vmem:[#allocation2 + $0x111] sm:$0xff]  ;;  %661 = vst.msk [vmem:[#allocation3 + $0x168] sm:$0xff] %vm509_vm0, %v645_v12  ;;  %v1058_v28 = vld [vmem:[#allocation2 + $0x81] sm:$0xff] }
  0x67   : > { %1438 = vrot.lane.b32.xlu0 %v3227_v29, %s2760_s19  ;;  %v1133_v50 = vld [vmem:[#allocation2 + $0x10a] sm:$0xff]  ;;  %v1134_v52 = vld [vmem:[#allocation2 + $0x112] sm:$0xff]  ;;  %v3255_v55 = vpack.c.bf16 %v1389_v49, %v1388_v46  ;;  %v1085_v31 = vpack.c.bf16 %v1058_v28, %v1057_v35  ;;  %v1499_v43 = vld [vmem:[#allocation2 + $0x3a] sm:$0xff]  ;;  %1102 = vst.msk [vmem:[#allocation3 + $0x80] sm:$0xff] %vm509_vm0, %v1086_v63 }
  0x68   : > { %v3257_v19 = vpack.c.bf16 %v1134_v52, %v1133_v50  ;;  %657 = vst.msk [vmem:[#allocation3 + $0x108] sm:$0xff] %vm509_vm0, %v3253_v4  ;;  %v1401_v44 = vld [vmem:[#allocation2 + $0x1a1] sm:$0xff]  ;;  %v1500_v47 = vld [vmem:[#allocation2 + $0x4a] sm:$0xff] }
  0x69   : > { %988 = vrot.lane.b32.xlu1 %v3097_v8, %s2760_s19  ;;  %v3264_v8 = vpack.c.bf16 %v1271_v42, %v1270_v41  ;;  %1107 = vst.msk [vmem:[#allocation3 + $0xf8] sm:$0xff] %vm509_vm0, %v3255_v55  ;;  %1101 = vst.msk [vmem:[#allocation3 + $0x68] sm:$0xff] %vm509_vm0, %v1085_v31  ;;  %v1400_v41 = vld [vmem:[#allocation2 + $0x199] sm:$0xff]  ;;  %v1122_v50 = vld [vmem:[#allocation2 + $0x82] sm:$0xff] }
  0x6a   : > { %1555 = vst.msk [vmem:[#allocation3 + $0xe8] sm:$0xff] %vm509_vm0, %v3257_v19  ;;  %v1498_v42 = vld [vmem:[#allocation2 + $0x32] sm:$0xff]  ;;  %v3308_v46 = vld [vmem:[%s3779_s3 + $0x80] sm:$0xff]   ;;  %v1417_v49 = vpack.c.bf16 %v1401_v44, %v1400_v41  ;;  %v1508_v28 = vld [vmem:[#allocation2 + $0xaa] sm:$0xff] }
  0x6b   : > { %1205 = vrot.lane.b32.xlu0 %v3245_v57, %s2758_s14  ;;  %v1530_v45 = vpack.c.bf16 %v1499_v43, %v1498_v42  ;;  %2578 = vmatprep.subr.bf16.mxu1 %v3308_v46  ;;  %v1250_v52 = vld [vmem:[#allocation2 + $0x90] sm:$0xff]  ;;  %v609_v1 = vld [vmem:[#allocation2 + $0x80] sm:$0xff] }
  0x6c   : > { %v1502_v17 = vld [vmem:[#allocation2 + $0x62] sm:$0xff]  ;;  %v1507_v23 = vld [vmem:[#allocation2 + $0x9a] sm:$0xff]  ;;  %v1253_v41 = vld [vmem:[#allocation2 + $0xb0] sm:$0xff] }
  0x6d   : > { %754 = vrot.lane.b32.xlu1 %v3070_v37, %s2758_s14  ;;  %v1096_v37 = vpack.c.bf16 %v1080_v3, %v1079_v2  ;;  %1546 = vst.msk [vmem:[#allocation3 + $0x10] sm:$0xff] %vm509_vm0, %v1530_v45  ;;  %v1503_v3 = vld [vmem:[#allocation2 + $0x6a] sm:$0xff]  ;;  %v1124_v25 = vld [vmem:[#allocation2 + $0x9a] sm:$0xff] }
  0x6e   : > { %v1532_v5 = vpack.c.bf16 %v1503_v3, %v1502_v17  ;;  %v1380_v45 = vld [vmem:[#allocation2 + $0xa9] sm:$0xff] }
  0x6f   : > { %1334 = vrot.lane.b32.xlu0 %v3264_v8, %s2759_s15  ;;  %1112 = vst.msk [vmem:[#allocation3 + $0x170] sm:$0xff] %vm509_vm0, %v1096_v37  ;;  %v1504_v37 = vld [vmem:[#allocation2 + $0x7a] sm:$0xff]  ;;  %v1521_v17 = vld [vmem:[#allocation2 + $0x142] sm:$0xff] }
  0x70   : > { %1548 = vst.msk [vmem:[#allocation3 + $0x40] sm:$0xff] %vm509_vm0, %v1532_v5  ;;  %v615_v5 = vld [vmem:[#allocation2 + $0xc8] sm:$0xff] }
  0x71   : > { %883 = vrot.lane.b32.xlu1 %v3133_v51, %s2759_s15  ;;  %v3286_v51 = vpack.c.bf16 %v1249_v10, %v1248_v9  ;;  %v1278_v9 = vpack.c.bf16 %v1251_v58, %v1250_v52  ;;  %v1379_v10 = vld [vmem:[#allocation2 + $0x99] sm:$0xff]  ;;  %v1255_v58 = vld [vmem:[#allocation2 + $0xc8] sm:$0xff] }
  0x72   : > { %v1254_v52 = vld [vmem:[#allocation2 + $0xc0] sm:$0xff] }
  0x73   : > { %1462 = vrot.lane.b32.xlu0 %v1416_v0, %s2760_s19  ;;  %v608_v0 = vld [vmem:[#allocation2 + $0x78] sm:$0xff] }
  0x74   : > { %v635_v2 = vpack.c.bf16 %v609_v1, %v608_v0  ;;  %v1520_v1 = vld [vmem:[#allocation2 + $0x13a] sm:$0xff] }
  0x75   : > { %1012 = vrot.lane.b32.xlu1 %v3146_v11, %s2760_s19  ;;  %v3292_v11 = vpack.c.bf16 %v1377_v20, %v1376_v14  ;;  %v1123_v14 = vld [vmem:[#allocation2 + $0x92] sm:$0xff]  ;;  %v1541_v3 = vpack.c.bf16 %v1521_v17, %v1520_v1 }
  0x76   : > { %651 = vst.msk [vmem:[#allocation3 + $0x78] sm:$0xff] %vm509_vm0, %v635_v2  ;;  %v1506_v20 = vld [vmem:[#allocation2 + $0x92] sm:$0xff] }
  0x77   : > { %1183 = vrot.lane.b32.xlu0 %v3278_v30, %s2758_s14  ;;  %v1534_v35 = vpack.c.bf16 %v1507_v23, %v1506_v20  ;;  %1557 = vst.msk [vmem:[#allocation3 + $0x118] sm:$0xff] %vm509_vm0, %v1541_v3  ;;  %v1523_v20 = vld [vmem:[#allocation2 + $0x15a] sm:$0xff] }
  0x79   : > { %732 = vrot.lane.b32.xlu1 %v3113_v22, %s2758_s14  ;;  %v606_v22 = vld [vmem:[#allocation2 + $0x60] sm:$0xff]  ;;  %1550 = vst.msk [vmem:[#allocation3 + $0x70] sm:$0xff] %vm509_vm0, %v1534_v35  ;;  %v1525_v35 = vld [vmem:[#allocation2 + $0x172] sm:$0xff] }
  0x7a   : > { %v634_v38 = vpack.c.bf16 %v607_v32, %v606_v22  ;;  %v1061_v32 = vld [vmem:[#allocation2 + $0xa9] sm:$0xff] }
  0x7b   : > { %1312 = vrot.lane.b32.xlu0 %v3286_v51, %s2759_s15 }
  0x7c   : > { %650 = vst.msk [vmem:[#allocation3 + $0x60] sm:$0xff] %vm509_vm0, %v634_v38  ;;  %v611_v38 = vld [vmem:[#allocation2 + $0x98] sm:$0xff] }
  0x7d   : > { %861 = vrot.lane.b32.xlu1 %v3181_v24, %s2759_s15  ;;  %v1289_v24 = vpack.c.bf16 %v1273_v36, %v1272_v34  ;;  %v1150_v34 = vpack.c.bf16 %v1124_v25, %v1123_v14  ;;  %v1062_v36 = vld [vmem:[#allocation2 + $0xb1] sm:$0xff] }
  0x7e   : > { %v1087_v42 = vpack.c.bf16 %v1062_v36, %v1061_v32  ;;  %v1522_v14 = vld [vmem:[#allocation2 + $0x152] sm:$0xff]  ;;  %v1524_v25 = vld [vmem:[#allocation2 + $0x16a] sm:$0xff]  ;;  %v1526_v32 = vld [vmem:[#allocation2 + $0x182] sm:$0xff] }
  0x7f   : > { %1440 = vrot.lane.b32.xlu0 %v3292_v11, %s2760_s19  ;;  %v1542_v23 = vpack.c.bf16 %v1523_v20, %v1522_v14 }
  0x80   : > { %1103 = vst.msk [vmem:[#allocation3 + $0x98] sm:$0xff] %vm509_vm0, %v1087_v42  ;;  %v2692_v42 = vld [vmem:[%s3779_s3 + $0x88] sm:$0xff]  }
  0x81   : > { %990 = vrot.lane.b32.xlu1 %v3197_v6, %s2760_s19  ;;  %v1501_v6 = vld [vmem:[#allocation2 + $0x52] sm:$0xff]  ;;  %1558 = vst.msk [vmem:[#allocation3 + $0x130] sm:$0xff] %vm509_vm0, %v1542_v23 }
  0x82   : > { %v1531_v48 = vpack.c.bf16 %v1501_v6, %v1500_v47  ;;  %v1381_v47 = vld [vmem:[#allocation2 + $0xb1] sm:$0xff] }
  0x83   : > { %1207 = vrot.lane.b32.xlu0 %v1160_v54, %s2758_s14  ;;  %v1509_v54 = vld [vmem:[#allocation2 + $0xb2] sm:$0xff]  ;;  %v1407_v6 = vpack.c.bf16 %v1381_v47, %v1380_v45 }
  0x84   : > { %1547 = vst.msk [vmem:[#allocation3 + $0x28] sm:$0xff] %vm509_vm0, %v1531_v48  ;;  %v1535_v22 = vpack.c.bf16 %v1509_v54, %v1508_v28  ;;  %v1126_v48 = vld [vmem:[#allocation2 + $0xb2] sm:$0xff]  ;;  %v1543_v54 = vpack.c.bf16 %v1525_v35, %v1524_v25 }
  0x85   : > { %756 = vrot.lane.b32.xlu1 %v3159_v26, %s2758_s14  ;;  %v1121_v26 = vld [vmem:[#allocation2 + $0x7a] sm:$0xff] }
  0x86   : > { %v1149_v62 = vpack.c.bf16 %v1122_v50, %v1121_v26  ;;  %1551 = vst.msk [vmem:[#allocation3 + $0x88] sm:$0xff] %vm509_vm0, %v1535_v22  ;;  %v612_v26 = vld [vmem:[#allocation2 + $0xa8] sm:$0xff]  ;;  %v613_v50 = vld [vmem:[#allocation2 + $0xb0] sm:$0xff]  ;;  %1559 = vst.msk [vmem:[#allocation3 + $0x148] sm:$0xff] %vm509_vm0, %v1543_v54 }
  0x87   : > { %1336 = vrot.lane.b32.xlu0 %v1289_v24, %s2759_s15  ;;  %v1252_v24 = vld [vmem:[#allocation2 + $0xa8] sm:$0xff]  ;;  %v637_v60 = vpack.c.bf16 %v613_v50, %v612_v26  ;;  %v1564_v54 = vld [vmem:[#allocation3 + $0x10] sm:$0xff] }
  0x88   : > { %v1279_v44 = vpack.c.bf16 %v1253_v41, %v1252_v24 }
  0x89   : > { %885 = vrot.lane.b32.xlu1 %v3245_v57, %s2759_s15  ;;  %v1505_v57 = vld [vmem:[#allocation2 + $0x82] sm:$0xff]  ;;  %653 = vst.msk [vmem:[#allocation3 + $0xa8] sm:$0xff] %vm509_vm0, %v637_v60 }
  0x8a   : > { %v1533_v7 = vpack.c.bf16 %v1505_v57, %v1504_v37  ;;  %v614_v57 = vld [vmem:[#allocation2 + $0xc0] sm:$0xff] }
  0x8b   : > { %1464 = vrot.lane.b32.xlu0 %v1417_v49, %s2760_s19  ;;  %v727_v31 = vpop.permute.xlu0 %726 }
  0x8c   : > { %1549 = vst.msk [vmem:[#allocation3 + $0x58] sm:$0xff] %vm509_vm0, %v1533_v7  ;;  %v638_v7 = vpack.c.bf16 %v615_v5, %v614_v57 }
  0x8d   : > { %1014 = vrot.lane.b32.xlu1 %v3264_v8, %s2760_s19  ;;  %v1378_v8 = vld [vmem:[#allocation2 + $0x91] sm:$0xff]  ;;  %775 = vst.msk [vmem:[#allocation3] sm:$0xff] %vm774_vm4, %v727_v31 }
  0x8e   : > { %v1406_v12 = vpack.c.bf16 %v1379_v10, %v1378_v8  ;;  %654 = vst.msk [vmem:[#allocation3 + $0xc0] sm:$0xff] %vm509_vm0, %v638_v7 }
  0x8f   : > { %1185 = vrot.lane.b32.xlu0 %v1149_v62, %s2758_s14 }
  0x91   : > { %734 = vrot.lane.b32.xlu1 %v3227_v29, %s2758_s14  ;;  %v856_v29 = vpop.permute.xlu1 %855 }
  0x92   : > { %904 = vst.msk [vmem:[#allocation3] sm:$0xff] %vm903_vm5, %v856_v29 }
  0x93   : > { %1314 = vrot.lane.b32.xlu0 %v1278_v9, %s2759_s15 }
  0x95   : > { %863 = vrot.lane.b32.xlu1 %v3278_v30, %s2759_s15  ;;  %v610_v30 = vld [vmem:[#allocation2 + $0x90] sm:$0xff] }
  0x96   : > { %v636_v43 = vpack.c.bf16 %v611_v38, %v610_v30  ;;  %v1528_v30 = vld [vmem:[#allocation2 + $0x19a] sm:$0xff]  ;;  %v1529_v38 = vld [vmem:[#allocation2 + $0x1a2] sm:$0xff] }
  0x97   : > { %1442 = vrot.lane.b32.xlu0 %v1406_v12, %s2760_s19 }
  0x98   : > { %652 = vst.msk [vmem:[#allocation3 + $0x90] sm:$0xff] %vm509_vm0, %v636_v43  ;;  %v1545_v43 = vpack.c.bf16 %v1529_v38, %v1528_v30  ;;  %v1570_v30 = vld [vmem:[#allocation3 + $0x40] sm:$0xff] }
  0x99   : > { %992 = vrot.lane.b32.xlu1 %v3286_v51, %s2760_s19  ;;  %v1125_v51 = vld [vmem:[#allocation2 + $0xaa] sm:$0xff] }
  0x9a   : > { %v1151_v49 = vpack.c.bf16 %v1126_v48, %v1125_v51  ;;  %1561 = vst.msk [vmem:[#allocation3 + $0x178] sm:$0xff] %vm509_vm0, %v1545_v43 }
  0x9b   : > { %1187 = vrot.lane.b32.xlu0 %v1150_v34, %s2758_s14 }
  0x9d   : > { %736 = vrot.lane.b32.xlu1 %v3292_v11, %s2758_s14 }
  0x9f   : > { %1316 = vrot.lane.b32.xlu0 %v1279_v44, %s2759_s15 }
  0xa1   : > { %865 = vrot.lane.b32.xlu1 %v1149_v62, %s2759_s15  ;;  %v1280_v62 = vpack.c.bf16 %v1255_v58, %v1254_v52 }
  0xa3   : > { %1444 = vrot.lane.b32.xlu0 %v1407_v6, %s2760_s19 }
  0xa5   : > { %994 = vrot.lane.b32.xlu1 %v1278_v9, %s2760_s19  ;;  %v1178_v11 = vpop.permute.xlu0 %1177 }
  0xa6   : > { %1225 = vst.msk [vmem:[#allocation3 + $0x8] sm:$0xff] %vm774_vm4, %v1178_v11 }
  0xa7   : > { %v1307_v61 = vpop.permute.xlu1 %1306  ;;  %1189 = vrot.lane.b32.xlu0 %v1151_v49, %s2758_s14 }
  0xa8   : > { %1354 = vst.msk [vmem:[#allocation3 + $0x8] sm:$0xff] %vm903_vm5, %v1307_v61 }
  0xa9   : > { %738 = vrot.lane.b32.xlu1 %v1406_v12, %s2758_s14  ;;  %v1435_v63 = vpop.permute.xlu0 %1434 }
  0xaa   : > { %1482 = vst.msk [vmem:[#allocation3 + $0x8] sm:$0xff] %vm1032_vm6, %v1435_v63 }
  0xab   : > { %v985_v0 = vpop.permute.xlu1 %984  ;;  %1318 = vrot.lane.b32.xlu0 %v1280_v62, %s2759_s15 }
  0xac   : > { %1033 = vst.msk [vmem:[#allocation3] sm:$0xff] %vm1032_vm6, %v985_v0 }
  0xad   : > { %867 = vrot.lane.b32.xlu1 %v1150_v34, %s2759_s15  ;;  %v1202_v2 = vpop.permute.xlu0 %1201  ;;  %v1527_v34 = vld [vmem:[#allocation2 + $0x18a] sm:$0xff] }
  0xae   : > { %1237 = vst.msk [vmem:[#allocation3 + $0x128] sm:$0xff] %vm774_vm4, %v1202_v2  ;;  %v1544_v36 = vpack.c.bf16 %v1527_v34, %v1526_v32  ;;  %v1567_v34 = vld [vmem:[#allocation3 + $0x28] sm:$0xff] }
  0xaf   : > { %v751_v37 = vpop.permute.xlu1 %750  ;;  %1446 = vrot.lane.b32.xlu0 %v3187_v53, %s2760_s19 }
  0xb0   : > { %787 = vst.msk [vmem:[#allocation3 + $0x120] sm:$0xff] %vm774_vm4, %v751_v37 }
  0xb1   : > { %996 = vrot.lane.b32.xlu1 %v1279_v44, %s2760_s19  ;;  %v1331_v9 = vpop.permute.xlu0 %1330  ;;  %v1563_v8 = vld [vmem:[#allocation3 + $0x8] sm:$0xff]  ;;  %1560 = vst.msk [vmem:[#allocation3 + $0x160] sm:$0xff] %vm509_vm0, %v1544_v36 }
  0xb2   : > { %1366 = vst.msk [vmem:[#allocation3 + $0x128] sm:$0xff] %vm903_vm5, %v1331_v9  ;;  %1841 = vmatprep.mubr.bf16.mxu0 %v1563_v8 }
  0xb3   : > { %v880_v10 = vpop.permute.xlu1 %879  ;;  %v1562_v12 = vld [vmem:[#allocation3] sm:$0xff]  ;;  %1191 = vrot.lane.b32.xlu0 %v3191_v59, %s2758_s14 }
  0xb4   : > { %916 = vst.msk [vmem:[#allocation3 + $0x120] sm:$0xff] %vm903_vm5, %v880_v10  ;;  %1842 = vmatmul.mubr.bf16.vlgmr.msra.gmra.mrb[0].mxu0 %v1562_v12 }
  0xb5   : > { %740 = vrot.lane.b32.xlu1 %v1407_v6, %s2758_s14  ;;  %v1459_v28 = vpop.permute.xlu0 %1458 }
  0xb6   : > { %1494 = vst.msk [vmem:[#allocation3 + $0x128] sm:$0xff] %vm1032_vm6, %v1459_v28 }
  0xb7   : > { %v1009_v31 = vpop.permute.xlu1 %1008  ;;  %1320 = vrot.lane.b32.xlu0 %v3208_v16, %s2759_s15 }
  0xb8   : > { %1045 = vst.msk [vmem:[#allocation3 + $0x120] sm:$0xff] %vm1032_vm6, %v1009_v31 }
  0xb9   : > { %869 = vrot.lane.b32.xlu1 %v1151_v49, %s2759_s15  ;;  %v1180_v22 = vpop.permute.xlu0 %1179 }
  0xba   : > { %1226 = vst.msk [vmem:[#allocation3 + $0x20] sm:$0xff] %vm774_vm4, %v1180_v22 }
  0xbb   : > { %v729_v29 = vpop.permute.xlu1 %728  ;;  %1448 = vrot.lane.b32.xlu0 %v3210_v18, %s2760_s19 }
  0xbc   : > { %776 = vst.msk [vmem:[#allocation3 + $0x18] sm:$0xff] %vm774_vm4, %v729_v29 }
  0xbd   : > { %998 = vrot.lane.b32.xlu1 %v1280_v62, %s2760_s19  ;;  %v1309_v24 = vpop.permute.xlu0 %1308  ;;  %v1599_v41 = vld [vmem:[#allocation3 + $0x128] sm:$0xff] }
  0xbe   : > { %1355 = vst.msk [vmem:[#allocation3 + $0x20] sm:$0xff] %vm903_vm5, %v1309_v24  ;;  %1937 = vmatprep.mubr.bf16.mxu1 %v1599_v41 }
  0xbf   : > { %v858_v44 = vpop.permute.xlu1 %857  ;;  %v1598_v45 = vld [vmem:[#allocation3 + $0x120] sm:$0xff]  ;;  %1193 = vrot.lane.b32.xlu0 %v3215_v27, %s2758_s14 }
  0xc0   : > { %905 = vst.msk [vmem:[#allocation3 + $0x18] sm:$0xff] %vm903_vm5, %v858_v44  ;;  %1938 = vmatmul.mubr.bf16.vlgmr.msra.gmra.mrb[0].mxu1 %v1598_v45  ;;  %v1573_v44 = vld [vmem:[#allocation3 + $0x58] sm:$0xff] }
  0xc1   : > { %742 = vrot.lane.b32.xlu1 %v3187_v53, %s2758_s14  ;;  %2579 = vmatpush3.bf16.msra.mxu1 %v3308_v46  ;;  %v1437_v47 = vpop.permute.xlu0 %1436 }
  0xc2   : > { %2580 = vmatprep.subr.bf16.mxu1 %v2692_v42  ;;  %1483 = vst.msk [vmem:[#allocation3 + $0x20] sm:$0xff] %vm1032_vm6, %v1437_v47  ;;  %v1576_v47 = vld [vmem:[#allocation3 + $0x70] sm:$0xff] }
  0xc3   : > { %v987_v6 = vpop.permute.xlu1 %986  ;;  %1322 = vrot.lane.b32.xlu0 %v3235_v33, %s2759_s15 }
  0xc4   : > { %1034 = vst.msk [vmem:[#allocation3 + $0x18] sm:$0xff] %vm1032_vm6, %v987_v6 }
  0xc5   : > { %871 = vrot.lane.b32.xlu1 %v3191_v59, %s2759_s15  ;;  %2581 = vmatpush3.bf16.msra.mxu1 %v2692_v42  ;;  %v1204_v51 = vpop.permute.xlu0 %1203 }
  0xc6   : > { %1238 = vst.msk [vmem:[#allocation3 + $0x140] sm:$0xff] %vm774_vm4, %v1204_v51 }
  0xc7   : > { %v753_v53 = vpop.permute.xlu1 %752  ;;  %1450 = vrot.lane.b32.xlu0 %v3237_v39, %s2760_s19 }
  0xc8   : > { %788 = vst.msk [vmem:[#allocation3 + $0x138] sm:$0xff] %vm774_vm4, %v753_v53 }
  0xc9   : > { %1000 = vrot.lane.b32.xlu1 %v3208_v16, %s2760_s19  ;;  %v1333_v46 = vpop.permute.xlu0 %1332  ;;  %v1566_v48 = vld [vmem:[#allocation3 + $0x20] sm:$0xff] }
  0xca   : > { %1367 = vst.msk [vmem:[#allocation3 + $0x140] sm:$0xff] %vm903_vm5, %v1333_v46  ;;  %1849 = vmatprep.mubr.bf16.mxu0 %v1566_v48  ;;  %v1579_v46 = vld [vmem:[#allocation3 + $0x88] sm:$0xff] }
  0xcb   : > { %v882_v49 = vpop.permute.xlu1 %881  ;;  %v1565_v59 = vld [vmem:[#allocation3 + $0x18] sm:$0xff]  ;;  %1195 = vrot.lane.b32.xlu0 %v3239_v40, %s2758_s14 }
  0xcc   : > { %917 = vst.msk [vmem:[#allocation3 + $0x138] sm:$0xff] %vm903_vm5, %v882_v49  ;;  %1850 = vmatmul.mubr.bf16.gmra.mrb[4].mxu0 %v1565_v59  ;;  %v1582_v59 = vld [vmem:[#allocation3 + $0xa0] sm:$0xff] }
  0xcd   : > { %744 = vrot.lane.b32.xlu1 %v3210_v18, %s2758_s14  ;;  %v1461_v26 = vpop.permute.xlu0 %1460 }
  0xce   : > { %1495 = vst.msk [vmem:[#allocation3 + $0x140] sm:$0xff] %vm1032_vm6, %v1461_v26 }
  0xcf   : > { %v1011_v16 = vpop.permute.xlu1 %1010  ;;  %1324 = vrot.lane.b32.xlu0 %v3253_v4, %s2759_s15 }
  0xd0   : > { %1046 = vst.msk [vmem:[#allocation3 + $0x138] sm:$0xff] %vm1032_vm6, %v1011_v16 }
  0xd1   : > { %873 = vrot.lane.b32.xlu1 %v3215_v27, %s2759_s15  ;;  %v1182_v50 = vpop.permute.xlu0 %1181 }
  0xd2   : > { %1227 = vst.msk [vmem:[#allocation3 + $0x38] sm:$0xff] %vm774_vm4, %v1182_v50 }
  0xd3   : > { %v731_v52 = vpop.permute.xlu1 %730  ;;  %1452 = vrot.lane.b32.xlu0 %v3255_v55, %s2760_s19 }
  0xd4   : > { %777 = vst.msk [vmem:[#allocation3 + $0x30] sm:$0xff] %vm774_vm4, %v731_v52 }
  0xd5   : > { %1002 = vrot.lane.b32.xlu1 %v3235_v33, %s2760_s19  ;;  %v1311_v18 = vpop.permute.xlu0 %1310  ;;  %v1602_v58 = vld [vmem:[#allocation3 + $0x140] sm:$0xff] }
  0xd6   : > { %1356 = vst.msk [vmem:[#allocation3 + $0x38] sm:$0xff] %vm903_vm5, %v1311_v18  ;;  %1945 = vmatprep.mubr.bf16.mxu1 %v1602_v58  ;;  %v1585_v18 = vld [vmem:[#allocation3 + $0xb8] sm:$0xff] }
  0xd7   : > { %v860_v60 = vpop.permute.xlu1 %859  ;;  %v1601_v11 = vld [vmem:[#allocation3 + $0x138] sm:$0xff]  ;;  %1197 = vrot.lane.b32.xlu0 %v3257_v19, %s2758_s14 }
  0xd8   : > { %906 = vst.msk [vmem:[#allocation3 + $0x30] sm:$0xff] %vm903_vm5, %v860_v60  ;;  %1946 = vmatmul.mubr.bf16.gmra.mrb[4].mxu1 %v1601_v11  ;;  %v1588_v60 = vld [vmem:[#allocation3 + $0xd0] sm:$0xff] }
  0xd9   : > { %746 = vrot.lane.b32.xlu1 %v3237_v39, %s2758_s14  ;;  %v1439_v27 = vpop.permute.xlu0 %1438 }
  0xda   : > { %1484 = vst.msk [vmem:[#allocation3 + $0x38] sm:$0xff] %vm1032_vm6, %v1439_v27 }
  0xdb   : > { %v989_v33 = vpop.permute.xlu1 %988  ;;  %1326 = vrot.lane.b32.xlu0 %v3111_v21, %s2759_s15 }
  0xdc   : > { %1035 = vst.msk [vmem:[#allocation3 + $0x30] sm:$0xff] %vm1032_vm6, %v989_v33 }
  0xdd   : > { %875 = vrot.lane.b32.xlu1 %v3239_v40, %s2759_s15  ;;  %v1206_v61 = vpop.permute.xlu0 %1205  ;;  %v1393_v40 = vld [vmem:[#allocation2 + $0x141] sm:$0xff] }
  0xde   : > { %1239 = vst.msk [vmem:[#allocation3 + $0x158] sm:$0xff] %vm774_vm4, %v1206_v61 }
  0xdf   : > { %v755_v62 = vpop.permute.xlu1 %754  ;;  %1454 = vrot.lane.b32.xlu0 %v3202_v15, %s2760_s19  ;;  %v1392_v15 = vld [vmem:[#allocation2 + $0x139] sm:$0xff] }
  0xe0   : > { %789 = vst.msk [vmem:[#allocation3 + $0x150] sm:$0xff] %vm774_vm4, %v755_v62  ;;  %v1413_v2 = vpack.c.bf16 %v1393_v40, %v1392_v15 }
  0xe1   : > { %1004 = vrot.lane.b32.xlu1 %v3253_v4, %s2760_s19  ;;  %v1335_v39 = vpop.permute.xlu0 %1334  ;;  %v1569_v63 = vld [vmem:[#allocation3 + $0x38] sm:$0xff] }
  0xe2   : > { %1368 = vst.msk [vmem:[#allocation3 + $0x158] sm:$0xff] %vm903_vm5, %v1335_v39  ;;  %1857 = vmatprep.mubr.bf16.mxu0 %v1569_v63  ;;  %v1591_v39 = vld [vmem:[#allocation3 + $0xe8] sm:$0xff] }
  0xe3   : > { %v884_v0 = vpop.permute.xlu1 %883  ;;  %v1568_v1 = vld [vmem:[#allocation3 + $0x30] sm:$0xff]  ;;  %1199 = vrot.lane.b32.xlu0 %v3217_v56, %s2758_s14 }
  0xe4   : > { %918 = vst.msk [vmem:[#allocation3 + $0x150] sm:$0xff] %vm903_vm5, %v884_v0  ;;  %1858 = vmatmul.mubr.bf16.gmra.mrb[8].mxu0 %v1568_v1  ;;  %v1594_v0 = vld [vmem:[#allocation3 + $0x100] sm:$0xff] }
  0xe5   : > { %748 = vrot.lane.b32.xlu1 %v3255_v55, %s2758_s14  ;;  %v1463_v17 = vpop.permute.xlu0 %1462  ;;  %s2367_s14 = sshll.u32 %s2906_s11, 8 }
  0xe6   : > { %1496 = vst.msk [vmem:[#allocation3 + $0x158] sm:$0xff] %vm1032_vm6, %v1463_v17  ;;  %v1597_v17 = vld [vmem:[#allocation3 + $0x118] sm:$0xff]  ;;  %s3552_s28 = scalar_lea.vmem %s3781_s5, %s2367_s14  ;;  %s2761_s14 = smov [#allocation4]  }
  0xe7   : > { %v1013_v4 = vpop.permute.xlu1 %1012  ;;  %1328 = vrot.lane.b32.xlu0 %v3151_v13, %s2759_s15 }
  0xe8   : > { %1047 = vst.msk [vmem:[#allocation3 + $0x150] sm:$0xff] %vm1032_vm6, %v1013_v4 }
  0xe9   : > { %877 = vrot.lane.b32.xlu1 %v3257_v19, %s2759_s15  ;;  %v1184_v56 = vpop.permute.xlu0 %1183  ;;  %s257_s15 = sand.u32 1, %s2747_s22  }
  0xea   : > { %1228 = vst.msk [vmem:[#allocation3 + $0x50] sm:$0xff] %vm774_vm4, %v1184_v56  ;;  %v1600_v56 = vld [vmem:[#allocation3 + $0x130] sm:$0xff]  ;;  %s2319_s11 = sshll.u32 %s257_s15, 8  ;;  %s3735_s25 = scalar_lea.sflag [#allocation5], %s257_s15 }
  0xeb   : > { %v733_v3 = vpop.permute.xlu1 %732  ;;  %1456 = vrot.lane.b32.xlu0 %v1413_v2, %s2760_s19  ;;  %s3569_s12 = scalar_lea.vmem [#allocation4], %s2319_s11 }
  0xec   : > { %778 = vst.msk [vmem:[#allocation3 + $0x48] sm:$0xff] %vm774_vm4, %v733_v3  ;;  %s2241_s16 = sshll.u32 %s3569_s12, 4  ;;  %s3727_s16 = int_to_ptr.vmem [resolvable:$true] %s2241_s16 }
  0xed   : > { %1006 = vrot.lane.b32.xlu1 %v3111_v21, %s2760_s19  ;;  %v1313_v55 = vpop.permute.xlu0 %1312  ;;  %v1605_v37 = vld [vmem:[#allocation3 + $0x158] sm:$0xff]  ;;  %s2693_s20 = scalar_lea.vmem %s3727_s16, 4096  ;;  %s2697_s19 = sshll.u32 %s2761_s14, 4  ;;  %s2698_s19 = int_to_ptr.vmem [resolvable:$false] %s2697_s19 }
  0xee   : > { %1357 = vst.msk [vmem:[#allocation3 + $0x50] sm:$0xff] %vm903_vm5, %v1313_v55  ;;  %1953 = vmatprep.mubr.bf16.mxu1 %v1605_v37  ;;  %p2694_p11 = scmp.ne.s32.totalorder %s3727_s16, %s2693_s20  ;;  %s2699_s26 = scalar_lea.vmem %s2698_s19, 8192 }
  0xef   : > { %v862_v13 = vpop.permute.xlu1 %861  ;;  %v1604_v57 = vld [vmem:[#allocation3 + $0x150] sm:$0xff]  ;;  %p2700_p0 = scmp.lt.s32.totalorder %s3727_s16, %s2698_s19  ;;  %p2701_p1 = scmp.lt.s32.totalorder %s2699_s26, %s2693_s20 }
  0xf0   : > { %907 = vst.msk [vmem:[#allocation3 + $0x48] sm:$0xff] %vm903_vm5, %v862_v13  ;;  %1954 = vmatmul.mubr.bf16.gmra.mrb[8].mxu1 %v1604_v57  ;;  %v1603_v57 = vld [vmem:[#allocation3 + $0x148] sm:$0xff]  ;;  %p2695_p12 = pnand %p2694_p11, %p2837_p5 }
  0xf1   : > { %v1441_v19 = vpop.permute.xlu0 %1440  ;;  %p2702_p2 = por %p2701_p1, %p2700_p0 }
  0xf2   : > { %1485 = vst.msk [vmem:[#allocation3 + $0x50] sm:$0xff] %vm1032_vm6, %v1441_v19  ;;  %p2696_p13 = pneg %p2695_p12 }
  0xf3   : > { %v991_v5 = vpop.permute.xlu1 %990 }
  0xf4   : > { %1036 = vst.msk [vmem:[#allocation3 + $0x48] sm:$0xff] %vm1032_vm6, %v991_v5  ;;  %v1606_v5 = vld [vmem:[#allocation3 + $0x160] sm:$0xff]  ;;  %p2703_p3 = pnand %p2702_p2, %p2696_p13 }
  0xf5   : > { %v1208_v7 = vpop.permute.xlu0 %1207 }
  0xf6   : > { %1240 = vst.msk [vmem:[#allocation3 + $0x170] sm:$0xff] %vm774_vm4, %v1208_v7 }
  0xf7   : > { %v757_v21 = vpop.permute.xlu1 %756 }
  0xf8   : > { %790 = vst.msk [vmem:[#allocation3 + $0x168] sm:$0xff] %vm774_vm4, %v757_v21 }
  0xf9   : > { %v1337_v9 = vpop.permute.xlu0 %1336  ;;  %v1572_v8 = vld [vmem:[#allocation3 + $0x50] sm:$0xff] }
  0xfa   : > { %1369 = vst.msk [vmem:[#allocation3 + $0x170] sm:$0xff] %vm903_vm5, %v1337_v9  ;;  %1865 = vmatprep.mubr.bf16.mxu0 %v1572_v8 }
  0xfb   : > { %v886_v10 = vpop.permute.xlu1 %885  ;;  %v1571_v12 = vld [vmem:[#allocation3 + $0x48] sm:$0xff] }
  0xfc   : > { %919 = vst.msk [vmem:[#allocation3 + $0x168] sm:$0xff] %vm903_vm5, %v886_v10  ;;  %1866 = vmatmul.mubr.bf16.gmra.mrb[12].mxu0 %v1571_v12  ;;  %v1609_v12 = vld [vmem:[#allocation3 + $0x178] sm:$0xff] }
  0xfd   : > { %v1465_v14 = vpop.permute.xlu0 %1464 }
  0xfe   : > { %1497 = vst.msk [vmem:[#allocation3 + $0x170] sm:$0xff] %vm1032_vm6, %v1465_v14 }
  0xff   : > { %v1015_v20 = vpop.permute.xlu1 %1014 }
 0x100   : > { %1048 = vst.msk [vmem:[#allocation3 + $0x168] sm:$0xff] %vm1032_vm6, %v1015_v20 }
 0x101   : > { %v1186_v23 = vpop.permute.xlu0 %1185 }
 0x102   : > { %1229 = vst.msk [vmem:[#allocation3 + $0x68] sm:$0xff] %vm774_vm4, %v1186_v23 }
 0x103   : > { %v735_v25 = vpop.permute.xlu1 %734 }
 0x104   : > { %779 = vst.msk [vmem:[#allocation3 + $0x60] sm:$0xff] %vm774_vm4, %v735_v25 }
 0x105   : > { %v1315_v35 = vpop.permute.xlu0 %1314  ;;  %v1608_v28 = vld [vmem:[#allocation3 + $0x170] sm:$0xff] }
 0x106   : > { %1358 = vst.msk [vmem:[#allocation3 + $0x68] sm:$0xff] %vm903_vm5, %v1315_v35  ;;  %1961 = vmatprep.mubr.bf16.mxu1 %v1608_v28 }
 0x107   : > { %v864_v31 = vpop.permute.xlu1 %863  ;;  %v1607_v22 = vld [vmem:[#allocation3 + $0x168] sm:$0xff] }
 0x108   : > { %908 = vst.msk [vmem:[#allocation3 + $0x60] sm:$0xff] %vm903_vm5, %v864_v31  ;;  %1962 = vmatmul.mubr.bf16.gmra.mrb[12].mxu1 %v1607_v22 }
 0x109   : > { %2582 = vmatprep.mubr.msk.bf16.mxu1 %vm509_vm0, %v1564_v54  ;;  %v1443_v29 = vpop.permute.xlu0 %1442 }
 0x10a   : > { %1486 = vst.msk [vmem:[#allocation3 + $0x68] sm:$0xff] %vm1032_vm6, %v1443_v29 }
 0x10b   : > { %v993_v32 = vpop.permute.xlu1 %992 }
 0x10c   : > { %1037 = vst.msk [vmem:[#allocation3 + $0x60] sm:$0xff] %vm1032_vm6, %v993_v32 }
 0x10d   : > { %v1188_v36 = vpop.permute.xlu0 %1187 }
 0x10e   : > { %1230 = vst.msk [vmem:[#allocation3 + $0x80] sm:$0xff] %vm774_vm4, %v1188_v36 }
 0x10f   : > { %v737_v38 = vpop.permute.xlu1 %736 }
 0x110   : > { %780 = vst.msk [vmem:[#allocation3 + $0x78] sm:$0xff] %vm774_vm4, %v737_v38  ;;  %2583 = vmatmul.mubr.msk.bf16.vlgmr.msra.gmra.mrb[16].mxu1 %vm509_vm0, %v1567_v34 }
 0x111   : > { %2586 = vmatprep.mubr.msk.bf16.mxu1 %vm509_vm0, %v1570_v30  ;;  %v1317_v24 = vpop.permute.xlu0 %1316  ;;  %v1575_v41 = vld [vmem:[#allocation3 + $0x68] sm:$0xff] }
 0x112   : > { %1359 = vst.msk [vmem:[#allocation3 + $0x80] sm:$0xff] %vm903_vm5, %v1317_v24  ;;  %1873 = vmatprep.mubr.bf16.mxu0 %v1575_v41 }
 0x113   : > { %v866_v42 = vpop.permute.xlu1 %865  ;;  %v1574_v43 = vld [vmem:[#allocation3 + $0x60] sm:$0xff] }
 0x114   : > { %909 = vst.msk [vmem:[#allocation3 + $0x78] sm:$0xff] %vm903_vm5, %v866_v42  ;;  %1874 = vmatmul.mubr.bf16.gmra.mrb[16].mxu0 %v1574_v43 }
 0x115   : > { %v1445_v45 = vpop.permute.xlu0 %1444 }
 0x116   : > { %1487 = vst.msk [vmem:[#allocation3 + $0x80] sm:$0xff] %vm1032_vm6, %v1445_v45 }
 0x117   : > { %v995_v6 = vpop.permute.xlu1 %994 }
 0x118   : > { %1038 = vst.msk [vmem:[#allocation3 + $0x78] sm:$0xff] %vm1032_vm6, %v995_v6  ;;  %2587 = vmatmul.mubr.msk.bf16.gmra.mrb[20].mxu1 %vm509_vm0, %v1573_v44 }
 0x119   : > { %2590 = vmatprep.mubr.msk.bf16.mxu1 %vm509_vm0, %v1576_v47  ;;  %v1190_v51 = vpop.permute.xlu0 %1189 }
 0x11a   : > { %1231 = vst.msk [vmem:[#allocation3 + $0x98] sm:$0xff] %vm774_vm4, %v1190_v51 }
 0x11b   : > { %v739_v53 = vpop.permute.xlu1 %738 }
 0x11c   : > { %781 = vst.msk [vmem:[#allocation3 + $0x90] sm:$0xff] %vm774_vm4, %v739_v53 }
 0x11d   : > { %v1319_v48 = vpop.permute.xlu0 %1318  ;;  %v1578_v49 = vld [vmem:[#allocation3 + $0x80] sm:$0xff] }
 0x11e   : > { %1360 = vst.msk [vmem:[#allocation3 + $0x98] sm:$0xff] %vm903_vm5, %v1319_v48  ;;  %1881 = vmatprep.mubr.bf16.mxu0 %v1578_v49 }
 0x11f   : > { %v868_v26 = vpop.permute.xlu1 %867  ;;  %v1577_v16 = vld [vmem:[#allocation3 + $0x78] sm:$0xff] }
 0x120   : > { %910 = vst.msk [vmem:[#allocation3 + $0x90] sm:$0xff] %vm903_vm5, %v868_v26  ;;  %1882 = vmatmul.mubr.bf16.gmra.mrb[20].mxu0 %v1577_v16  ;;  %2591 = vmatmul.mubr.msk.bf16.gmra.mrb[24].mxu1 %vm509_vm0, %v1579_v46 }
 0x121   : > { %2594 = vmatprep.mubr.msk.bf16.mxu1 %vm509_vm0, %v1582_v59  ;;  %v1447_v50 = vpop.permute.xlu0 %1446 }
 0x122   : > { %1488 = vst.msk [vmem:[#allocation3 + $0x98] sm:$0xff] %vm1032_vm6, %v1447_v50 }
 0x123   : > { %v997_v52 = vpop.permute.xlu1 %996 }
 0x124   : > { %1039 = vst.msk [vmem:[#allocation3 + $0x90] sm:$0xff] %vm1032_vm6, %v997_v52 }
 0x125   : > { %v1192_v58 = vpop.permute.xlu0 %1191 }
 0x126   : > { %1232 = vst.msk [vmem:[#allocation3 + $0xb0] sm:$0xff] %vm774_vm4, %v1192_v58 }
 0x127   : > { %v741_v11 = vpop.permute.xlu1 %740 }
 0x128   : > { %782 = vst.msk [vmem:[#allocation3 + $0xa8] sm:$0xff] %vm774_vm4, %v741_v11  ;;  %2595 = vmatmul.mubr.msk.bf16.gmra.mrb[28].mxu1 %vm509_vm0, %v1585_v18 }
 0x129   : > { %2598 = vmatprep.mubr.msk.bf16.mxu1 %vm509_vm0, %v1588_v60  ;;  %v1321_v27 = vpop.permute.xlu0 %1320  ;;  %v1581_v33 = vld [vmem:[#allocation3 + $0x98] sm:$0xff] }
 0x12a   : > { %1361 = vst.msk [vmem:[#allocation3 + $0xb0] sm:$0xff] %vm903_vm5, %v1321_v27  ;;  %1889 = vmatprep.mubr.bf16.mxu0 %v1581_v33 }
 0x12b   : > { %v870_v61 = vpop.permute.xlu1 %869  ;;  %v1580_v62 = vld [vmem:[#allocation3 + $0x90] sm:$0xff] }
 0x12c   : > { %911 = vst.msk [vmem:[#allocation3 + $0xa8] sm:$0xff] %vm903_vm5, %v870_v61  ;;  %1890 = vmatmul.mubr.bf16.gmra.mrb[24].mxu0 %v1580_v62 }
 0x12d   : > { %v1449_v63 = vpop.permute.xlu0 %1448 }
 0x12e   : > { %1489 = vst.msk [vmem:[#allocation3 + $0xb0] sm:$0xff] %vm1032_vm6, %v1449_v63 }
 0x12f   : > { %v999_v1 = vpop.permute.xlu1 %998 }
 0x130   : > { %1040 = vst.msk [vmem:[#allocation3 + $0xa8] sm:$0xff] %vm1032_vm6, %v999_v1  ;;  %2599 = vmatmul.mubr.msk.bf16.gmra.mrb[32].mxu1 %vm509_vm0, %v1591_v39 }
 0x131   : > { %2602 = vmatprep.mubr.msk.bf16.mxu1 %vm509_vm0, %v1594_v0  ;;  %v1194_v15 = vpop.permute.xlu0 %1193 }
 0x132   : > { %1233 = vst.msk [vmem:[#allocation3 + $0xc8] sm:$0xff] %vm774_vm4, %v1194_v15 }
 0x133   : > { %v743_v40 = vpop.permute.xlu1 %742 }
 0x134   : > { %783 = vst.msk [vmem:[#allocation3 + $0xc0] sm:$0xff] %vm774_vm4, %v743_v40 }
 0x135   : > { %v1323_v4 = vpop.permute.xlu0 %1322  ;;  %v1584_v2 = vld [vmem:[#allocation3 + $0xb0] sm:$0xff] }
 0x136   : > { %1362 = vst.msk [vmem:[#allocation3 + $0xc8] sm:$0xff] %vm903_vm5, %v1323_v4  ;;  %1897 = vmatprep.mubr.bf16.mxu0 %v1584_v2 }
 0x137   : > { %v872_v3 = vpop.permute.xlu1 %871  ;;  %v1583_v55 = vld [vmem:[#allocation3 + $0xa8] sm:$0xff] }
 0x138   : > { %912 = vst.msk [vmem:[#allocation3 + $0xc0] sm:$0xff] %vm903_vm5, %v872_v3  ;;  %1898 = vmatmul.mubr.bf16.gmra.mrb[28].mxu0 %v1583_v55  ;;  %2603 = vmatmul.mubr.msk.bf16.gmra.mrb[36].mxu1 %vm509_vm0, %v1597_v17 }
 0x139   : > { %2606 = vmatprep.mubr.msk.bf16.mxu1 %vm509_vm0, %v1600_v56  ;;  %v1451_v37 = vpop.permute.xlu0 %1450 }
 0x13a   : > { %1490 = vst.msk [vmem:[#allocation3 + $0xc8] sm:$0xff] %vm1032_vm6, %v1451_v37 }
 0x13b   : > { %v1001_v13 = vpop.permute.xlu1 %1000 }
 0x13c   : > { %1041 = vst.msk [vmem:[#allocation3 + $0xc0] sm:$0xff] %vm1032_vm6, %v1001_v13 }
 0x13d   : > { %v1196_v19 = vpop.permute.xlu0 %1195 }
 0x13e   : > { %1234 = vst.msk [vmem:[#allocation3 + $0xe0] sm:$0xff] %vm774_vm4, %v1196_v19 }
 0x13f   : > { %v745_v7 = vpop.permute.xlu1 %744 }
 0x140   : > { %784 = vst.msk [vmem:[#allocation3 + $0xd8] sm:$0xff] %vm774_vm4, %v745_v7  ;;  %2607 = vmatmul.mubr.msk.bf16.gmra.mrb[40].mxu1 %vm509_vm0, %v1603_v57 }
 0x141   : > { %2610 = vmatprep.mubr.msk.bf16.mxu1 %vm509_vm0, %v1606_v5  ;;  %v1325_v21 = vpop.permute.xlu0 %1324  ;;  %v1587_v9 = vld [vmem:[#allocation3 + $0xc8] sm:$0xff] }
 0x142   : > { %1363 = vst.msk [vmem:[#allocation3 + $0xe0] sm:$0xff] %vm903_vm5, %v1325_v21  ;;  %1905 = vmatprep.mubr.bf16.mxu0 %v1587_v9 }
 0x143   : > { %v874_v8 = vpop.permute.xlu1 %873  ;;  %v1586_v10 = vld [vmem:[#allocation3 + $0xc0] sm:$0xff] }
 0x144   : > { %913 = vst.msk [vmem:[#allocation3 + $0xd8] sm:$0xff] %vm903_vm5, %v874_v8  ;;  %1906 = vmatmul.mubr.bf16.gmra.mrb[32].mxu0 %v1586_v10 }
 0x145   : > { %v1453_v14 = vpop.permute.xlu0 %1452 }
 0x146   : > { %1491 = vst.msk [vmem:[#allocation3 + $0xe0] sm:$0xff] %vm1032_vm6, %v1453_v14 }
 0x147   : > { %v1003_v20 = vpop.permute.xlu1 %1002 }
 0x148   : > { %1042 = vst.msk [vmem:[#allocation3 + $0xd8] sm:$0xff] %vm1032_vm6, %v1003_v20  ;;  %2611 = vmatmul.mubr.msk.bf16.gmra.mrb[44].mxu1 %vm509_vm0, %v1609_v12 }
 0x149   : > { %v1198_v23 = vpop.permute.xlu0 %1197 }
 0x14a   : > { %1235 = vst.msk [vmem:[#allocation3 + $0xf8] sm:$0xff] %vm774_vm4, %v1198_v23 }
 0x14b   : > { %v747_v25 = vpop.permute.xlu1 %746 }
 0x14c   : > { %785 = vst.msk [vmem:[#allocation3 + $0xf0] sm:$0xff] %vm774_vm4, %v747_v25 }
 0x14d   : > { %v1327_v35 = vpop.permute.xlu0 %1326  ;;  %v1590_v28 = vld [vmem:[#allocation3 + $0xe0] sm:$0xff] }
 0x14e   : > { %1364 = vst.msk [vmem:[#allocation3 + $0xf8] sm:$0xff] %vm903_vm5, %v1327_v35  ;;  %1913 = vmatprep.mubr.bf16.mxu0 %v1590_v28  ;;  %v3557_v35 = vld [vmem:[%s3780_s4] ss:$0 sm:$0xff] }
 0x14f   : > { %v876_v54 = vpop.permute.xlu1 %875  ;;  %v1589_v31 = vld [vmem:[#allocation3 + $0xd8] sm:$0xff] }
 0x150   : > { %914 = vst.msk [vmem:[#allocation3 + $0xf0] sm:$0xff] %vm903_vm5, %v876_v54  ;;  %1914 = vmatmul.mubr.bf16.gmra.mrb[36].mxu0 %v1589_v31  ;;  %v2133_v31 = vld [vmem:[%s3552_s28 + $0x10] sm:$0xff] }
 0x151   : > { %v1455_v22 = vpop.permute.xlu0 %1454 }
 0x152   : > { %1492 = vst.msk [vmem:[#allocation3 + $0xf8] sm:$0xff] %vm1032_vm6, %v1455_v22 }
 0x153   : > { %v1005_v29 = vpop.permute.xlu1 %1004 }
 0x154   : > { %1043 = vst.msk [vmem:[#allocation3 + $0xf0] sm:$0xff] %vm1032_vm6, %v1005_v29 }
 0x155   : > { %v1200_v32 = vpop.permute.xlu0 %1199 }
 0x156   : > { %1236 = vst.msk [vmem:[#allocation3 + $0x110] sm:$0xff] %vm774_vm4, %v1200_v32 }
 0x157   : > { %v749_v34 = vpop.permute.xlu1 %748 }
 0x158   : > { %786 = vst.msk [vmem:[#allocation3 + $0x108] sm:$0xff] %vm774_vm4, %v749_v34  ;;  %v2131_v34 = vld [vmem:[%s3552_s28] sm:$0xff] }
 0x159   : > { %v1329_v36 = vpop.permute.xlu0 %1328  ;;  %v1593_v30 = vld [vmem:[#allocation3 + $0xf8] sm:$0xff] }
 0x15a   : > { %1365 = vst.msk [vmem:[#allocation3 + $0x110] sm:$0xff] %vm903_vm5, %v1329_v36  ;;  %1921 = vmatprep.mubr.bf16.mxu0 %v1593_v30 }
 0x15b   : > { %v878_v38 = vpop.permute.xlu1 %877  ;;  %v1592_v24 = vld [vmem:[#allocation3 + $0xf0] sm:$0xff] }
 0x15c   : > { %915 = vst.msk [vmem:[#allocation3 + $0x108] sm:$0xff] %vm903_vm5, %v878_v38  ;;  %1922 = vmatmul.mubr.bf16.gmra.mrb[40].mxu0 %v1592_v24  ;;  %v2134_v24 = vld [vmem:[%s3552_s28 + $0x18] sm:$0xff] }
 0x15d   : > { %v1457_v41 = vpop.permute.xlu0 %1456 }
 0x15e   : > { %1493 = vst.msk [vmem:[#allocation3 + $0x110] sm:$0xff] %vm1032_vm6, %v1457_v41 }
 0x15f   : > { %v1007_v42 = vpop.permute.xlu1 %1006 }
 0x160   : > { %1044 = vst.msk [vmem:[#allocation3 + $0x108] sm:$0xff] %vm1032_vm6, %v1007_v42 }
 0x165   : > { %v1596_v43 = vld [vmem:[#allocation3 + $0x110] sm:$0xff] }
 0x166   : > { %1929 = vmatprep.mubr.bf16.mxu0 %v1596_v43 }
 0x167   : > { %v1595_v44 = vld [vmem:[#allocation3 + $0x108] sm:$0xff] }
 0x168   : > { %1930 = vmatmul.mubr.bf16.gmra.mrb[44].mxu0 %v1595_v44 }
 0x187   : > { %v2464_v45 = vpop.f32.mrb[0].mxu0 }
 0x188   : > { %v2465_v47 = vpop.f32.mrb[1].mxu0 }
 0x189   : > { %v2466_v6 = vadd.f32 %v2465_v47, %v2464_v45  ;;  %v2467_v51 = vpop.f32.mrb[2].mxu0  ;;  %v2132_v45 = vld [vmem:[%s3552_s28 + $0x8] sm:$0xff] }
 0x18a   : > { %v2468_v53 = vpop.f32.mrb[3].mxu0 }
 0x18b   : > { %v2469_v46 = vadd.f32 %v2468_v53, %v2467_v51  ;;  %v1844_v22 = vadd.f32 %v2466_v6, %v3557_v35 }
 0x18d   : > { %v1847_v41 = vadd.f32 %v2469_v46, %v3557_v35 }
 0x193   : > { %v2536_v48 = vpop.f32.mrb[0].mxu1 }
 0x194   : > { %v2537_v49 = vpop.f32.mrb[1].mxu1 }
 0x195   : > { %v3529_v59 = vadd.f32 %v2537_v49, %v2536_v48  ;;  %v2539_v26 = vpop.f32.mrb[2].mxu1 }
 0x196   : > { %v2540_v16 = vpop.f32.mrb[3].mxu1 }
 0x197   : > { %v3531_v50 = vadd.f32 %v2540_v16, %v2539_v26 }
 0x19f   : > { %v2470_v52 = vpop.f32.mrb[4].mxu0 }
 0x1a0   : > { %v2471_v18 = vpop.f32.mrb[5].mxu0 }
 0x1a1   : > { %v2472_v58 = vadd.f32 %v2471_v18, %v2470_v52  ;;  %v2473_v60 = vpop.f32.mrb[6].mxu0 }
 0x1a2   : > { %v2474_v11 = vpop.f32.mrb[7].mxu0 }
 0x1a3   : > { %v2475_v27 = vadd.f32 %v2474_v11, %v2473_v60  ;;  %v1852_v28 = vadd.f32 %v2472_v58, %v3557_v35  ;;  %v2137_v60 = vld [vmem:[%s3552_s28 + $0x30] sm:$0xff] }
 0x1a5   : > { %v1855_v36 = vadd.f32 %v2475_v27, %v3557_v35 }
 0x1ab   : > { %v2542_v33 = vpop.f32.mrb[4].mxu1 }
 0x1ac   : > { %v2543_v61 = vpop.f32.mrb[5].mxu1 }
 0x1ad   : > { %v3533_v62 = vadd.f32 %v2543_v61, %v2542_v33  ;;  %v2545_v39 = vpop.f32.mrb[6].mxu1  ;;  %v2135_v61 = vld [vmem:[%s3552_s28 + $0x20] sm:$0xff] }
 0x1ae   : > { %v2546_v63 = vpop.f32.mrb[7].mxu1 }
 0x1af   : > { %v3535_v0 = vadd.f32 %v2546_v63, %v2545_v39 }
 0x1b7   : > { %v2476_v1 = vpop.f32.mrb[8].mxu0 }
 0x1b8   : > { %v2477_v15 = vpop.f32.mrb[9].mxu0 }
 0x1b9   : > { %v2478_v40 = vadd.f32 %v2477_v15, %v2476_v1  ;;  %v2479_v17 = vpop.f32.mrb[10].mxu0  ;;  %v2138_v15 = vld [vmem:[%s3552_s28 + $0x38] sm:$0xff] }
 0x1ba   : > { %v2480_v4 = vpop.f32.mrb[11].mxu0 }
 0x1bb   : > { %v3537_v2 = vadd.f32 %v2480_v4, %v2479_v17  ;;  %v1860_v11 = vadd.f32 %v2478_v40, %v3557_v35 }
 0x1bd   : > { %v1863_v17 = vadd.f32 %v3537_v2, %v3557_v35 }
 0x1c3   : > { %v2548_v56 = vpop.f32.mrb[8].mxu1 }
 0x1c4   : > { %v2549_v3 = vpop.f32.mrb[9].mxu1 }
 0x1c5   : > { %v3539_v55 = vadd.f32 %v2549_v3, %v2548_v56  ;;  %v2551_v37 = vpop.f32.mrb[10].mxu1 }
 0x1c6   : > { %v2552_v13 = vpop.f32.mrb[11].mxu1 }
 0x1c7   : > { %v3541_v57 = vadd.f32 %v2552_v13, %v2551_v37  ;;  %v2136_v37 = vld [vmem:[%s3552_s28 + $0x28] sm:$0xff] }
 0x1cf   : > { %v2482_v19 = vpop.f32.mrb[12].mxu0 }
 0x1d0   : > { %v2483_v5 = vpop.f32.mrb[13].mxu0 }
 0x1d1   : > { %v2484_v7 = vadd.f32 %v2483_v5, %v2482_v19  ;;  %v2485_v21 = vpop.f32.mrb[14].mxu0 }
 0x1d2   : > { %v2486_v9 = vpop.f32.mrb[15].mxu0 }
 0x1d3   : > { %v2487_v8 = vadd.f32 %v2486_v9, %v2485_v21  ;;  %v1868_v52 = vadd.f32 %v2484_v7, %v3557_v35 }
 0x1d5   : > { %v1871_v39 = vadd.f32 %v2487_v8, %v3557_v35 }
 0x1db   : > { %v2554_v10 = vpop.f32.mrb[12].mxu1 }
 0x1dc   : > { %v2555_v12 = vpop.f32.mrb[13].mxu1 }
 0x1dd   : > { %v3544_v14 = vadd.f32 %v2555_v12, %v2554_v10  ;;  %v2557_v20 = vpop.f32.mrb[14].mxu1  ;;  %v2139_v10 = vld [vmem:[%s3552_s28 + $0x40] sm:$0xff] }
 0x1de   : > { %v2558_v23 = vpop.f32.mrb[15].mxu1 }
 0x1df   : > { %v3546_v25 = vadd.f32 %v2558_v23, %v2557_v20 }
 0x1e3   : > { %v2584_v54 = vpop.f32.mrb[16].mxu1 }
 0x1e4   : > { %v2013_v29 = vadd.f32 %v2584_v54, %v1852_v28  ;;  %v2004_v32 = vpop.f32.mrb[17].mxu1 }
 0x1e5   : > { %v2005_v30 = vadd.f32 %v2004_v32, %v1844_v22  ;;  %v2585_v38 = vpop.f32.mrb[18].mxu1 }
 0x1e6   : > { %v2165_v42 = vadd.f32 %v2133_v31, %v2013_v29  ;;  %v2016_v43 = vadd.f32 %v2585_v38, %v1855_v36  ;;  %v2007_v44 = vpop.f32.mrb[19].mxu1  ;;  %v2140_v29 = vld [vmem:[%s3552_s28 + $0x48] sm:$0xff]  ;;  %v2141_v38 = vld [vmem:[%s3552_s28 + $0x50] sm:$0xff] }
 0x1e7   : > { %v2163_v47 = vadd.f32 %v2131_v34, %v2005_v30  ;;  %v2008_v51 = vadd.f32 %v2007_v44, %v1847_v41  ;;  %v2488_v53 = vpop.f32.mrb[16].mxu0 }
 0x1e8   : > { %2197 = vst.msk [vmem:[%s3569_s12 + $0x10] sm:$0xff] %vm509_vm0, %v2165_v42  ;;  %v2166_v6 = vadd.f32 %v2134_v24, %v2016_v43  ;;  %v2489_v48 = vpop.f32.mrb[17].mxu0  ;;  %v2142_v43 = vld [vmem:[%s3552_s28 + $0x58] sm:$0xff] }
 0x1e9   : > { %2195 = vst.msk [vmem:[%s3569_s12] sm:$0xff] %vm509_vm0, %v2163_v47  ;;  %v2164_v46 = vadd.f32 %v2132_v45, %v2008_v51  ;;  %v2490_v49 = vadd.f32 %v2489_v48, %v2488_v53  ;;  %v2491_v26 = vpop.f32.mrb[18].mxu0 }
 0x1ea   : > { %2198 = vst.msk [vmem:[%s3569_s12 + $0x18] sm:$0xff] %vm509_vm0, %v2166_v6  ;;  %v2492_v16 = vpop.f32.mrb[19].mxu0 }
 0x1eb   : > { %2196 = vst.msk [vmem:[%s3569_s12 + $0x8] sm:$0xff] %vm509_vm0, %v2164_v46  ;;  %v2493_v18 = vadd.f32 %v2492_v16, %v2491_v26  ;;  %v2588_v58 = vpop.f32.mrb[20].mxu1  ;;  %v1876_v21 = vadd.f32 %v2490_v49, %v3557_v35 }
 0x1ec   : > { %v2029_v27 = vadd.f32 %v2588_v58, %v1868_v52  ;;  %v2020_v33 = vpop.f32.mrb[21].mxu1 }
 0x1ed   : > { %v2021_v63 = vadd.f32 %v2020_v33, %v1860_v11  ;;  %v2589_v1 = vpop.f32.mrb[22].mxu1  ;;  %v1879_v54 = vadd.f32 %v2493_v18, %v3557_v35  ;;  %v2143_v11 = vld [vmem:[%s3552_s28 + $0x60] sm:$0xff] }
 0x1ee   : > { %v2169_v4 = vadd.f32 %v2137_v60, %v2029_v27  ;;  %v2032_v56 = vadd.f32 %v2589_v1, %v1871_v39  ;;  %v2023_v3 = vpop.f32.mrb[23].mxu1 }
 0x1ef   : > { %v2167_v40 = vadd.f32 %v2135_v61, %v2021_v63  ;;  %v2024_v13 = vadd.f32 %v2023_v3, %v1863_v17  ;;  %v2144_v63 = vld [vmem:[%s3552_s28 + $0x68] sm:$0xff] }
 0x1f0   : > { %2201 = vst.msk [vmem:[%s3569_s12 + $0x30] sm:$0xff] %vm509_vm0, %v2169_v4  ;;  %v2170_v19 = vadd.f32 %v2138_v15, %v2032_v56 }
 0x1f1   : > { %2199 = vst.msk [vmem:[%s3569_s12 + $0x20] sm:$0xff] %vm509_vm0, %v2167_v40  ;;  %v2168_v5 = vadd.f32 %v2136_v37, %v2024_v13 }
 0x1f2   : > { %2202 = vst.msk [vmem:[%s3569_s12 + $0x38] sm:$0xff] %vm509_vm0, %v2170_v19 }
 0x1f3   : > { %2200 = vst.msk [vmem:[%s3569_s12 + $0x28] sm:$0xff] %vm509_vm0, %v2168_v5  ;;  %v2494_v7 = vpop.f32.mrb[20].mxu0  ;;  %v2592_v2 = vpop.f32.mrb[24].mxu1 }
 0x1f4   : > { %v2495_v9 = vpop.f32.mrb[21].mxu0  ;;  %v2036_v8 = vpop.f32.mrb[25].mxu1 }
 0x1f5   : > { %v2496_v12 = vadd.f32 %v2495_v9, %v2494_v7  ;;  %v2037_v20 = vadd.f32 %v2036_v8, %v1876_v21  ;;  %v2497_v23 = vpop.f32.mrb[22].mxu0  ;;  %v2593_v28 = vpop.f32.mrb[26].mxu1  ;;  %v2145_v8 = vld [vmem:[%s3552_s28 + $0x70] sm:$0xff] }
 0x1f6   : > { %v2498_v31 = vpop.f32.mrb[23].mxu0  ;;  %v2039_v22 = vpop.f32.mrb[27].mxu1 }
 0x1f7   : > { %v1884_v32 = vadd.f32 %v2496_v12, %v3557_v35  ;;  %v2171_v34 = vadd.f32 %v2139_v10, %v2037_v20  ;;  %v2499_v36 = vadd.f32 %v2498_v31, %v2497_v23  ;;  %v2040_v30 = vadd.f32 %v2039_v22, %v1879_v54  ;;  %v2146_v20 = vld [vmem:[%s3552_s28 + $0x78] sm:$0xff]  ;;  %v2157_v22 = vld [vmem:[%s3552_s28 + $0xd0] sm:$0xff] }
 0x1f8   : > { %v1948_v23 = vadd.f32 %v3533_v62, %v3557_v35 }
 0x1f9   : > { %v2045_v24 = vadd.f32 %v2592_v2, %v1884_v32  ;;  %2203 = vst.msk [vmem:[%s3569_s12 + $0x40] sm:$0xff] %vm509_vm0, %v2171_v34  ;;  %v1887_v41 = vadd.f32 %v2499_v36, %v3557_v35  ;;  %v2172_v42 = vadd.f32 %v2140_v29, %v2040_v30  ;;  %v1940_v29 = vadd.f32 %v3529_v59, %v3557_v35  ;;  %v2155_v36 = vld [vmem:[%s3552_s28 + $0xc0] sm:$0xff] }
 0x1fa   : > { %v1951_v30 = vadd.f32 %v3535_v0, %v3557_v35 }
 0x1fb   : > { %v2173_v44 = vadd.f32 %v2141_v38, %v2045_v24  ;;  %v2048_v45 = vadd.f32 %v2593_v28, %v1887_v41  ;;  %2204 = vst.msk [vmem:[%s3569_s12 + $0x48] sm:$0xff] %vm509_vm0, %v2172_v42  ;;  %v2596_v47 = vpop.f32.mrb[28].mxu1  ;;  %v2158_v41 = vld [vmem:[%s3552_s28 + $0xd8] sm:$0xff]  ;;  %v1943_v42 = vadd.f32 %v3531_v50, %v3557_v35 }
 0x1fc   : > { %v2052_v51 = vpop.f32.mrb[29].mxu1 }
 0x1fd   : > { %2205 = vst.msk [vmem:[%s3569_s12 + $0x50] sm:$0xff] %vm509_vm0, %v2173_v44  ;;  %v2174_v53 = vadd.f32 %v2142_v43, %v2048_v45  ;;  %v2597_v6 = vpop.f32.mrb[30].mxu1  ;;  %v2156_v45 = vld [vmem:[%s3552_s28 + $0xc8] sm:$0xff] }
 0x1fe   : > { %v2055_v48 = vpop.f32.mrb[31].mxu1 }
 0x1ff   : > { %2206 = vst.msk [vmem:[%s3569_s12 + $0x58] sm:$0xff] %vm509_vm0, %v2174_v53  ;;  %v2500_v46 = vpop.f32.mrb[24].mxu0 }
 0x200   : > { %v2501_v49 = vpop.f32.mrb[25].mxu0 }
 0x201   : > { %v2502_v26 = vadd.f32 %v2501_v49, %v2500_v46  ;;  %v2503_v16 = vpop.f32.mrb[26].mxu0 }
 0x202   : > { %v2504_v52 = vpop.f32.mrb[27].mxu0 }
 0x203   : > { %v2505_v18 = vadd.f32 %v2504_v52, %v2503_v16  ;;  %v1892_v58 = vadd.f32 %v2502_v26, %v3557_v35  ;;  %v3613_v60 = vpop.f32.mrb[32].mxu1  ;;  %v1964_v26 = vadd.f32 %v3544_v14, %v3557_v35  ;;  %v1967_v14 = vadd.f32 %v3546_v25, %v3557_v35 }
 0x204   : > { %v3616_v27 = vpop.f32.mrb[33].mxu1 }
 0x205   : > { %v2053_v33 = vadd.f32 %v2052_v51, %v1892_v58  ;;  %v1895_v61 = vadd.f32 %v2505_v18, %v3557_v35  ;;  %v3619_v39 = vpop.f32.mrb[34].mxu1  ;;  %v2161_v58 = vld [vmem:[%s3552_s28 + $0xf0] sm:$0xff] }
 0x206   : > { %v3622_v1 = vpop.f32.mrb[35].mxu1 }
 0x207   : > { %v2175_v15 = vadd.f32 %v2143_v11, %v2053_v33  ;;  %v2056_v17 = vadd.f32 %v2055_v48, %v1895_v61  ;;  %v1956_v11 = vadd.f32 %v3539_v55, %v3557_v35  ;;  %v2147_v33 = vld [vmem:[%s3552_s28 + $0x80] sm:$0xff]  ;;  %v1959_v55 = vadd.f32 %v3541_v57, %v3557_v35 }
 0x209   : > { %2207 = vst.msk [vmem:[%s3569_s12 + $0x60] sm:$0xff] %vm509_vm0, %v2175_v15  ;;  %v2176_v4 = vadd.f32 %v2144_v63, %v2056_v17  ;;  %v2159_v15 = vld [vmem:[%s3552_s28 + $0xe0] sm:$0xff] }
 0x20b   : > { %2208 = vst.msk [vmem:[%s3569_s12 + $0x68] sm:$0xff] %vm509_vm0, %v2176_v4  ;;  %v2506_v56 = vpop.f32.mrb[28].mxu0  ;;  %v3628_v3 = vpop.f32.mrb[36].mxu1 }
 0x20c   : > { %v2507_v37 = vpop.f32.mrb[29].mxu0  ;;  %v3630_v40 = vpop.f32.mrb[37].mxu1 }
 0x20d   : > { %v2508_v13 = vadd.f32 %v2507_v37, %v2506_v56  ;;  %v2509_v19 = vpop.f32.mrb[30].mxu0  ;;  %v3632_v5 = vpop.f32.mrb[38].mxu1 }
 0x20e   : > { %v2510_v7 = vpop.f32.mrb[31].mxu0  ;;  %v3634_v2 = vpop.f32.mrb[39].mxu1 }
 0x20f   : > { %v1900_v21 = vadd.f32 %v2508_v13, %v3557_v35  ;;  %v2511_v9 = vadd.f32 %v2510_v7, %v2509_v19  ;;  %v2162_v13 = vld [vmem:[%s3552_s28 + $0xf8] sm:$0xff]  ;;  %v2148_v19 = vld [vmem:[%s3552_s28 + $0x88] sm:$0xff] }
 0x211   : > { %v2061_v10 = vadd.f32 %v2596_v47, %v1900_v21  ;;  %v1903_v12 = vadd.f32 %v2511_v9, %v3557_v35  ;;  %v2160_v9 = vld [vmem:[%s3552_s28 + $0xe8] sm:$0xff] }
 0x213   : > { %v2177_v28 = vadd.f32 %v2145_v8, %v2061_v10  ;;  %v2064_v54 = vadd.f32 %v2597_v6, %v1903_v12  ;;  %v2608_v31 = vpop.f32.mrb[40].mxu1 }
 0x214   : > { %v2109_v32 = vadd.f32 %v2608_v31, %v1948_v23  ;;  %v2100_v34 = vpop.f32.mrb[41].mxu1 }
 0x215   : > { %2209 = vst.msk [vmem:[%s3569_s12 + $0x70] sm:$0xff] %vm509_vm0, %v2177_v28  ;;  %v2178_v38 = vadd.f32 %v2146_v20, %v2064_v54  ;;  %v2101_v62 = vadd.f32 %v2100_v34, %v1940_v29  ;;  %v2609_v24 = vpop.f32.mrb[42].mxu1  ;;  %v2149_v34 = vld [vmem:[%s3552_s28 + $0x90] sm:$0xff] }
 0x216   : > { %v2189_v43 = vadd.f32 %v2157_v22, %v2109_v32  ;;  %v2112_v59 = vadd.f32 %v2609_v24, %v1951_v30  ;;  %v2103_v44 = vpop.f32.mrb[43].mxu1 }
 0x217   : > { %2210 = vst.msk [vmem:[%s3569_s12 + $0x78] sm:$0xff] %vm509_vm0, %v2178_v38  ;;  %v2187_v47 = vadd.f32 %v2155_v36, %v2101_v62  ;;  %v2104_v0 = vadd.f32 %v2103_v44, %v1943_v42  ;;  %v2512_v51 = vpop.f32.mrb[32].mxu0  ;;  %v2150_v38 = vld [vmem:[%s3552_s28 + $0x98] sm:$0xff] }
 0x218   : > { %2221 = vst.msk [vmem:[%s3569_s12 + $0xd0] sm:$0xff] %vm509_vm0, %v2189_v43  ;;  %v2190_v53 = vadd.f32 %v2158_v41, %v2112_v59  ;;  %v2513_v6 = vpop.f32.mrb[33].mxu0 }
 0x219   : > { %2219 = vst.msk [vmem:[%s3569_s12 + $0xc0] sm:$0xff] %vm509_vm0, %v2187_v47  ;;  %v2188_v50 = vadd.f32 %v2156_v45, %v2104_v0  ;;  %v2514_v48 = vadd.f32 %v2513_v6, %v2512_v51  ;;  %v2515_v46 = vpop.f32.mrb[34].mxu0  ;;  %v2151_v0 = vld [vmem:[%s3552_s28 + $0xa0] sm:$0xff] }
 0x21a   : > { %2222 = vst.msk [vmem:[%s3569_s12 + $0xd8] sm:$0xff] %vm509_vm0, %v2190_v53  ;;  %v2516_v49 = vpop.f32.mrb[35].mxu0  ;;  %v2152_v53 = vld [vmem:[%s3552_s28 + $0xa8] sm:$0xff] }
 0x21b   : > { %2220 = vst.msk [vmem:[%s3569_s12 + $0xc8] sm:$0xff] %vm509_vm0, %v2188_v50  ;;  %v1908_v16 = vadd.f32 %v2514_v48, %v3557_v35  ;;  %v2517_v52 = vadd.f32 %v2516_v49, %v2515_v46  ;;  %v2612_v18 = vpop.f32.mrb[44].mxu1 }
 0x21c   : > { %v2125_v61 = vadd.f32 %v2612_v18, %v1964_v26  ;;  %v2116_v63 = vpop.f32.mrb[45].mxu1 }
 0x21d   : > { %v2069_v17 = vadd.f32 %v3616_v27, %v1908_v16  ;;  %v1911_v4 = vadd.f32 %v2517_v52, %v3557_v35  ;;  %v2117_v56 = vadd.f32 %v2116_v63, %v1956_v11  ;;  %v2613_v37 = vpop.f32.mrb[46].mxu1 }
 0x21e   : > { %v2193_v7 = vadd.f32 %v2161_v58, %v2125_v61  ;;  %v2128_v21 = vadd.f32 %v2613_v37, %v1967_v14  ;;  %v2119_v25 = vpop.f32.mrb[47].mxu1  ;;  %v2153_v58 = vld [vmem:[%s3552_s28 + $0xb0] sm:$0xff] }
 0x21f   : > { %v2179_v8 = vadd.f32 %v2147_v33, %v2069_v17  ;;  %v2072_v27 = vadd.f32 %v3622_v1, %v1911_v4  ;;  %v2191_v10 = vadd.f32 %v2159_v15, %v2117_v56  ;;  %v2120_v12 = vadd.f32 %v2119_v25, %v1959_v55  ;;  %v2154_v33 = vld [vmem:[%s3552_s28 + $0xb8] sm:$0xff] }
 0x220   : > { %2225 = vst.msk [vmem:[%s3569_s12 + $0xf0] sm:$0xff] %vm509_vm0, %v2193_v7  ;;  %v2194_v20 = vadd.f32 %v2162_v13, %v2128_v21 }
 0x221   : > { %2211 = vst.msk [vmem:[%s3569_s12 + $0x80] sm:$0xff] %vm509_vm0, %v2179_v8  ;;  %v2180_v57 = vadd.f32 %v2148_v19, %v2072_v27  ;;  %2223 = vst.msk [vmem:[%s3569_s12 + $0xe0] sm:$0xff] %vm509_vm0, %v2191_v10  ;;  %v2192_v23 = vadd.f32 %v2160_v9, %v2120_v12 }
 0x222   : > { %2226 = vst.msk [vmem:[%s3569_s12 + $0xf8] sm:$0xff] %vm509_vm0, %v2194_v20 }
 0x223   : > { %2212 = vst.msk [vmem:[%s3569_s12 + $0x88] sm:$0xff] %vm509_vm0, %v2180_v57  ;;  %2224 = vst.msk [vmem:[%s3569_s12 + $0xe8] sm:$0xff] %vm509_vm0, %v2192_v23  ;;  %v2518_v1 = vpop.f32.mrb[36].mxu0 }
 0x224   : > { %v2519_v28 = vpop.f32.mrb[37].mxu0 }
 0x225   : > { %v2520_v54 = vadd.f32 %v2519_v28, %v2518_v1  ;;  %v2521_v31 = vpop.f32.mrb[38].mxu0 }
 0x226   : > { %v2522_v22 = vpop.f32.mrb[39].mxu0 }
 0x227   : > { %v1916_v29 = vadd.f32 %v2520_v54, %v3557_v35  ;;  %v2523_v32 = vadd.f32 %v2522_v22, %v2521_v31 }
 0x229   : > { %v2077_v36 = vadd.f32 %v3613_v60, %v1916_v29  ;;  %v1919_v30 = vadd.f32 %v2523_v32, %v3557_v35 }
 0x22b   : > { %v2181_v62 = vadd.f32 %v2149_v34, %v2077_v36  ;;  %v2080_v24 = vadd.f32 %v3619_v39, %v1919_v30 }
 0x22d   : > { %2213 = vst.msk [vmem:[%s3569_s12 + $0x90] sm:$0xff] %vm509_vm0, %v2181_v62  ;;  %v2182_v41 = vadd.f32 %v2150_v38, %v2080_v24 }
 0x22f   : > { %2214 = vst.msk [vmem:[%s3569_s12 + $0x98] sm:$0xff] %vm509_vm0, %v2182_v41  ;;  %v2524_v42 = vpop.f32.mrb[40].mxu0 }
 0x230   : > { %v2525_v43 = vpop.f32.mrb[41].mxu0 }
 0x231   : > { %v2526_v59 = vadd.f32 %v2525_v43, %v2524_v42  ;;  %v2527_v44 = vpop.f32.mrb[42].mxu0 }
 0x232   : > { %v2528_v45 = vpop.f32.mrb[43].mxu0 }
 0x233   : > { %v1924_v60 = vadd.f32 %v2526_v59, %v3557_v35  ;;  %v2529_v47 = vadd.f32 %v2528_v45, %v2527_v44 }
 0x235   : > { %v2085_v51 = vadd.f32 %v3630_v40, %v1924_v60  ;;  %v1927_v39 = vadd.f32 %v2529_v47, %v3557_v35 }
 0x237   : > { %v2183_v6 = vadd.f32 %v2151_v0, %v2085_v51  ;;  %v2088_v50 = vadd.f32 %v3634_v2, %v1927_v39 }
 0x239   : > { %2215 = vst.msk [vmem:[%s3569_s12 + $0xa0] sm:$0xff] %vm509_vm0, %v2183_v6  ;;  %v2184_v48 = vadd.f32 %v2152_v53, %v2088_v50 }
 0x23b   : > { %2216 = vst.msk [vmem:[%s3569_s12 + $0xa8] sm:$0xff] %vm509_vm0, %v2184_v48  ;;  %v2530_v46 = vpop.f32.mrb[44].mxu0 }
 0x23c   : > { %v2531_v49 = vpop.f32.mrb[45].mxu0 }
 0x23d   : > { %v2532_v26 = vadd.f32 %v2531_v49, %v2530_v46  ;;  %v2533_v16 = vpop.f32.mrb[46].mxu0 }
 0x23e   : > { %v2534_v40 = vpop.f32.mrb[47].mxu0 }
 0x23f   : > { %v1932_v52 = vadd.f32 %v2532_v26, %v3557_v35  ;;  %v2535_v18 = vadd.f32 %v2534_v40, %v2533_v16 }
 0x241   : > { %v2093_v2 = vadd.f32 %v3628_v3, %v1932_v52  ;;  %v1935_v11 = vadd.f32 %v2535_v18, %v3557_v35 }
 0x243   : > { %v2185_v61 = vadd.f32 %v2153_v58, %v2093_v2  ;;  %v2096_v63 = vadd.f32 %v3632_v5, %v1935_v11 }
 0x245   : > { %2217 = vst.msk [vmem:[%s3569_s12 + $0xb0] sm:$0xff] %vm509_vm0, %v2185_v61  ;;  %v2186_v3 = vadd.f32 %v2154_v33, %v2096_v63 }
 0x247   : > { %2218 = vst.msk [vmem:[%s3569_s12 + $0xb8] sm:$0xff] %vm509_vm0, %v2186_v3 }
 0x248   : > { %2706 = shalt.err (!%p2703_p3)
}
 0x249   : > { %s2707_s15 = scalar_lea.hbm %s3725_s18, 4096  ;;  %s2711_s9 = scalar_lea.hbm %s3782_s6, 8192 }
 0x24a   : > { %p2708_p4 = scmp.ne.s32.totalorder %s3725_s18, %s2707_s15  ;;  %p2712_p9 = scmp.lt.u32.totalorder %s3725_s18, %s3782_s6 }
 0x24b   : > { %p2713_p10 = scmp.lt.u32.totalorder %s2711_s9, %s2707_s15  ;;  %p2715_p12 = scmp.lt.u32.totalorder %s2707_s15, %s3725_s18 }
 0x24c   : > { %p2709_p7 = pnand %p2708_p4, %p2837_p5 }
 0x24d   : > { %p2714_p11 = por %p2713_p10, %p2712_p9 }
 0x24e   : > { %p2710_p8 = pneg %p2709_p7 }
 0x24f   : > { %p2716_p13 = por %p2715_p12, %p2714_p11 }
 0x251   : > { %p2717_p0 = pnand %p2716_p13, %p2710_p8 }
 0x253   : > { %2720 = shalt.err (!%p2717_p0)
}
 0x254   : > { %s2762_s13 = smov 128   ;;  %s2763_s10 = smov 8  }
 0x255   : > { %2630 = dma.vmem_to_hbm [thread:$0]  (%p2837_p5), %s3727_s16, 4096, %s3725_s18, %s3735_s25, %s2762_s13, %s2762_s13, %s2763_s10  }
 0x256 PF: > { %p2636_p1 = scmp.ge.s32.totalorder %s2755_s24, 2  ;;  %s2256_s17 = sand.u32 1, %s2743_s21  }
 0x257   : > { %s2257_s20 = scalar_lea.sflag [#allocation5], %s2256_s17 }
 0x258   : > { %p2633_p2 = pnand %p2636_p1, %p2841_p6 }
 0x25a   : > { %2738 = dma.done.wait (!%p2633_p2), %s2257_s20, 4096  }
 0x25b   : > { %2740 = vsyncadd (!%p2633_p2), %s2257_s20, 4294963200  ;;  %p16_p3 = scmp.ge.s32.totalorder %s2824_s27, 4   ;;  %s3785_s21 = smov %s2747_s22 }
 0x25c   : > { %s3786_s22 = smov %s2751_s23  ;;  %s3787_s23 = smov %s2835_s30 }
 0x25d   : > { %s3788_s24 = smov %s2824_s27  ;;  %18 = sbr.rel (!%p16_p3) target bundleno = 3 (0x3), region = 84 }
 0x264   :  { %2262 = vsyncpa [#allocation5], 1 }
 0x265   :  { %2264 = vsyncpa [#allocation5 + $0x1], 1 }

</bundles_post_ra>
